<compile_context>
chip_gen: v6e
topology: v6e:2x2x1
jax: 0.10.0
libtpu: 0.0.40
codegen_flags: <defaults>
</compile_context>

<pallas_src>
import numpy as np
import jax
import jax.numpy as jnp
from jax import lax
from jax.experimental import pallas as pl
from jax.experimental.pallas import tpu as pltpu


def _gelu(x):
    # TODO(synk): torch.nn.GELU() defaults to the exact erf formulation; the
    # tanh approximation is used here because it lowers reliably on Mosaic
    # (max abs deviation ~1e-3).  The pure-JAX reference below uses the same.
    return jax.nn.gelu(x, approximate=True)


def joint_decoder_kernel(lens_ref, x_ref, wht_ref, bht_ref, uhh_ref, utc_ref,
                         norm_ref, pred_ref, s_buf):
    """One batch element per grid step.

    lens_ref : (B,) int32 in SMEM (scalar prefetch) -- valid token counts
    x_ref    : (1, S, E)     encoder reprs for this batch element
    wht_ref  : (E, 2M)       [head | tail] MLP weights, fused
    bht_ref  : (1, 2M)       [head | tail] MLP biases
    uhh_ref  : (O*M, M+1)    U[:, :M, :]  (row = o*M + i; last col = head bias)
    utc_ref  : (O, M+1)      U[:,  M, :]  (tail-bias row + constant)
    norm_ref : (1, O, S, S)  normalized joint score, boxy layout (bf16)
    pred_ref : (1, S, S)     argmax label preds (int32)
    s_buf    : (O, S, S) f32 VMEM scratch staging per-label score slices
    """
    num_labels = utc_ref.shape[0]
    mlp_dim = utc_ref.shape[1] - 1
    x = x_ref[0]                                               # (S, E)
    seq = x.shape[0]

    # ---- fused head/tail MLP: one MXU GEMM, 2M output lanes ---------------
    ht = _gelu(jnp.dot(x, wht_ref[...], preferred_element_type=jnp.float32)
               + bht_ref[...])                                 # (S, 2M)
    h = ht[:, :mlp_dim]                                        # (S, M)
    t_aug = jnp.concatenate(
        [ht[:, mlp_dim:], jnp.ones((seq, 1), jnp.float32)], axis=-1)  # (S, M+1)

    # ---- tail-side contraction: ONE big GEMM, lane dim = S ----------------
    #   c[o*M + i, y] = sum_j U[o,i,j] t[y,j] + U[o,i,M]   (head bias folded in)
    c = lax.dot_general(uhh_ref[...], t_aug, (((1,), (1,)), ((), ())),
                        preferred_element_type=jnp.float32)    # (O*M, S)
    #   tb[o, y] = sum_j U[o,M,j] t[y,j] + U[o,M,M]         (tail bias + const)
    tb = lax.dot_general(utc_ref[...], t_aug, (((1,), (1,)), ((), ())),
                         preferred_element_type=jnp.float32)   # (O, S)

    # ---- in-kernel joint_label_matrix_mask from tokens_lens ---------------
    n_valid = lens_ref[pl.program_id(0)]
    row_ids = lax.broadcasted_iota(jnp.int32, (seq, seq), 0)
    col_ids = lax.broadcasted_iota(jnp.int32, (seq, seq), 1)
    valid = jnp.logical_and(row_ids < n_valid, col_ids < n_valid)
    maskf = valid.astype(jnp.float32)

    # ---- pass 1: per-label score slice -> VMEM scratch; fused max/argmax --
    m = None
    best = None
    for o in range(num_labels):                                # static unroll, O small
        c_o = c[o * mlp_dim:(o + 1) * mlp_dim, :]              # (M, S) aligned slice
        s_o = jnp.dot(h, c_o, preferred_element_type=jnp.float32)  # (S, S)
        s_o = s_o + tb[o:o + 1, :]                             # (1,S) sublane bcast
        s_buf[o] = s_o
        if o == 0:
            m = s_o
            best = jnp.zeros((seq, seq), jnp.int32)
        else:
            take = s_o > m
            m = jnp.where(take, s_o, m)
            best = jnp.where(take, jnp.int32(o), best)

    # ---- pass 2: exp + denominator ----------------------------------------
    denom = jnp.zeros((seq, seq), jnp.float32)
    for o in range(num_labels):
        e_o = jnp.exp(s_buf[o] - m)
        denom = denom + e_o
        s_buf[o] = e_o

    # ---- pass 3: normalize, mask, store bf16 + preds -----------------------
    scale = pl.reciprocal(denom, approx=False) * maskf
    for o in range(num_labels):
        norm_ref[0, o] = (s_buf[o] * scale).astype(norm_ref.dtype)
    # softmax is monotone per cell, so argmax(norm) == argmax(s) on unmasked
    # cells; masked cells are all-zero rows -> label 0 (matches torch.argmax).
    pred_ref[0] = jnp.where(valid, best, jnp.int32(0))


def ent_rel_joint_decoder_forward(x, wh, bh, wt, bt, U, tokens_lens,
                                  norm_dtype=jnp.bfloat16):
    """Inference-path forward of EntRelJointDecoder (given encoder reprs).

    Returns:
      normalized_joint_score in the kernel-native "boxy" layout [B, O, S, S]
        (index [b, o, x, y]; == torch's einsum result BEFORE .permute(0,2,3,1)),
        stored as `norm_dtype` (default bfloat16).
      joint_label_preds [B, S, S] int32.

    The raw (pre-softmax) joint score is only needed by the training losses
    and is intentionally not written back on this path.
    # TODO(synk): training losses and the data-dependent soft/hard joint
    # decoding span loops are not kernelized.
    """
    B, S, E = x.shape
    M = wh.shape[1]
    O = U.shape[0]
    assert U.shape == (O, M + 1, M + 1)

    # Batch-invariant weight repacking (done once, outside the kernel).
    wht = jnp.concatenate([wh, wt], axis=1)              # (E, 2M) fused MLP weight
    bht = jnp.concatenate([bh, bt], axis=0)[None, :]     # (1, 2M) fused MLP bias
    uhh_r = U[:, :M, :].reshape(O * M, M + 1)            # rows o*M+i; col M = head bias
    utc = U[:, M, :]                                     # (O, M+1) tail bias + const
    lens = tokens_lens.astype(jnp.int32)

    # TODO(synk): for production shapes (S >= 512) add a grid axis tiling the
    # query rows (keeps both v7x TensorCores busy at B == 1 and keeps output
    # blocks under v7x's 64 MiB VMEM), raise vmem_limit_bytes on v6e, and mark
    # the constant-index weight specs single-buffered (pipeline_mode=pl.Buffered(1)).

    out_shapes = (
        jax.ShapeDtypeStruct((B, O, S, S), norm_dtype),
        jax.ShapeDtypeStruct((B, S, S), jnp.int32),
    )
    grid_spec = pltpu.PrefetchScalarGridSpec(
        num_scalar_prefetch=1,
        grid=(B,),
        in_specs=[
            pl.BlockSpec((1, S, E), lambda b, lens: (b, 0, 0)),
            pl.BlockSpec((E, 2 * M), lambda b, lens: (0, 0)),
            pl.BlockSpec((1, 2 * M), lambda b, lens: (0, 0)),
            pl.BlockSpec((O * M, M + 1), lambda b, lens: (0, 0)),
            pl.BlockSpec((O, M + 1), lambda b, lens: (0, 0)),
        ],
        out_specs=[
            pl.BlockSpec((1, O, S, S), lambda b, lens: (b, 0, 0, 0)),
            pl.BlockSpec((1, S, S), lambda b, lens: (b, 0, 0)),
        ],
        scratch_shapes=[pltpu.VMEM((O, S, S), jnp.float32)],
    )
    norm_boxy, preds = pl.pallas_call(
        joint_decoder_kernel,
        out_shape=out_shapes,
        grid_spec=grid_spec,
        compiler_params=pltpu.CompilerParams(dimension_semantics=("parallel",)),
    )(lens, x, wht, bht, uhh_r, utc)
    return norm_boxy, preds


def _reference_forward(x, wh, bh, wt, bt, U, tokens_lens):
    """Pure-JAX re-statement of the PyTorch eval forward, in boxy layout."""
    B, S, _ = x.shape
    h = _gelu(jnp.einsum('bse,em->bsm', x, wh) + bh)
    h = jnp.concatenate([h, jnp.ones_like(h[..., :1])], axis=-1)
    t = _gelu(jnp.einsum('bse,em->bsm', x, wt) + bt)
    t = jnp.concatenate([t, jnp.ones_like(t[..., :1])], axis=-1)
    score = jnp.einsum('bxi,oij,byj->boxy', h, U, t)             # (B,O,S,S)
    pos = jnp.arange(S)
    valid = pos[None, :] < tokens_lens[:, None]                  # (B,S)
    mask = valid[:, :, None] & valid[:, None, :]                 # (B,S,S)
    norm = jax.nn.softmax(score, axis=1) * mask[:, None, :, :].astype(jnp.float32)
    preds = jnp.argmax(norm, axis=1).astype(jnp.int32)
    return norm, preds, mask


if __name__ == "__main__":
    # batch, seq, encoder hidden, mlp hidden, #ent_rel labels.
    # S = 128 keeps the last block dimension lane-dense (unmasked vst runs).
    B, S, E, M, O = 2, 128, 32, 32, 8

    key = jax.random.PRNGKey(0)
    kx, kwh, kbh, kwt, kbt, ku = jax.random.split(key, 6)

    x = jax.random.normal(kx, (B, S, E), dtype=jnp.float32)
    wh = jax.random.normal(kwh, (E, M), dtype=jnp.float32) * 0.1
    bh = jax.random.normal(kbh, (M,), dtype=jnp.float32) * 0.1
    wt = jax.random.normal(kwt, (E, M), dtype=jnp.float32) * 0.1
    bt = jax.random.normal(kbt, (M,), dtype=jnp.float32) * 0.1
    # NOTE: the PyTorch module zero-initializes U; small random values here so
    # the kernel exercises a non-trivial biaffine score.
    U = jax.random.normal(ku, (O, M + 1, M + 1), dtype=jnp.float32) * 0.2

    # tokens_lens defines joint_label_matrix_mask = valid x valid positions.
    tokens_lens = jnp.array([100, 77], dtype=jnp.int32)

    norm, preds = ent_rel_joint_decoder_forward(x, wh, bh, wt, bt, U, tokens_lens)
    jax.block_until_ready((norm, preds))

    ref_norm, ref_preds, mask = _reference_forward(x, wh, bh, wt, bt, U, tokens_lens)

    norm_np = np.asarray(norm.astype(jnp.float32))
    preds_np = np.asarray(preds)
    ref_norm_np = np.asarray(ref_norm)
    ref_preds_np = np.asarray(ref_preds)
    mask_np = np.asarray(mask)

    # Normalized scores are stored as bf16 -> ~4e-3 absolute tolerance.
    assert np.allclose(norm_np, ref_norm_np, atol=5e-3), "normalized score mismatch"

    # Argmax check, robust to float-level near-ties between label scores:
    # the score of the chosen label must equal the best score, masked cells
    # must be label 0, and the vast majority must match exactly.
    chosen = np.take_along_axis(ref_norm_np, preds_np[:, None, :, :], axis=1)[:, 0]
    best = ref_norm_np.max(axis=1)
    assert np.allclose(chosen, best, atol=1e-5), "pred mismatch (beyond near-tie tolerance)"
    assert np.all(preds_np[~mask_np] == 0), "masked preds must be 0"
    assert np.mean(preds_np == ref_preds_np) > 0.999, "too many pred mismatches"

    print("KERNEL_OK")
</pallas_src>

<mosaic_0001>
module attributes {stable_mosaic.version = 11 : i64} {
  func.func @joint_decoder_kernel(%arg0: i32, %arg1: memref<2xi32, #tpu.memory_space<smem>>, %arg2: memref<1x128x32xf32, #tpu.memory_space<vmem>>, %arg3: memref<32x64xf32, #tpu.memory_space<vmem>>, %arg4: memref<1x64xf32, #tpu.memory_space<vmem>>, %arg5: memref<256x33xf32, #tpu.memory_space<vmem>>, %arg6: memref<8x33xf32, #tpu.memory_space<vmem>>, %arg7: memref<1x8x128x128xbf16, #tpu.memory_space<vmem>>, %arg8: memref<1x128x128xi32, #tpu.memory_space<vmem>>, %arg9: memref<8x128x128xf32, #tpu.memory_space<vmem>>) attributes {dimension_semantics = [#tpu.dimension_semantics<parallel>], iteration_bounds = array<i64: 2>, scalar_prefetch = 1 : i64, scratch_operands = 1 : i64, tpu.core_type = #tpu.core_type<tc>, window_params = [{transform_indices = @transform_0, window_bounds = array<i64: 1, 128, 32>}, {pipeline_mode = #tpu.pipeline_mode<synchronous>, transform_indices = @transform_1, window_bounds = array<i64: 32, 64>}, {pipeline_mode = #tpu.pipeline_mode<synchronous>, transform_indices = @transform_2, window_bounds = array<i64: 1, 64>}, {pipeline_mode = #tpu.pipeline_mode<synchronous>, transform_indices = @transform_3, window_bounds = array<i64: 256, 33>}, {pipeline_mode = #tpu.pipeline_mode<synchronous>, transform_indices = @transform_4, window_bounds = array<i64: 8, 33>}, {transform_indices = @transform_5, window_bounds = array<i64: 1, 8, 128, 128>}, {transform_indices = @transform_6, window_bounds = array<i64: 1, 128, 128>}]} {
    %c0 = arith.constant 0 : index
    %c0_0 = arith.constant 0 : index
    %c0_1 = arith.constant 0 : index
    %0 = vector.load %arg2[%c0, %c0_0, %c0_1] : memref<1x128x32xf32, #tpu.memory_space<vmem>>, vector<1x128x32xf32>
    %1 = vector.shape_cast %0 : vector<1x128x32xf32> to vector<128x32xf32>
    %c0_2 = arith.constant 0 : index
    %c0_3 = arith.constant 0 : index
    %2 = vector.load %arg3[%c0_2, %c0_3] : memref<32x64xf32, #tpu.memory_space<vmem>>, vector<32x64xf32>
    %cst = arith.constant dense<0.000000e+00> : vector<128x64xf32>
    %3 = tpu.matmul %1, %2, %cst {dimension_numbers = #tpu.dot_dimension_numbers<[1], [0], [0], [1], [0, 0, 1, 1], [], []>} : vector<128x32xf32>, vector<32x64xf32>, vector<128x64xf32> -> vector<128x64xf32>
    %c0_4 = arith.constant 0 : index
    %c0_5 = arith.constant 0 : index
    %4 = vector.load %arg4[%c0_4, %c0_5] : memref<1x64xf32, #tpu.memory_space<vmem>>, vector<1x64xf32>
    %5 = vector.broadcast %4 : vector<1x64xf32> to vector<128x64xf32>
    %6 = arith.addf %3, %5 : vector<128x64xf32>
    %7 = arith.mulf %6, %6 : vector<128x64xf32>
    %8 = arith.mulf %6, %7 : vector<128x64xf32>
    %cst_6 = arith.constant 4.471500e-02 : f32
    %9 = vector.broadcast %cst_6 : f32 to vector<128x64xf32>
    %10 = arith.mulf %9, %8 : vector<128x64xf32>
    %11 = arith.addf %6, %10 : vector<128x64xf32>
    %cst_7 = arith.constant 0.797884583 : f32
    %12 = vector.broadcast %cst_7 : f32 to vector<128x64xf32>
    %13 = arith.mulf %12, %11 : vector<128x64xf32>
    %14 = math.tanh %13 : vector<128x64xf32>
    %cst_8 = arith.constant 1.000000e+00 : f32
    %15 = vector.broadcast %cst_8 : f32 to vector<128x64xf32>
    %16 = arith.addf %15, %14 : vector<128x64xf32>
    %cst_9 = arith.constant 5.000000e-01 : f32
    %17 = vector.broadcast %cst_9 : f32 to vector<128x64xf32>
    %18 = arith.mulf %17, %16 : vector<128x64xf32>
    %19 = arith.mulf %6, %18 : vector<128x64xf32>
    %20 = vector.extract_strided_slice %19 {offsets = [0, 0], sizes = [128, 32], strides = [1, 1]} : vector<128x64xf32> to vector<128x32xf32>
    %21 = vector.extract_strided_slice %19 {offsets = [0, 32], sizes = [128, 32], strides = [1, 1]} : vector<128x64xf32> to vector<128x32xf32>
    %cst_10 = arith.constant 1.000000e+00 : f32
    %22 = vector.broadcast %cst_10 : f32 to vector<128x1xf32>
    %23 = tpu.concatenate %21, %22 in 1 : vector<128x32xf32>, vector<128x1xf32> -> vector<128x33xf32>
    %c0_11 = arith.constant 0 : index
    %c0_12 = arith.constant 0 : index
    %24 = vector.load %arg5[%c0_11, %c0_12] : memref<256x33xf32, #tpu.memory_space<vmem>>, vector<256x33xf32>
    %cst_13 = arith.constant dense<0.000000e+00> : vector<256x128xf32>
    %25 = tpu.matmul %24, %23, %cst_13 {dimension_numbers = #tpu.dot_dimension_numbers<[1], [1], [0], [0], [0, 0, 1, 0], [], []>} : vector<256x33xf32>, vector<128x33xf32>, vector<256x128xf32> -> vector<256x128xf32>
    %c0_14 = arith.constant 0 : index
    %c0_15 = arith.constant 0 : index
    %26 = vector.load %arg6[%c0_14, %c0_15] : memref<8x33xf32, #tpu.memory_space<vmem>>, vector<8x33xf32>
    %cst_16 = arith.constant dense<0.000000e+00> : vector<8x128xf32>
    %27 = tpu.matmul %26, %23, %cst_16 {dimension_numbers = #tpu.dot_dimension_numbers<[1], [1], [0], [0], [0, 0, 1, 0], [], []>} : vector<8x33xf32>, vector<128x33xf32>, vector<8x128xf32> -> vector<8x128xf32>
    %28 = arith.index_cast %arg0 : i32 to index
    %29 = memref.load %arg1[%28] : memref<2xi32, #tpu.memory_space<smem>>
    %30 = tpu.iota {dimensions = array<i32: 0>} : vector<128x128xi32>
    %31 = tpu.iota {dimensions = array<i32: 1>} : vector<128x128xi32>
    %32 = vector.broadcast %29 : i32 to vector<128x128xi32>
    %33 = arith.cmpi slt, %30, %32 : vector<128x128xi32>
    %34 = vector.broadcast %29 : i32 to vector<128x128xi32>
    %35 = arith.cmpi slt, %31, %34 : vector<128x128xi32>
    %36 = arith.andi %33, %35 : vector<128x128xi1>
    %37 = arith.extui %36 : vector<128x128xi1> to vector<128x128xi32>
    %38 = arith.sitofp %37 : vector<128x128xi32> to vector<128x128xf32>
    %39 = vector.extract_strided_slice %25 {offsets = [0, 0], sizes = [32, 128], strides = [1, 1]} : vector<256x128xf32> to vector<32x128xf32>
    %cst_17 = arith.constant dense<0.000000e+00> : vector<128x128xf32>
    %40 = tpu.matmul %20, %39, %cst_17 {dimension_numbers = #tpu.dot_dimension_numbers<[1], [0], [0], [1], [0, 0, 1, 1], [], []>} : vector<128x32xf32>, vector<32x128xf32>, vector<128x128xf32> -> vector<128x128xf32>
    %41 = vector.extract_strided_slice %27 {offsets = [0, 0], sizes = [1, 128], strides = [1, 1]} : vector<8x128xf32> to vector<1x128xf32>
    %42 = vector.broadcast %41 : vector<1x128xf32> to vector<128x128xf32>
    %43 = arith.addf %40, %42 : vector<128x128xf32>
    %c0_18 = arith.constant 0 : index
    %c0_19 = arith.constant 0 : index
    %c0_20 = arith.constant 0 : index
    %44 = vector.load %arg9[%c0_18, %c0_19, %c0_20] : memref<8x128x128xf32, #tpu.memory_space<vmem>>, vector<1x128x128xf32>
    %45 = vector.shape_cast %44 : vector<1x128x128xf32> to vector<128x128xf32>
    %46 = vector.shape_cast %43 : vector<128x128xf32> to vector<1x128x128xf32>
    tpu.vector_store %arg9[%c0_18, %c0_19, %c0_20], %46 {strides = array<i32>} : memref<8x128x128xf32, #tpu.memory_space<vmem>>, vector<1x128x128xf32>,
    %c0_i32 = arith.constant 0 : i32
    %47 = vector.broadcast %c0_i32 : i32 to vector<128x128xi32>
    %48 = vector.extract_strided_slice %25 {offsets = [32, 0], sizes = [32, 128], strides = [1, 1]} : vector<256x128xf32> to vector<32x128xf32>
    %cst_21 = arith.constant dense<0.000000e+00> : vector<128x128xf32>
    %49 = tpu.matmul %20, %48, %cst_21 {dimension_numbers = #tpu.dot_dimension_numbers<[1], [0], [0], [1], [0, 0, 1, 1], [], []>} : vector<128x32xf32>, vector<32x128xf32>, vector<128x128xf32> -> vector<128x128xf32>
    %50 = vector.extract_strided_slice %27 {offsets = [1, 0], sizes = [1, 128], strides = [1, 1]} : vector<8x128xf32> to vector<1x128xf32>
    %51 = vector.broadcast %50 : vector<1x128xf32> to vector<128x128xf32>
    %52 = arith.addf %49, %51 : vector<128x128xf32>
    %c1 = arith.constant 1 : index
    %c0_22 = arith.constant 0 : index
    %c0_23 = arith.constant 0 : index
    %53 = vector.load %arg9[%c1, %c0_22, %c0_23] : memref<8x128x128xf32, #tpu.memory_space<vmem>>, vector<1x128x128xf32>
    %54 = vector.shape_cast %53 : vector<1x128x128xf32> to vector<128x128xf32>
    %55 = vector.shape_cast %52 : vector<128x128xf32> to vector<1x128x128xf32>
    tpu.vector_store %arg9[%c1, %c0_22, %c0_23], %55 {strides = array<i32>} : memref<8x128x128xf32, #tpu.memory_space<vmem>>, vector<1x128x128xf32>,
    %56 = arith.cmpf ogt, %52, %43 : vector<128x128xf32>
    %57 = arith.select %56, %52, %43 : vector<128x128xi1>, vector<128x128xf32>
    %c1_i32 = arith.constant 1 : i32
    %58 = vector.broadcast %c1_i32 : i32 to vector<128x128xi32>
    %59 = arith.select %56, %58, %47 : vector<128x128xi1>, vector<128x128xi32>
    %60 = vector.extract_strided_slice %25 {offsets = [64, 0], sizes = [32, 128], strides = [1, 1]} : vector<256x128xf32> to vector<32x128xf32>
    %cst_24 = arith.constant dense<0.000000e+00> : vector<128x128xf32>
    %61 = tpu.matmul %20, %60, %cst_24 {dimension_numbers = #tpu.dot_dimension_numbers<[1], [0], [0], [1], [0, 0, 1, 1], [], []>} : vector<128x32xf32>, vector<32x128xf32>, vector<128x128xf32> -> vector<128x128xf32>
    %62 = vector.extract_strided_slice %27 {offsets = [2, 0], sizes = [1, 128], strides = [1, 1]} : vector<8x128xf32> to vector<1x128xf32>
    %63 = vector.broadcast %62 : vector<1x128xf32> to vector<128x128xf32>
    %64 = arith.addf %61, %63 : vector<128x128xf32>
    %c2 = arith.constant 2 : index
    %c0_25 = arith.constant 0 : index
    %c0_26 = arith.constant 0 : index
    %65 = vector.load %arg9[%c2, %c0_25, %c0_26] : memref<8x128x128xf32, #tpu.memory_space<vmem>>, vector<1x128x128xf32>
    %66 = vector.shape_cast %65 : vector<1x128x128xf32> to vector<128x128xf32>
    %67 = vector.shape_cast %64 : vector<128x128xf32> to vector<1x128x128xf32>
    tpu.vector_store %arg9[%c2, %c0_25, %c0_26], %67 {strides = array<i32>} : memref<8x128x128xf32, #tpu.memory_space<vmem>>, vector<1x128x128xf32>,
    %68 = arith.cmpf ogt, %64, %57 : vector<128x128xf32>
    %69 = arith.select %68, %64, %57 : vector<128x128xi1>, vector<128x128xf32>
    %c2_i32 = arith.constant 2 : i32
    %70 = vector.broadcast %c2_i32 : i32 to vector<128x128xi32>
    %71 = arith.select %68, %70, %59 : vector<128x128xi1>, vector<128x128xi32>
    %72 = vector.extract_strided_slice %25 {offsets = [96, 0], sizes = [32, 128], strides = [1, 1]} : vector<256x128xf32> to vector<32x128xf32>
    %cst_27 = arith.constant dense<0.000000e+00> : vector<128x128xf32>
    %73 = tpu.matmul %20, %72, %cst_27 {dimension_numbers = #tpu.dot_dimension_numbers<[1], [0], [0], [1], [0, 0, 1, 1], [], []>} : vector<128x32xf32>, vector<32x128xf32>, vector<128x128xf32> -> vector<128x128xf32>
    %74 = vector.extract_strided_slice %27 {offsets = [3, 0], sizes = [1, 128], strides = [1, 1]} : vector<8x128xf32> to vector<1x128xf32>
    %75 = vector.broadcast %74 : vector<1x128xf32> to vector<128x128xf32>
    %76 = arith.addf %73, %75 : vector<128x128xf32>
    %c3 = arith.constant 3 : index
    %c0_28 = arith.constant 0 : index
    %c0_29 = arith.constant 0 : index
    %77 = vector.load %arg9[%c3, %c0_28, %c0_29] : memref<8x128x128xf32, #tpu.memory_space<vmem>>, vector<1x128x128xf32>
    %78 = vector.shape_cast %77 : vector<1x128x128xf32> to vector<128x128xf32>
    %79 = vector.shape_cast %76 : vector<128x128xf32> to vector<1x128x128xf32>
    tpu.vector_store %arg9[%c3, %c0_28, %c0_29], %79 {strides = array<i32>} : memref<8x128x128xf32, #tpu.memory_space<vmem>>, vector<1x128x128xf32>,
    %80 = arith.cmpf ogt, %76, %69 : vector<128x128xf32>
    %81 = arith.select %80, %76, %69 : vector<128x128xi1>, vector<128x128xf32>
    %c3_i32 = arith.constant 3 : i32
    %82 = vector.broadcast %c3_i32 : i32 to vector<128x128xi32>
    %83 = arith.select %80, %82, %71 : vector<128x128xi1>, vector<128x128xi32>
    %84 = vector.extract_strided_slice %25 {offsets = [128, 0], sizes = [32, 128], strides = [1, 1]} : vector<256x128xf32> to vector<32x128xf32>
    %cst_30 = arith.constant dense<0.000000e+00> : vector<128x128xf32>
    %85 = tpu.matmul %20, %84, %cst_30 {dimension_numbers = #tpu.dot_dimension_numbers<[1], [0], [0], [1], [0, 0, 1, 1], [], []>} : vector<128x32xf32>, vector<32x128xf32>, vector<128x128xf32> -> vector<128x128xf32>
    %86 = vector.extract_strided_slice %27 {offsets = [4, 0], sizes = [1, 128], strides = [1, 1]} : vector<8x128xf32> to vector<1x128xf32>
    %87 = vector.broadcast %86 : vector<1x128xf32> to vector<128x128xf32>
    %88 = arith.addf %85, %87 : vector<128x128xf32>
    %c4 = arith.constant 4 : index
    %c0_31 = arith.constant 0 : index
    %c0_32 = arith.constant 0 : index
    %89 = vector.load %arg9[%c4, %c0_31, %c0_32] : memref<8x128x128xf32, #tpu.memory_space<vmem>>, vector<1x128x128xf32>
    %90 = vector.shape_cast %89 : vector<1x128x128xf32> to vector<128x128xf32>
    %91 = vector.shape_cast %88 : vector<128x128xf32> to vector<1x128x128xf32>
    tpu.vector_store %arg9[%c4, %c0_31, %c0_32], %91 {strides = array<i32>} : memref<8x128x128xf32, #tpu.memory_space<vmem>>, vector<1x128x128xf32>,
    %92 = arith.cmpf ogt, %88, %81 : vector<128x128xf32>
    %93 = arith.select %92, %88, %81 : vector<128x128xi1>, vector<128x128xf32>
    %c4_i32 = arith.constant 4 : i32
    %94 = vector.broadcast %c4_i32 : i32 to vector<128x128xi32>
    %95 = arith.select %92, %94, %83 : vector<128x128xi1>, vector<128x128xi32>
    %96 = vector.extract_strided_slice %25 {offsets = [160, 0], sizes = [32, 128], strides = [1, 1]} : vector<256x128xf32> to vector<32x128xf32>
    %cst_33 = arith.constant dense<0.000000e+00> : vector<128x128xf32>
    %97 = tpu.matmul %20, %96, %cst_33 {dimension_numbers = #tpu.dot_dimension_numbers<[1], [0], [0], [1], [0, 0, 1, 1], [], []>} : vector<128x32xf32>, vector<32x128xf32>, vector<128x128xf32> -> vector<128x128xf32>
    %98 = vector.extract_strided_slice %27 {offsets = [5, 0], sizes = [1, 128], strides = [1, 1]} : vector<8x128xf32> to vector<1x128xf32>
    %99 = vector.broadcast %98 : vector<1x128xf32> to vector<128x128xf32>
    %100 = arith.addf %97, %99 : vector<128x128xf32>
    %c5 = arith.constant 5 : index
    %c0_34 = arith.constant 0 : index
    %c0_35 = arith.constant 0 : index
    %101 = vector.load %arg9[%c5, %c0_34, %c0_35] : memref<8x128x128xf32, #tpu.memory_space<vmem>>, vector<1x128x128xf32>
    %102 = vector.shape_cast %101 : vector<1x128x128xf32> to vector<128x128xf32>
    %103 = vector.shape_cast %100 : vector<128x128xf32> to vector<1x128x128xf32>
    tpu.vector_store %arg9[%c5, %c0_34, %c0_35], %103 {strides = array<i32>} : memref<8x128x128xf32, #tpu.memory_space<vmem>>, vector<1x128x128xf32>,
    %104 = arith.cmpf ogt, %100, %93 : vector<128x128xf32>
    %105 = arith.select %104, %100, %93 : vector<128x128xi1>, vector<128x128xf32>
    %c5_i32 = arith.constant 5 : i32
    %106 = vector.broadcast %c5_i32 : i32 to vector<128x128xi32>
    %107 = arith.select %104, %106, %95 : vector<128x128xi1>, vector<128x128xi32>
    %108 = vector.extract_strided_slice %25 {offsets = [192, 0], sizes = [32, 128], strides = [1, 1]} : vector<256x128xf32> to vector<32x128xf32>
    %cst_36 = arith.constant dense<0.000000e+00> : vector<128x128xf32>
    %109 = tpu.matmul %20, %108, %cst_36 {dimension_numbers = #tpu.dot_dimension_numbers<[1], [0], [0], [1], [0, 0, 1, 1], [], []>} : vector<128x32xf32>, vector<32x128xf32>, vector<128x128xf32> -> vector<128x128xf32>
    %110 = vector.extract_strided_slice %27 {offsets = [6, 0], sizes = [1, 128], strides = [1, 1]} : vector<8x128xf32> to vector<1x128xf32>
    %111 = vector.broadcast %110 : vector<1x128xf32> to vector<128x128xf32>
    %112 = arith.addf %109, %111 : vector<128x128xf32>
    %c6 = arith.constant 6 : index
    %c0_37 = arith.constant 0 : index
    %c0_38 = arith.constant 0 : index
    %113 = vector.load %arg9[%c6, %c0_37, %c0_38] : memref<8x128x128xf32, #tpu.memory_space<vmem>>, vector<1x128x128xf32>
    %114 = vector.shape_cast %113 : vector<1x128x128xf32> to vector<128x128xf32>
    %115 = vector.shape_cast %112 : vector<128x128xf32> to vector<1x128x128xf32>
    tpu.vector_store %arg9[%c6, %c0_37, %c0_38], %115 {strides = array<i32>} : memref<8x128x128xf32, #tpu.memory_space<vmem>>, vector<1x128x128xf32>,
    %116 = arith.cmpf ogt, %112, %105 : vector<128x128xf32>
    %117 = arith.select %116, %112, %105 : vector<128x128xi1>, vector<128x128xf32>
    %c6_i32 = arith.constant 6 : i32
    %118 = vector.broadcast %c6_i32 : i32 to vector<128x128xi32>
    %119 = arith.select %116, %118, %107 : vector<128x128xi1>, vector<128x128xi32>
    %120 = vector.extract_strided_slice %25 {offsets = [224, 0], sizes = [32, 128], strides = [1, 1]} : vector<256x128xf32> to vector<32x128xf32>
    %cst_39 = arith.constant dense<0.000000e+00> : vector<128x128xf32>
    %121 = tpu.matmul %20, %120, %cst_39 {dimension_numbers = #tpu.dot_dimension_numbers<[1], [0], [0], [1], [0, 0, 1, 1], [], []>} : vector<128x32xf32>, vector<32x128xf32>, vector<128x128xf32> -> vector<128x128xf32>
    %122 = vector.extract_strided_slice %27 {offsets = [7, 0], sizes = [1, 128], strides = [1, 1]} : vector<8x128xf32> to vector<1x128xf32>
    %123 = vector.broadcast %122 : vector<1x128xf32> to vector<128x128xf32>
    %124 = arith.addf %121, %123 : vector<128x128xf32>
    %c7 = arith.constant 7 : index
    %c0_40 = arith.constant 0 : index
    %c0_41 = arith.constant 0 : index
    %125 = vector.load %arg9[%c7, %c0_40, %c0_41] : memref<8x128x128xf32, #tpu.memory_space<vmem>>, vector<1x128x128xf32>
    %126 = vector.shape_cast %125 : vector<1x128x128xf32> to vector<128x128xf32>
    %127 = vector.shape_cast %124 : vector<128x128xf32> to vector<1x128x128xf32>
    tpu.vector_store %arg9[%c7, %c0_40, %c0_41], %127 {strides = array<i32>} : memref<8x128x128xf32, #tpu.memory_space<vmem>>, vector<1x128x128xf32>,
    %128 = arith.cmpf ogt, %124, %117 : vector<128x128xf32>
    %129 = arith.select %128, %124, %117 : vector<128x128xi1>, vector<128x128xf32>
    %c7_i32 = arith.constant 7 : i32
    %130 = vector.broadcast %c7_i32 : i32 to vector<128x128xi32>
    %131 = arith.select %128, %130, %119 : vector<128x128xi1>, vector<128x128xi32>
    %cst_42 = arith.constant 0.000000e+00 : f32
    %132 = vector.broadcast %cst_42 : f32 to vector<128x128xf32>
    %c0_43 = arith.constant 0 : index
    %c0_44 = arith.constant 0 : index
    %c0_45 = arith.constant 0 : index
    %133 = vector.load %arg9[%c0_43, %c0_44, %c0_45] : memref<8x128x128xf32, #tpu.memory_space<vmem>>, vector<1x128x128xf32>
    %134 = vector.shape_cast %133 : vector<1x128x128xf32> to vector<128x128xf32>
    %135 = arith.subf %134, %129 : vector<128x128xf32>
    %136 = math.exp %135 : vector<128x128xf32>
    %137 = arith.addf %132, %136 : vector<128x128xf32>
    %c0_46 = arith.constant 0 : index
    %c0_47 = arith.constant 0 : index
    %c0_48 = arith.constant 0 : index
    %138 = vector.load %arg9[%c0_46, %c0_47, %c0_48] : memref<8x128x128xf32, #tpu.memory_space<vmem>>, vector<1x128x128xf32>
    %139 = vector.shape_cast %138 : vector<1x128x128xf32> to vector<128x128xf32>
    %140 = vector.shape_cast %136 : vector<128x128xf32> to vector<1x128x128xf32>
    tpu.vector_store %arg9[%c0_46, %c0_47, %c0_48], %140 {strides = array<i32>} : memref<8x128x128xf32, #tpu.memory_space<vmem>>, vector<1x128x128xf32>,
    %c1_49 = arith.constant 1 : index
    %c0_50 = arith.constant 0 : index
    %c0_51 = arith.constant 0 : index
    %141 = vector.load %arg9[%c1_49, %c0_50, %c0_51] : memref<8x128x128xf32, #tpu.memory_space<vmem>>, vector<1x128x128xf32>
    %142 = vector.shape_cast %141 : vector<1x128x128xf32> to vector<128x128xf32>
    %143 = arith.subf %142, %129 : vector<128x128xf32>
    %144 = math.exp %143 : vector<128x128xf32>
    %145 = arith.addf %137, %144 : vector<128x128xf32>
    %c1_52 = arith.constant 1 : index
    %c0_53 = arith.constant 0 : index
    %c0_54 = arith.constant 0 : index
    %146 = vector.load %arg9[%c1_52, %c0_53, %c0_54] : memref<8x128x128xf32, #tpu.memory_space<vmem>>, vector<1x128x128xf32>
    %147 = vector.shape_cast %146 : vector<1x128x128xf32> to vector<128x128xf32>
    %148 = vector.shape_cast %144 : vector<128x128xf32> to vector<1x128x128xf32>
    tpu.vector_store %arg9[%c1_52, %c0_53, %c0_54], %148 {strides = array<i32>} : memref<8x128x128xf32, #tpu.memory_space<vmem>>, vector<1x128x128xf32>,
    %c2_55 = arith.constant 2 : index
    %c0_56 = arith.constant 0 : index
    %c0_57 = arith.constant 0 : index
    %149 = vector.load %arg9[%c2_55, %c0_56, %c0_57] : memref<8x128x128xf32, #tpu.memory_space<vmem>>, vector<1x128x128xf32>
    %150 = vector.shape_cast %149 : vector<1x128x128xf32> to vector<128x128xf32>
    %151 = arith.subf %150, %129 : vector<128x128xf32>
    %152 = math.exp %151 : vector<128x128xf32>
    %153 = arith.addf %145, %152 : vector<128x128xf32>
    %c2_58 = arith.constant 2 : index
    %c0_59 = arith.constant 0 : index
    %c0_60 = arith.constant 0 : index
    %154 = vector.load %arg9[%c2_58, %c0_59, %c0_60] : memref<8x128x128xf32, #tpu.memory_space<vmem>>, vector<1x128x128xf32>
    %155 = vector.shape_cast %154 : vector<1x128x128xf32> to vector<128x128xf32>
    %156 = vector.shape_cast %152 : vector<128x128xf32> to vector<1x128x128xf32>
    tpu.vector_store %arg9[%c2_58, %c0_59, %c0_60], %156 {strides = array<i32>} : memref<8x128x128xf32, #tpu.memory_space<vmem>>, vector<1x128x128xf32>,
    %c3_61 = arith.constant 3 : index
    %c0_62 = arith.constant 0 : index
    %c0_63 = arith.constant 0 : index
    %157 = vector.load %arg9[%c3_61, %c0_62, %c0_63] : memref<8x128x128xf32, #tpu.memory_space<vmem>>, vector<1x128x128xf32>
    %158 = vector.shape_cast %157 : vector<1x128x128xf32> to vector<128x128xf32>
    %159 = arith.subf %158, %129 : vector<128x128xf32>
    %160 = math.exp %159 : vector<128x128xf32>
    %161 = arith.addf %153, %160 : vector<128x128xf32>
    %c3_64 = arith.constant 3 : index
    %c0_65 = arith.constant 0 : index
    %c0_66 = arith.constant 0 : index
    %162 = vector.load %arg9[%c3_64, %c0_65, %c0_66] : memref<8x128x128xf32, #tpu.memory_space<vmem>>, vector<1x128x128xf32>
    %163 = vector.shape_cast %162 : vector<1x128x128xf32> to vector<128x128xf32>
    %164 = vector.shape_cast %160 : vector<128x128xf32> to vector<1x128x128xf32>
    tpu.vector_store %arg9[%c3_64, %c0_65, %c0_66], %164 {strides = array<i32>} : memref<8x128x128xf32, #tpu.memory_space<vmem>>, vector<1x128x128xf32>,
    %c4_67 = arith.constant 4 : index
    %c0_68 = arith.constant 0 : index
    %c0_69 = arith.constant 0 : index
    %165 = vector.load %arg9[%c4_67, %c0_68, %c0_69] : memref<8x128x128xf32, #tpu.memory_space<vmem>>, vector<1x128x128xf32>
    %166 = vector.shape_cast %165 : vector<1x128x128xf32> to vector<128x128xf32>
    %167 = arith.subf %166, %129 : vector<128x128xf32>
    %168 = math.exp %167 : vector<128x128xf32>
    %169 = arith.addf %161, %168 : vector<128x128xf32>
    %c4_70 = arith.constant 4 : index
    %c0_71 = arith.constant 0 : index
    %c0_72 = arith.constant 0 : index
    %170 = vector.load %arg9[%c4_70, %c0_71, %c0_72] : memref<8x128x128xf32, #tpu.memory_space<vmem>>, vector<1x128x128xf32>
    %171 = vector.shape_cast %170 : vector<1x128x128xf32> to vector<128x128xf32>
    %172 = vector.shape_cast %168 : vector<128x128xf32> to vector<1x128x128xf32>
    tpu.vector_store %arg9[%c4_70, %c0_71, %c0_72], %172 {strides = array<i32>} : memref<8x128x128xf32, #tpu.memory_space<vmem>>, vector<1x128x128xf32>,
    %c5_73 = arith.constant 5 : index
    %c0_74 = arith.constant 0 : index
    %c0_75 = arith.constant 0 : index
    %173 = vector.load %arg9[%c5_73, %c0_74, %c0_75] : memref<8x128x128xf32, #tpu.memory_space<vmem>>, vector<1x128x128xf32>
    %174 = vector.shape_cast %173 : vector<1x128x128xf32> to vector<128x128xf32>
    %175 = arith.subf %174, %129 : vector<128x128xf32>
    %176 = math.exp %175 : vector<128x128xf32>
    %177 = arith.addf %169, %176 : vector<128x128xf32>
    %c5_76 = arith.constant 5 : index
    %c0_77 = arith.constant 0 : index
    %c0_78 = arith.constant 0 : index
    %178 = vector.load %arg9[%c5_76, %c0_77, %c0_78] : memref<8x128x128xf32, #tpu.memory_space<vmem>>, vector<1x128x128xf32>
    %179 = vector.shape_cast %178 : vector<1x128x128xf32> to vector<128x128xf32>
    %180 = vector.shape_cast %176 : vector<128x128xf32> to vector<1x128x128xf32>
    tpu.vector_store %arg9[%c5_76, %c0_77, %c0_78], %180 {strides = array<i32>} : memref<8x128x128xf32, #tpu.memory_space<vmem>>, vector<1x128x128xf32>,
    %c6_79 = arith.constant 6 : index
    %c0_80 = arith.constant 0 : index
    %c0_81 = arith.constant 0 : index
    %181 = vector.load %arg9[%c6_79, %c0_80, %c0_81] : memref<8x128x128xf32, #tpu.memory_space<vmem>>, vector<1x128x128xf32>
    %182 = vector.shape_cast %181 : vector<1x128x128xf32> to vector<128x128xf32>
    %183 = arith.subf %182, %129 : vector<128x128xf32>
    %184 = math.exp %183 : vector<128x128xf32>
    %185 = arith.addf %177, %184 : vector<128x128xf32>
    %c6_82 = arith.constant 6 : index
    %c0_83 = arith.constant 0 : index
    %c0_84 = arith.constant 0 : index
    %186 = vector.load %arg9[%c6_82, %c0_83, %c0_84] : memref<8x128x128xf32, #tpu.memory_space<vmem>>, vector<1x128x128xf32>
    %187 = vector.shape_cast %186 : vector<1x128x128xf32> to vector<128x128xf32>
    %188 = vector.shape_cast %184 : vector<128x128xf32> to vector<1x128x128xf32>
    tpu.vector_store %arg9[%c6_82, %c0_83, %c0_84], %188 {strides = array<i32>} : memref<8x128x128xf32, #tpu.memory_space<vmem>>, vector<1x128x128xf32>,
    %c7_85 = arith.constant 7 : index
    %c0_86 = arith.constant 0 : index
    %c0_87 = arith.constant 0 : index
    %189 = vector.load %arg9[%c7_85, %c0_86, %c0_87] : memref<8x128x128xf32, #tpu.memory_space<vmem>>, vector<1x128x128xf32>
    %190 = vector.shape_cast %189 : vector<1x128x128xf32> to vector<128x128xf32>
    %191 = arith.subf %190, %129 : vector<128x128xf32>
    %192 = math.exp %191 : vector<128x128xf32>
    %193 = arith.addf %185, %192 : vector<128x128xf32>
    %c7_88 = arith.constant 7 : index
    %c0_89 = arith.constant 0 : index
    %c0_90 = arith.constant 0 : index
    %194 = vector.load %arg9[%c7_88, %c0_89, %c0_90] : memref<8x128x128xf32, #tpu.memory_space<vmem>>, vector<1x128x128xf32>
    %195 = vector.shape_cast %194 : vector<1x128x128xf32> to vector<128x128xf32>
    %196 = vector.shape_cast %192 : vector<128x128xf32> to vector<1x128x128xf32>
    tpu.vector_store %arg9[%c7_88, %c0_89, %c0_90], %196 {strides = array<i32>} : memref<8x128x128xf32, #tpu.memory_space<vmem>>, vector<1x128x128xf32>,
    %197 = tpu.reciprocal %193 : vector<128x128xf32> -> vector<128x128xf32>
    %198 = arith.mulf %197, %38 : vector<128x128xf32>
    %c0_91 = arith.constant 0 : index
    %c0_92 = arith.constant 0 : index
    %c0_93 = arith.constant 0 : index
    %199 = vector.load %arg9[%c0_91, %c0_92, %c0_93] : memref<8x128x128xf32, #tpu.memory_space<vmem>>, vector<1x128x128xf32>
    %200 = vector.shape_cast %199 : vector<1x128x128xf32> to vector<128x128xf32>
    %201 = arith.mulf %200, %198 : vector<128x128xf32>
    %202 = arith.truncf %201 : vector<128x128xf32> to vector<128x128xbf16>
    %c0_94 = arith.constant 0 : index
    %c0_95 = arith.constant 0 : index
    %c0_96 = arith.constant 0 : index
    %c0_97 = arith.constant 0 : index
    %203 = vector.load %arg7[%c0_94, %c0_95, %c0_96, %c0_97] : memref<1x8x128x128xbf16, #tpu.memory_space<vmem>>, vector<1x1x128x128xbf16>
    %204 = vector.shape_cast %203 : vector<1x1x128x128xbf16> to vector<128x128xbf16>
    %205 = vector.shape_cast %202 : vector<128x128xbf16> to vector<1x1x128x128xbf16>
    tpu.vector_store %arg7[%c0_94, %c0_95, %c0_96, %c0_97], %205 {strides = array<i32>} : memref<1x8x128x128xbf16, #tpu.memory_space<vmem>>, vector<1x1x128x128xbf16>,
    %c1_98 = arith.constant 1 : index
    %c0_99 = arith.constant 0 : index
    %c0_100 = arith.constant 0 : index
    %206 = vector.load %arg9[%c1_98, %c0_99, %c0_100] : memref<8x128x128xf32, #tpu.memory_space<vmem>>, vector<1x128x128xf32>
    %207 = vector.shape_cast %206 : vector<1x128x128xf32> to vector<128x128xf32>
    %208 = arith.mulf %207, %198 : vector<128x128xf32>
    %209 = arith.truncf %208 : vector<128x128xf32> to vector<128x128xbf16>
    %c0_101 = arith.constant 0 : index
    %c1_102 = arith.constant 1 : index
    %c0_103 = arith.constant 0 : index
    %c0_104 = arith.constant 0 : index
    %210 = vector.load %arg7[%c0_101, %c1_102, %c0_103, %c0_104] : memref<1x8x128x128xbf16, #tpu.memory_space<vmem>>, vector<1x1x128x128xbf16>
    %211 = vector.shape_cast %210 : vector<1x1x128x128xbf16> to vector<128x128xbf16>
    %212 = vector.shape_cast %209 : vector<128x128xbf16> to vector<1x1x128x128xbf16>
    tpu.vector_store %arg7[%c0_101, %c1_102, %c0_103, %c0_104], %212 {strides = array<i32>} : memref<1x8x128x128xbf16, #tpu.memory_space<vmem>>, vector<1x1x128x128xbf16>,
    %c2_105 = arith.constant 2 : index
    %c0_106 = arith.constant 0 : index
    %c0_107 = arith.constant 0 : index
    %213 = vector.load %arg9[%c2_105, %c0_106, %c0_107] : memref<8x128x128xf32, #tpu.memory_space<vmem>>, vector<1x128x128xf32>
    %214 = vector.shape_cast %213 : vector<1x128x128xf32> to vector<128x128xf32>
    %215 = arith.mulf %214, %198 : vector<128x128xf32>
    %216 = arith.truncf %215 : vector<128x128xf32> to vector<128x128xbf16>
    %c0_108 = arith.constant 0 : index
    %c2_109 = arith.constant 2 : index
    %c0_110 = arith.constant 0 : index
    %c0_111 = arith.constant 0 : index
    %217 = vector.load %arg7[%c0_108, %c2_109, %c0_110, %c0_111] : memref<1x8x128x128xbf16, #tpu.memory_space<vmem>>, vector<1x1x128x128xbf16>
    %218 = vector.shape_cast %217 : vector<1x1x128x128xbf16> to vector<128x128xbf16>
    %219 = vector.shape_cast %216 : vector<128x128xbf16> to vector<1x1x128x128xbf16>
    tpu.vector_store %arg7[%c0_108, %c2_109, %c0_110, %c0_111], %219 {strides = array<i32>} : memref<1x8x128x128xbf16, #tpu.memory_space<vmem>>, vector<1x1x128x128xbf16>,
    %c3_112 = arith.constant 3 : index
    %c0_113 = arith.constant 0 : index
    %c0_114 = arith.constant 0 : index
    %220 = vector.load %arg9[%c3_112, %c0_113, %c0_114] : memref<8x128x128xf32, #tpu.memory_space<vmem>>, vector<1x128x128xf32>
    %221 = vector.shape_cast %220 : vector<1x128x128xf32> to vector<128x128xf32>
    %222 = arith.mulf %221, %198 : vector<128x128xf32>
    %223 = arith.truncf %222 : vector<128x128xf32> to vector<128x128xbf16>
    %c0_115 = arith.constant 0 : index
    %c3_116 = arith.constant 3 : index
    %c0_117 = arith.constant 0 : index
    %c0_118 = arith.constant 0 : index
    %224 = vector.load %arg7[%c0_115, %c3_116, %c0_117, %c0_118] : memref<1x8x128x128xbf16, #tpu.memory_space<vmem>>, vector<1x1x128x128xbf16>
    %225 = vector.shape_cast %224 : vector<1x1x128x128xbf16> to vector<128x128xbf16>
    %226 = vector.shape_cast %223 : vector<128x128xbf16> to vector<1x1x128x128xbf16>
    tpu.vector_store %arg7[%c0_115, %c3_116, %c0_117, %c0_118], %226 {strides = array<i32>} : memref<1x8x128x128xbf16, #tpu.memory_space<vmem>>, vector<1x1x128x128xbf16>,
    %c4_119 = arith.constant 4 : index
    %c0_120 = arith.constant 0 : index
    %c0_121 = arith.constant 0 : index
    %227 = vector.load %arg9[%c4_119, %c0_120, %c0_121] : memref<8x128x128xf32, #tpu.memory_space<vmem>>, vector<1x128x128xf32>
    %228 = vector.shape_cast %227 : vector<1x128x128xf32> to vector<128x128xf32>
    %229 = arith.mulf %228, %198 : vector<128x128xf32>
    %230 = arith.truncf %229 : vector<128x128xf32> to vector<128x128xbf16>
    %c0_122 = arith.constant 0 : index
    %c4_123 = arith.constant 4 : index
    %c0_124 = arith.constant 0 : index
    %c0_125 = arith.constant 0 : index
    %231 = vector.load %arg7[%c0_122, %c4_123, %c0_124, %c0_125] : memref<1x8x128x128xbf16, #tpu.memory_space<vmem>>, vector<1x1x128x128xbf16>
    %232 = vector.shape_cast %231 : vector<1x1x128x128xbf16> to vector<128x128xbf16>
    %233 = vector.shape_cast %230 : vector<128x128xbf16> to vector<1x1x128x128xbf16>
    tpu.vector_store %arg7[%c0_122, %c4_123, %c0_124, %c0_125], %233 {strides = array<i32>} : memref<1x8x128x128xbf16, #tpu.memory_space<vmem>>, vector<1x1x128x128xbf16>,
    %c5_126 = arith.constant 5 : index
    %c0_127 = arith.constant 0 : index
    %c0_128 = arith.constant 0 : index
    %234 = vector.load %arg9[%c5_126, %c0_127, %c0_128] : memref<8x128x128xf32, #tpu.memory_space<vmem>>, vector<1x128x128xf32>
    %235 = vector.shape_cast %234 : vector<1x128x128xf32> to vector<128x128xf32>
    %236 = arith.mulf %235, %198 : vector<128x128xf32>
    %237 = arith.truncf %236 : vector<128x128xf32> to vector<128x128xbf16>
    %c0_129 = arith.constant 0 : index
    %c5_130 = arith.constant 5 : index
    %c0_131 = arith.constant 0 : index
    %c0_132 = arith.constant 0 : index
    %238 = vector.load %arg7[%c0_129, %c5_130, %c0_131, %c0_132] : memref<1x8x128x128xbf16, #tpu.memory_space<vmem>>, vector<1x1x128x128xbf16>
    %239 = vector.shape_cast %238 : vector<1x1x128x128xbf16> to vector<128x128xbf16>
    %240 = vector.shape_cast %237 : vector<128x128xbf16> to vector<1x1x128x128xbf16>
    tpu.vector_store %arg7[%c0_129, %c5_130, %c0_131, %c0_132], %240 {strides = array<i32>} : memref<1x8x128x128xbf16, #tpu.memory_space<vmem>>, vector<1x1x128x128xbf16>,
    %c6_133 = arith.constant 6 : index
    %c0_134 = arith.constant 0 : index
    %c0_135 = arith.constant 0 : index
    %241 = vector.load %arg9[%c6_133, %c0_134, %c0_135] : memref<8x128x128xf32, #tpu.memory_space<vmem>>, vector<1x128x128xf32>
    %242 = vector.shape_cast %241 : vector<1x128x128xf32> to vector<128x128xf32>
    %243 = arith.mulf %242, %198 : vector<128x128xf32>
    %244 = arith.truncf %243 : vector<128x128xf32> to vector<128x128xbf16>
    %c0_136 = arith.constant 0 : index
    %c6_137 = arith.constant 6 : index
    %c0_138 = arith.constant 0 : index
    %c0_139 = arith.constant 0 : index
    %245 = vector.load %arg7[%c0_136, %c6_137, %c0_138, %c0_139] : memref<1x8x128x128xbf16, #tpu.memory_space<vmem>>, vector<1x1x128x128xbf16>
    %246 = vector.shape_cast %245 : vector<1x1x128x128xbf16> to vector<128x128xbf16>
    %247 = vector.shape_cast %244 : vector<128x128xbf16> to vector<1x1x128x128xbf16>
    tpu.vector_store %arg7[%c0_136, %c6_137, %c0_138, %c0_139], %247 {strides = array<i32>} : memref<1x8x128x128xbf16, #tpu.memory_space<vmem>>, vector<1x1x128x128xbf16>,
    %c7_140 = arith.constant 7 : index
    %c0_141 = arith.constant 0 : index
    %c0_142 = arith.constant 0 : index
    %248 = vector.load %arg9[%c7_140, %c0_141, %c0_142] : memref<8x128x128xf32, #tpu.memory_space<vmem>>, vector<1x128x128xf32>
    %249 = vector.shape_cast %248 : vector<1x128x128xf32> to vector<128x128xf32>
    %250 = arith.mulf %249, %198 : vector<128x128xf32>
    %251 = arith.truncf %250 : vector<128x128xf32> to vector<128x128xbf16>
    %c0_143 = arith.constant 0 : index
    %c7_144 = arith.constant 7 : index
    %c0_145 = arith.constant 0 : index
    %c0_146 = arith.constant 0 : index
    %252 = vector.load %arg7[%c0_143, %c7_144, %c0_145, %c0_146] : memref<1x8x128x128xbf16, #tpu.memory_space<vmem>>, vector<1x1x128x128xbf16>
    %253 = vector.shape_cast %252 : vector<1x1x128x128xbf16> to vector<128x128xbf16>
    %254 = vector.shape_cast %251 : vector<128x128xbf16> to vector<1x1x128x128xbf16>
    tpu.vector_store %arg7[%c0_143, %c7_144, %c0_145, %c0_146], %254 {strides = array<i32>} : memref<1x8x128x128xbf16, #tpu.memory_space<vmem>>, vector<1x1x128x128xbf16>,
    %c0_i32_147 = arith.constant 0 : i32
    %255 = vector.broadcast %c0_i32_147 : i32 to vector<128x128xi32>
    %256 = arith.select %36, %131, %255 : vector<128x128xi1>, vector<128x128xi32>
    %c0_148 = arith.constant 0 : index
    %c0_149 = arith.constant 0 : index
    %c0_150 = arith.constant 0 : index
    %257 = vector.load %arg8[%c0_148, %c0_149, %c0_150] : memref<1x128x128xi32, #tpu.memory_space<vmem>>, vector<1x128x128xi32>
    %258 = vector.shape_cast %257 : vector<1x128x128xi32> to vector<128x128xi32>
    %259 = vector.shape_cast %256 : vector<128x128xi32> to vector<1x128x128xi32>
    tpu.vector_store %arg8[%c0_148, %c0_149, %c0_150], %259 {strides = array<i32>} : memref<1x128x128xi32, #tpu.memory_space<vmem>>, vector<1x128x128xi32>,
    return
  }
  func.func @transform_0(%arg0: i32, %arg1: memref<2xi32, #tpu.memory_space<smem>>) -> (i32, i32, i32) {
    %c0_i32 = arith.constant 0 : i32
    %c0_i32_0 = arith.constant 0 : i32
    %c0_i32_1 = arith.constant 0 : i32
    return %arg0, %c0_i32, %c0_i32_0 : i32, i32, i32
  }
  func.func @transform_1(%arg0: i32, %arg1: memref<2xi32, #tpu.memory_space<smem>>) -> (i32, i32) {
    %c0_i32 = arith.constant 0 : i32
    %c0_i32_0 = arith.constant 0 : i32
    %c0_i32_1 = arith.constant 0 : i32
    return %c0_i32, %c0_i32_0 : i32, i32
  }
  func.func @transform_2(%arg0: i32, %arg1: memref<2xi32, #tpu.memory_space<smem>>) -> (i32, i32) {
    %c0_i32 = arith.constant 0 : i32
    %c0_i32_0 = arith.constant 0 : i32
    %c0_i32_1 = arith.constant 0 : i32
    return %c0_i32, %c0_i32_0 : i32, i32
  }
  func.func @transform_3(%arg0: i32, %arg1: memref<2xi32, #tpu.memory_space<smem>>) -> (i32, i32) {
    %c0_i32 = arith.constant 0 : i32
    %c0_i32_0 = arith.constant 0 : i32
    %c0_i32_1 = arith.constant 0 : i32
    return %c0_i32, %c0_i32_0 : i32, i32
  }
  func.func @transform_4(%arg0: i32, %arg1: memref<2xi32, #tpu.memory_space<smem>>) -> (i32, i32) {
    %c0_i32 = arith.constant 0 : i32
    %c0_i32_0 = arith.constant 0 : i32
    %c0_i32_1 = arith.constant 0 : i32
    return %c0_i32, %c0_i32_0 : i32, i32
  }
  func.func @transform_5(%arg0: i32, %arg1: memref<2xi32, #tpu.memory_space<smem>>) -> (i32, i32, i32, i32) {
    %c0_i32 = arith.constant 0 : i32
    %c0_i32_0 = arith.constant 0 : i32
    %c0_i32_1 = arith.constant 0 : i32
    %c0_i32_2 = arith.constant 0 : i32
    return %arg0, %c0_i32, %c0_i32_0, %c0_i32_1 : i32, i32, i32, i32
  }
  func.func @transform_6(%arg0: i32, %arg1: memref<2xi32, #tpu.memory_space<smem>>) -> (i32, i32, i32) {
    %c0_i32 = arith.constant 0 : i32
    %c0_i32_0 = arith.constant 0 : i32
    %c0_i32_1 = arith.constant 0 : i32
    return %arg0, %c0_i32, %c0_i32_0 : i32, i32, i32
  }
}

</mosaic_0001>

<bundles_post_ra>
// kernel: tpu_custom_call.1
= control target key start
LH: loop header
LB: loop body
LE: loop exit
PB: predicated region body
PF: predicated region fallthrough
CT: control target
= control target key end

     0   :  { %s10193_s0 = inlined_call_operand.vmem [shape: s32[2], index: 0, kind: input, shape index: {}]   ;;  %s10194_s1 = inlined_call_operand.vmem [shape: f32[2,128,32], index: 1, kind: input, shape index: {}]   ;;  %s10195_s2 = inlined_call_operand.vmem [shape: f32[32,64], index: 2, kind: input, shape index: {}]   ;;  %s10196_s3 = inlined_call_operand.vmem [shape: f32[1,64], index: 3, kind: input, shape index: {}]   ;;  %s10197_s4 = inlined_call_operand.vmem [shape: f32[256,33], index: 4, kind: input, shape index: {}]   ;;  %s10198_s5 = inlined_call_operand.vmem [shape: f32[8,33], index: 5, kind: input, shape index: {}]   ;;  %s10199_s6 = inlined_call_operand.hbm [shape: bf16[2,8,128,128], index: 6, kind: output, shape index: {0}]   ;;  %s10200_s7 = inlined_call_operand.hbm [shape: s32[2,128,128], index: 7, kind: output, shape index: {1}]  }
   0x1   :  { %s13_s26 = sshll.u32 %s10193_s0, 4  ;;  %s14_s26 = int_to_ptr.vmem [resolvable:$true] %s13_s26 }
   0x2   :  { %s6851_s27 = scalar_lea.vmem %s14_s26, 16  ;;  %p6856_p1 = scmp.lt.s32.totalorder %s14_s26, %s14_s26 }
   0x3   :  { %p6852_p0 = scmp.ne.s32.totalorder %s14_s26, %s6851_s27  ;;  %p6857_p2 = scmp.lt.s32.totalorder %s6851_s27, %s6851_s27 }
   0x5   :  { %p6858_p3 = por %p6857_p2, %p6856_p1 }
   0x7   :  { %p6859_p4 = pnand %p6858_p3, %p6852_p0 }
   0x9   :  { %6862 = shalt.err (!%p6859_p4)  }
   0xa   :  { %s6957_s28 = smov [#allocation4]  }
   0xb   :  { %16 = dma.vmem_to_smem %s14_s26, 16, %s6957_s28, [#allocation3] }
   0xc   :  { %6931 = dma.done.wait [#allocation3], 16 }
   0xd   :  { %6932 = vsyncadd [#allocation3], 4294967280 }
   0xe   :  { %18 = sfence }
   0xf   :  { %19 = vsyncpa [#allocation6], 0 }
  0x10   :  { %21 = vsyncpa [#allocation6 + $0x1], 0 }
  0x11   :  { %22 = vsyncpa [#allocation8], 0 }
  0x12   :  { %24 = vsyncpa [#allocation8 + $0x1], 0  ;;  %s7011_s29 = smov 0   ;;  %s7013_s0 = smov 0  }
  0x13   :  { %s7015_s30 = smov 0   ;;  %s7017_s8 = smov 0  }
  0x14 LB: > { %s7032_s9 = sadd.s32 4294967295, %s6955_s8   ;;  %s4834_s10 = sadd.s32 4294967294, %s6955_s8   ;;  %s6955_s8 = sphi %s7017_s8, %s10663_s8   ;;  %s6951_s30 = sphi %s7015_s30, %s10662_s30   ;;  %s6947_s0 = sphi %s7013_s0, %s10661_s0   ;;  %s6943_s29 = sphi %s7011_s29, %s10660_s29  }
  0x15   : > { %s7036_s11 = sadd.s32 1, %s6955_s8   ;;  %s147_s12 = sadd.s32 1, %s6951_s30 }
  0x16   : > { %s144_s13 = ssub.s32 %s6955_s8, %s7036_s11  ;;  %p157_p5 = scmp.ne.s32.totalorder %s6951_s30, %s6947_s0 }
  0x17   : > { %p145_p6 = scmp.eq.s32.totalorder %s144_s13, 0  ;;  %p158_p7 = scmp.eq.s32.totalorder %s7032_s9, 1 }
  0x18   : > { %p163_p8 = scmp.ne.s32.totalorder %s6947_s0, %s6943_s29  ;;  %p164_p9 = scmp.eq.s32.totalorder %s4834_s10, 1 }
  0x19   : > { %s7047_s14 = scalar_select %p145_p6, %s6951_s30, %s147_s12  }
  0x1a   : > { %p7049_p10 = por %p158_p7, %p157_p5  ;;  %p7053_p11 = por %p164_p9, %p163_p8 }
  0x1b   : > { %p4837_p12 = scmp.ge.s32.totalorder %s6955_s8, 1  ;;  %p228_p13 = scmp.lt.s32.totalorder %s6955_s8, 3 }
  0x1d   : > { %p229_p0 = pnand %p4837_p12, %p228_p13 }
  0x1f   : > { %232 = sbr.rel (%p229_p0) target bundleno = 1280 (0x500), region = 40 }
  0x24   : > { %v287_v0 = vld [vmem:[%s10195_s2 + $0x18] sm:$0xff]  ;;  %v286_v1 = vld [vmem:[%s10195_s2 + $0x10] sm:$0xff]  ;;  %p263_p1 = scmp.lt.s32.totalorder %s7032_s9, 1  ;;  %v285_v2 = vld [vmem:[%s10195_s2 + $0x8] sm:$0xff]  ;;  %vm295_vm0 = vcmask 261120   ;;  %s6959_s17 = smov 96  }
  0x25   : > { %6075 = vmatprep.subr.mxu1 %v287_v0  ;;  %v284_v3 = vld [vmem:[%s10195_s2] sm:$0xff]  ;;  %vm745_vm1 = vcmask 269312   ;;  %vm6960_vm2 = vmmov 0   ;;  %s7899_s24 = sld [smem:[#allocation4 + %s7032_s9]]  ;;  %s8814_s25 = sand.u32 1, %s6947_s0  }
  0x26   : > { %6076 = vmatpush3.msra.mxu1 %v287_v0  ;;  %s264_s23 = scalar_select %p263_p1, %s7032_s9, 1  ;;  %v7115_v30 = vld [vmem:[%s10196_s3] ss:$0 sm:$0xff] }
  0x27   : > { %6077 = vmatprep.subr.mxu1 %v286_v1  ;;  %s4838_s28 = sshll.u32 %s8814_s25, 9  ;;  %s5446_s12 = sshll.u32 %s7032_s9, 11 }
  0x28   : > { %6078 = vmatpush3.msra.mxu1 %v286_v1  ;;  %s5316_s26 = sshll.u32 %s264_s23, 7  ;;  %s10028_s19 = scalar_lea.hbm %s10200_s7, %s5446_s12 }
  0x29   : > { %6079 = vmatprep.subr.mxu1 %v285_v2  ;;  %s7076_s10 = scalar_lea.vmem %s10194_s1, %s5316_s26  ;;  %s4839_s26 = sshll.u32 %s8814_s25, 7 }
  0x2a   : > { %6080 = vmatpush3.msra.mxu1 %v285_v2  ;;  %v268_v4 = vld [vmem:[%s7076_s10] sm:$0xff]  ;;  %v269_v5 = vld [vmem:[%s7076_s10 + $0x8] sm:$0xff]  ;;  %v270_v6 = vld [vmem:[%s7076_s10 + $0x10] sm:$0xff]  ;;  %s8890_s27 = scalar_lea.vmem [#allocation7], %s4839_s26  ;;  %s4711_s20 = scalar_lea.sflag [#allocation8], %s8814_s25 }
  0x2b   : > { %6081 = vmatprep.subr.mxu1 %v284_v3  ;;  %6083 = vmatprep.mubr.msk.f32.mxu1 %vm295_vm0, %v268_v4  ;;  %v271_v7 = vld [vmem:[%s7076_s10 + $0x18] sm:$0xff]  ;;  %v272_v8 = vld [vmem:[%s7076_s10 + $0x20] sm:$0xff]  ;;  %v273_v9 = vld [vmem:[%s7076_s10 + $0x28] sm:$0xff]  ;;  %s4740_s13 = sshll.u32 %s8890_s27, 4  ;;  %s6962_s22 = smov [#allocation7]   ;;  %s10030_s13 = int_to_ptr.vmem [resolvable:$true] %s4740_s13 }
  0x2c   : > { %6082 = vmatpush3.msra.mxu1 %v284_v3  ;;  %v274_v10 = vld [vmem:[%s7076_s10 + $0x30] sm:$0xff]  ;;  %v275_v11 = vld [vmem:[%s7076_s10 + $0x38] sm:$0xff]  ;;  %v276_v12 = vld [vmem:[%s7076_s10 + $0x40] sm:$0xff]  ;;  %s6863_s21 = scalar_lea.vmem %s10030_s13, 2048  ;;  %s6867_s23 = sshll.u32 %s6962_s22, 4  ;;  %s6868_s23 = int_to_ptr.vmem [resolvable:$false] %s6867_s23 }
  0x2d   : > { %6084 = vmatmul.mubr.msk.f32.vlgmr.msra.gmra.mxu1 %vm295_vm0, %v269_v5  ;;  %v277_v13 = vld [vmem:[%s7076_s10 + $0x48] sm:$0xff]  ;;  %v278_v14 = vld [vmem:[%s7076_s10 + $0x50] sm:$0xff]  ;;  %v279_v15 = vld [vmem:[%s7076_s10 + $0x58] sm:$0xff]  ;;  %p6864_p2 = scmp.ne.s32.totalorder %s10030_s13, %s6863_s21  ;;  %p6870_p5 = scmp.lt.s32.totalorder %s10030_s13, %s6868_s23 }
  0x2e   : > { %6086 = vmatprep.mubr.msk.f32.mxu1 %vm295_vm0, %v270_v6  ;;  %v280_v16 = vld [vmem:[%s7076_s10 + $0x60] sm:$0xff]  ;;  %v281_v17 = vld [vmem:[%s7076_s10 + $0x68] sm:$0xff]  ;;  %v282_v18 = vld [vmem:[%s7076_s10 + $0x70] sm:$0xff] }
  0x2f   : > { %v283_v19 = vld [vmem:[%s7076_s10 + $0x78] sm:$0xff]  ;;  %s9209_s10 = scalar_lea.vmem [#allocation5], %s4838_s28  ;;  %p6865_p3 = pnand %p6864_p2, %p7049_p10 }
  0x31   : > { %6087 = vmatmul.mubr.msk.f32.gmra.mxu1 %vm295_vm0, %v271_v7  ;;  %p6866_p4 = pneg %p6865_p3 }
  0x32   : > { %6089 = vmatprep.mubr.msk.f32.mxu1 %vm295_vm0, %v272_v8 }
  0x35   : > { %6090 = vmatmul.mubr.msk.f32.gmra.mxu1 %vm295_vm0, %v273_v9 }
  0x36   : > { %6092 = vmatprep.mubr.msk.f32.mxu1 %vm295_vm0, %v274_v10 }
  0x39   : > { %6093 = vmatmul.mubr.msk.f32.gmra.mxu1 %vm295_vm0, %v275_v11 }
  0x3a   : > { %6095 = vmatprep.mubr.msk.f32.mxu1 %vm295_vm0, %v276_v12 }
  0x3d   : > { %6096 = vmatmul.mubr.msk.f32.gmra.mxu1 %vm295_vm0, %v277_v13 }
  0x3e   : > { %6098 = vmatprep.mubr.msk.f32.mxu1 %vm295_vm0, %v278_v14 }
  0x41   : > { %6099 = vmatmul.mubr.msk.f32.gmra.mxu1 %vm295_vm0, %v279_v15 }
  0x42   : > { %6101 = vmatprep.mubr.msk.f32.mxu1 %vm295_vm0, %v280_v16 }
  0x45   : > { %6102 = vmatmul.mubr.msk.f32.gmra.mxu1 %vm295_vm0, %v281_v17 }
  0x46   : > { %6104 = vmatprep.mubr.msk.f32.mxu1 %vm295_vm0, %v282_v18 }
  0x49   : > { %6105 = vmatmul.mubr.msk.f32.gmra.mxu1 %vm295_vm0, %v283_v19 }
  0xed   : > { %v7110_v20 = vpop.f32.mrf.mxu1 }
  0xef   : > { %v410_v21 = vpop.f32.mrf.mxu1 }
  0xf0   : > { %v7142_v44 = vadd.f32 %v7115_v30, %v410_v21 }
  0xf1   : > { %v6088_v22 = vpop.f32.mrf.mxu1 }
  0xf2   : > { %v489_v59 = vmul.f32 %v7142_v44, %v7142_v44  ;;  %v7171_v60 = vadd.f32 %v6088_v22, %v7115_v30 }
  0xf3   : > { %v420_v23 = vpop.f32.mrf.mxu1 }
  0xf4   : > { %v7157_v52 = vadd.f32 %v7115_v30, %v420_v23 }
  0xf5   : > { %v6091_v24 = vpop.f32.mrf.mxu1 }
  0xf6   : > { %v491_v4 = vmul.f32 %v7157_v52, %v7157_v52  ;;  %v7181_v5 = vadd.f32 %v6091_v24, %v7115_v30 }
  0xf7   : > { %v430_v25 = vpop.f32.mrf.mxu1 }
  0xf8   : > { %v7145_v45 = vadd.f32 %v7115_v30, %v430_v25  ;;  %v494_v21 = vmul.f32 %v7181_v5, %v7181_v5 }
  0xf9   : > { %v6094_v26 = vpop.f32.mrf.mxu1 }
  0xfa   : > { %v7160_v53 = vadd.f32 %v6094_v26, %v7115_v30  ;;  %v493_v61 = vmul.f32 %v7145_v45, %v7145_v45 }
  0xfb   : > { %v440_v27 = vpop.f32.mrf.mxu1 }
  0xfc   : > { %v7121_v33 = vadd.f32 %v7115_v30, %v440_v27  ;;  %v496_v6 = vmul.f32 %v7160_v53, %v7160_v53  ;;  %v509_v16 = vmul.f32 %v493_v61, %v7145_v45 }
  0xfd   : > { %v6097_v28 = vpop.f32.mrf.mxu1 }
  0xfe   : > { %v495_v39 = vmul.f32 %v7121_v33, %v7121_v33  ;;  %v7134_v40 = vadd.f32 %v6097_v28, %v7115_v30  ;;  %v512_v22 = vmul.f32 %v496_v6, %v7160_v53 }
  0xff   : > { %v450_v29 = vpop.f32.mrf.mxu1 }
 0x100   : > { %v7118_v31 = vadd.f32 %v7115_v30, %v450_v29  ;;  %v511_v54 = vmul.f32 %v495_v39, %v7121_v33  ;;  %v498_v55 = vmul.f32 %v7134_v40, %v7134_v40  ;;  %v7210_v39 = vadd.f32 %v7110_v20, %v7115_v30 }
 0x101   : > { %v6100_v32 = vpop.f32.mrf.mxu1 }
 0x102   : > { %v7124_v35 = vadd.f32 %v6100_v32, %v7115_v30  ;;  %v497_v36 = vmul.f32 %v7118_v31, %v7118_v31  ;;  %v527_v8 = vmul.f32 0.044715, %v511_v54  ;;  %v514_v9 = vmul.f32 %v498_v55, %v7134_v40 }
 0x103   : > { %v460_v34 = vpop.f32.mrf.mxu1 }
 0x104   : > { %v7129_v37 = vadd.f32 %v7115_v30, %v460_v34  ;;  %v500_v46 = vmul.f32 %v7124_v35, %v7124_v35  ;;  %v513_v47 = vmul.f32 %v497_v36, %v7118_v31  ;;  %v543_v25 = vadd.f32 %v527_v8, %v7121_v33 }
 0x105   : > { %v6103_v38 = vpop.f32.mrf.mxu1  ;;  %v530_v26 = vmul.f32 0.044715, %v514_v9  ;;  %v507_v34 = vmul.f32 %v491_v4, %v7157_v52  ;;  %v525_v36 = vmul.f32 0.044715, %v509_v16 }
 0x106   : > { %v499_v41 = vmul.f32 %v7129_v37, %v7129_v37  ;;  %v7139_v42 = vadd.f32 %v6103_v38, %v7115_v30  ;;  %v516_v62 = vmul.f32 %v500_v46, %v7124_v35  ;;  %v529_v63 = vmul.f32 0.044715, %v513_v47 }
 0x107   : > { %v470_v43 = vpop.f32.mrf.mxu1  ;;  %v492_v47 = vmul.f32 %v7171_v60, %v7171_v60  ;;  %v546_v54 = vadd.f32 %v530_v26, %v7134_v40  ;;  %v523_v20 = vmul.f32 0.044715, %v507_v34 }
 0x108   : > { %v515_v48 = vmul.f32 %v499_v41, %v7129_v37  ;;  %v502_v49 = vmul.f32 %v7139_v42, %v7139_v42  ;;  %v7154_v50 = vadd.f32 %v7115_v30, %v470_v43  ;;  %v532_v12 = vmul.f32 0.044715, %v516_v62 }
 0x109   : > { %v6106_v51 = vpop.f32.mrf.mxu1  ;;  %v545_v17 = vadd.f32 %v529_v63, %v7118_v31  ;;  %v505_v41 = vmul.f32 %v489_v59, %v7142_v44  ;;  %v508_v61 = vmul.f32 %v492_v47, %v7171_v60 }
 0x10a   : > { %v531_v56 = vmul.f32 0.044715, %v515_v48  ;;  %v518_v57 = vmul.f32 %v502_v49, %v7139_v42  ;;  %v501_v58 = vmul.f32 %v7154_v50, %v7154_v50  ;;  %v7186_v7 = vadd.f32 %v6106_v51, %v7115_v30 }
 0x10b   : > { %v480_v3 = vpop.f32.mrf.mxu1  ;;  %v548_v28 = vadd.f32 %v532_v12, %v7124_v35  ;;  %v561_v38 = vmul.f32 0.7978846, %v545_v17  ;;  %v510_v48 = vmul.f32 %v494_v21, %v7181_v5  ;;  %v528_v49 = vmul.f32 0.044715, %v512_v22 }
 0x10c   : > { %v547_v0 = vadd.f32 %v531_v56, %v7129_v37  ;;  %v534_v1 = vmul.f32 0.044715, %v518_v57  ;;  %v517_v2 = vmul.f32 %v501_v58, %v7154_v50  ;;  %v504_v14 = vmul.f32 %v7186_v7, %v7186_v7 }
 0x10d   : > { %v7193_v15 = vadd.f32 %v7115_v30, %v480_v3  ;;  %v559_v51 = vmul.f32 0.7978846, %v543_v25  ;;  %v564_v55 = vmul.f32 0.7978846, %v548_v28  ;;  %v541_v30 = vadd.f32 %v525_v36, %v7145_v45 }
 0x10e   : > { %v550_v10 = vadd.f32 %v534_v1, %v7139_v42  ;;  %v533_v11 = vmul.f32 0.044715, %v517_v2  ;;  %v563_v13 = vmul.f32 0.7978846, %v547_v0  ;;  %v520_v23 = vmul.f32 %v504_v14, %v7186_v7 }
 0x10f   : > { %v503_v24 = vmul.f32 %v7193_v15, %v7193_v15  ;;  %v490_v58 = vmul.f32 %v7210_v39, %v7210_v39  ;;  %v521_v59 = vmul.f32 0.044715, %v505_v41  ;;  %v526_v63 = vmul.f32 0.044715, %v510_v48 }
 0x110   : > { %v566_v18 = vmul.f32 0.7978846, %v550_v10  ;;  %v549_v19 = vadd.f32 %v533_v11, %v7154_v50  ;;  %v536_v29 = vmul.f32 0.044715, %v520_v23  ;;  %v544_v0 = vadd.f32 %v528_v49, %v7160_v53 }
 0x111   : > { %v519_v32 = vmul.f32 %v503_v24, %v7193_v15  ;;  %v562_v1 = vmul.f32 0.7978846, %v546_v54  ;;  %v539_v2 = vadd.f32 %v523_v20, %v7157_v52  ;;  %v557_v3 = vmul.f32 0.7978846, %v541_v30 }
 0x112   : > { %6531 = vtanh.f32 %v566_v18  ;;  %v565_v27 = vmul.f32 0.7978846, %v549_v19  ;;  %v552_v43 = vadd.f32 %v536_v29, %v7186_v7  ;;  %v506_v4 = vmul.f32 %v490_v58, %v7210_v39 }
 0x113   : > { %6533 = vtanh.f32 %v563_v13  ;;  %v535_v46 = vmul.f32 0.044715, %v519_v32  ;;  %v537_v6 = vadd.f32 %v521_v59, %v7142_v44  ;;  %v524_v9 = vmul.f32 0.044715, %v508_v61 }
 0x114   : > { %6535 = vtanh.f32 %v565_v27  ;;  %v568_v56 = vmul.f32 0.7978846, %v552_v43  ;;  %v542_v10 = vadd.f32 %v526_v63, %v7181_v5  ;;  %v560_v11 = vmul.f32 0.7978846, %v544_v0 }
 0x115   : > { %v551_v57 = vadd.f32 %v535_v46, %v7193_v15  ;;  %6537 = vtanh.f32 %v561_v38  ;;  %v555_v13 = vmul.f32 0.7978846, %v539_v2  ;;  %v10201_v17 = vmov 0.0  }
 0x116   : > { %6539 = vtanh.f32 %v568_v56  ;;  %6187 = vmatprep.subr.mxu0 %v10201_v17  ;;  %v522_v18 = vmul.f32 0.044715, %v506_v4  ;;  %v553_v22 = vmul.f32 0.7978846, %v537_v6  ;;  %v540_v23 = vadd.f32 %v524_v9, %v7171_v60  ;;  %6219 = vmatprep.mubr.msk.f32.mxu0 %vm6960_vm2, %v10201_v17 }
 0x117   : > { %6541 = vtanh.f32 %v559_v51  ;;  %v567_v62 = vmul.f32 0.7978846, %v551_v57  ;;  %v558_v24 = vmul.f32 0.7978846, %v542_v10 }
 0x118   : > { %6543 = vtanh.f32 %v564_v55  ;;  %v538_v34 = vadd.f32 %v522_v18, %v7210_v39  ;;  %v556_v36 = vmul.f32 0.7978846, %v540_v23 }
 0x119   : > { %6545 = vtanh.f32 %v567_v62 }
 0x11a   : > { %6547 = vtanh.f32 %v562_v1  ;;  %v554_v51 = vmul.f32 0.7978846, %v538_v34 }
 0x11b   : > { %6549 = vtanh.f32 %v557_v3 }
 0x11c   : > { %6551 = vtanh.f32 %v560_v11 }
 0x11d   : > { %6553 = vtanh.f32 %v555_v13 }
 0x11e   : > { %6555 = vtanh.f32 %v558_v24 }
 0x11f   : > { %v6532_v8 = vpop.eup %6531  ;;  %6557 = vtanh.f32 %v553_v22 }
 0x120   : > { %v6534_v12 = vpop.eup %6533  ;;  %v598_v14 = vadd.f32 1.0, %v6532_v8  ;;  %6559 = vtanh.f32 %v556_v36 }
 0x121   : > { %v6536_v16 = vpop.eup %6535  ;;  %v595_v25 = vadd.f32 1.0, %v6534_v12  ;;  %6561 = vtanh.f32 %v554_v51 }
 0x122   : > { %v614_v19 = vmul.f32 0.5, %v598_v14  ;;  %v597_v21 = vadd.f32 1.0, %v6536_v16  ;;  %v6538_v28 = vpop.eup %6537 }
 0x123   : > { %v6540_v29 = vpop.eup %6539  ;;  %v593_v43 = vadd.f32 1.0, %v6538_v28  ;;  %v611_v46 = vmul.f32 0.5, %v595_v25 }
 0x124   : > { %v7231_v26 = vmul.f32 %v614_v19, %v7139_v42  ;;  %v613_v27 = vmul.f32 0.5, %v597_v21  ;;  %v6542_v32 = vpop.eup %6541  ;;  %v600_v38 = vadd.f32 1.0, %v6540_v29 }
 0x125   : > { %v6544_v41 = vpop.eup %6543  ;;  %v591_v57 = vadd.f32 1.0, %v6542_v32  ;;  %v609_v20 = vmul.f32 0.5, %v593_v43  ;;  %v7245_v30 = vmul.f32 %v611_v46, %v7129_v37 }
 0x126   : > { %675 = vrot.lane.b32.xlu1 %v7231_v26, %s6959_s17  ;;  %v7237_v42 = vmul.f32 %v613_v27, %v7154_v50  ;;  %v6546_v47 = vpop.eup %6545  ;;  %v616_v48 = vmul.f32 0.5, %v600_v38  ;;  %v596_v54 = vadd.f32 1.0, %v6544_v41 }
 0x127   : > { %v599_v49 = vadd.f32 1.0, %v6546_v47  ;;  %v6548_v56 = vpop.eup %6547  ;;  %v607_v0 = vmul.f32 0.5, %v591_v57  ;;  %v7255_v37 = vmul.f32 %v609_v20, %v7118_v31 }
 0x128   : > { %v7242_v55 = vmul.f32 %v616_v48, %v7186_v7  ;;  %v6550_v58 = vpop.eup %6549  ;;  %v594_v59 = vadd.f32 1.0, %v6548_v56  ;;  %v612_v61 = vmul.f32 0.5, %v596_v54 }
 0x129   : > { %v615_v50 = vmul.f32 0.5, %v599_v49  ;;  %v6552_v62 = vpop.eup %6551  ;;  %v589_v63 = vadd.f32 1.0, %v6550_v58  ;;  %v7265_v9 = vmul.f32 %v607_v0, %v7121_v33 }
 0x12a   : > { %673 = vrot.lane.b32.xlu1 %v7237_v42, %s6959_s17  ;;  %679 = vrot.lane.b32.xlu0 %v7242_v55, %s6959_s17  ;;  %v6554_v1 = vpop.eup %6553  ;;  %v592_v2 = vadd.f32 1.0, %v6552_v62  ;;  %v610_v3 = vmul.f32 0.5, %v594_v59  ;;  %v7262_v4 = vmul.f32 %v612_v61, %v7124_v35 }
 0x12b   : > { %v7252_v7 = vmul.f32 %v615_v50, %v7193_v15  ;;  %v6556_v15 = vpop.eup %6555  ;;  %v587_v6 = vadd.f32 1.0, %v6554_v1  ;;  %v605_v8 = vmul.f32 0.5, %v589_v63 }
 0x12c   : > { %v6558_v31 = vpop.eup %6557  ;;  %v590_v10 = vadd.f32 1.0, %v6556_v15  ;;  %v608_v11 = vmul.f32 0.5, %v592_v2  ;;  %v7272_v12 = vmul.f32 %v610_v3, %v7134_v40 }
 0x12d   : > { %v6560_v35 = vpop.eup %6559  ;;  %v585_v13 = vadd.f32 1.0, %v6558_v31  ;;  %v603_v14 = vmul.f32 0.5, %v587_v6  ;;  %v7275_v16 = vmul.f32 %v605_v8, %v7145_v45  ;;  %v1115_v8 = vld [vmem:[%s10198_s5] sm:$0xff]  ;;  %v714_v31 = vld [vmem:[%s10197_s4 + $0x8] sm:$0xff] }
 0x12e   : > { %669 = vrot.lane.b32.xlu1 %v7245_v30, %s6959_s17  ;;  %677 = vrot.lane.b32.xlu0 %v7252_v7, %s6959_s17  ;;  %v588_v33 = vadd.f32 1.0, %v6560_v35  ;;  %v606_v18 = vmul.f32 0.5, %v590_v10  ;;  %v7282_v19 = vmul.f32 %v608_v11, %v7160_v53  ;;  %v6562_v21 = vpop.eup %6561  ;;  %v715_v10 = vld [vmem:[%s10197_s4 + $0x10] sm:$0xff]  ;;  %v716_v11 = vld [vmem:[%s10197_s4 + $0x18] sm:$0xff] }
 0x12f   : > { %v601_v40 = vmul.f32 0.5, %v585_v13  ;;  %v7285_v22 = vmul.f32 %v603_v14, %v7157_v52  ;;  %v586_v45 = vadd.f32 1.0, %v6562_v21  ;;  %v717_v35 = vld [vmem:[%s10197_s4 + $0x20] sm:$0xff]  ;;  %v718_v13 = vld [vmem:[%s10197_s4 + $0x28] sm:$0xff]  ;;  %v719_v14 = vld [vmem:[%s10197_s4 + $0x30] sm:$0xff] }
 0x130   : > { %v604_v23 = vmul.f32 0.5, %v588_v33  ;;  %v7292_v24 = vmul.f32 %v606_v18, %v7181_v5  ;;  %v720_v33 = vld [vmem:[%s10197_s4 + $0x38] sm:$0xff]  ;;  %v721_v18 = vld [vmem:[%s10197_s4 + $0x40] sm:$0xff]  ;;  %v722_v21 = vld [vmem:[%s10197_s4 + $0x48] sm:$0xff] }
 0x131   : > { %v7295_v25 = vmul.f32 %v601_v40, %v7142_v44  ;;  %v602_v52 = vmul.f32 0.5, %v586_v45  ;;  %v713_v44 = vld [vmem:[%s10197_s4] sm:$0xff]  ;;  %v723_v40 = vld [vmem:[%s10197_s4 + $0x50] sm:$0xff]  ;;  %v724_v45 = vld [vmem:[%s10197_s4 + $0x58] sm:$0xff] }
 0x132   : > { %665 = vrot.lane.b32.xlu1 %v7255_v37, %s6959_s17  ;;  %671 = vrot.lane.b32.xlu0 %v7262_v4, %s6959_s17  ;;  %v7302_v53 = vmul.f32 %v604_v23, %v7171_v60  ;;  %v725_v23 = vld [vmem:[%s10197_s4 + $0x60] sm:$0xff] }
 0x133   : > { %v7307_v27 = vmul.f32 %v602_v52, %v7210_v39  ;;  %6139 = vmatprep.mubr.msk.f32.mxu1 %vm745_vm1, %v713_v44  ;;  %v726_v52 = vld [vmem:[%s10197_s4 + $0x68] sm:$0xff]  ;;  %v727_v44 = vld [vmem:[%s10197_s4 + $0x70] sm:$0xff] }
 0x136   : > { %661 = vrot.lane.b32.xlu1 %v7265_v9, %s6959_s17  ;;  %667 = vrot.lane.b32.xlu0 %v7272_v12, %s6959_s17 }
 0x13a   : > { %657 = vrot.lane.b32.xlu1 %v7275_v16, %s6959_s17  ;;  %663 = vrot.lane.b32.xlu0 %v7282_v19, %s6959_s17 }
 0x13e   : > { %653 = vrot.lane.b32.xlu1 %v7285_v22, %s6959_s17  ;;  %659 = vrot.lane.b32.xlu0 %v7292_v24, %s6959_s17 }
 0x142   : > { %649 = vrot.lane.b32.xlu1 %v7295_v25, %s6959_s17  ;;  %655 = vrot.lane.b32.xlu0 %v7302_v53, %s6959_s17 }
 0x146   : > { %651 = vrot.lane.b32.xlu0 %v7307_v27, %s6959_s17 }
 0x198   : > { %v676_v28 = vpop.permute.xlu1 %675 }
 0x199   : > { %v710_v32 = vsel %vm295_vm0, %v676_v28, 1.0  ;;  %v730_v28 = vld [vmem:[%s10197_s4 + $0x88] sm:$0xff] }
 0x19c   : > { %v680_v60 = vpop.permute.xlu0 %679  ;;  %v674_v34 = vpop.permute.xlu1 %673 }
 0x19d   : > { %v712_v5 = vsel %vm295_vm0, %v680_v60, 1.0  ;;  %v709_v36 = vsel %vm295_vm0, %v674_v34, 1.0  ;;  %v728_v60 = vld [vmem:[%s10197_s4 + $0x78] sm:$0xff]  ;;  %v734_v34 = vld [vmem:[%s10197_s4 + $0xa8] sm:$0xff] }
 0x19e   : > { %6107 = vmatprep.subr.msk.mxu1 %vm745_vm1, %v712_v5  ;;  %6188 = vmatpush3.xpose.msk.msra.mxu0 %vm745_vm1, %v712_v5 }
 0x19f   : > { %6108 = vmatpush3.xpose.msk.msra.mxu1 %vm745_vm1, %v712_v5  ;;  %6189 = vmatprep.subr.mxu0 %v10201_v17  ;;  %v729_v5 = vld [vmem:[%s10197_s4 + $0x80] sm:$0xff] }
 0x1a0   : > { %v678_v39 = vpop.permute.xlu0 %677  ;;  %v670_v43 = vpop.permute.xlu1 %669 }
 0x1a1   : > { %v711_v29 = vsel %vm295_vm0, %v678_v39, 1.0  ;;  %v707_v46 = vsel %vm295_vm0, %v670_v43, 1.0  ;;  %v731_v39 = vld [vmem:[%s10197_s4 + $0x90] sm:$0xff]  ;;  %v738_v43 = vld [vmem:[%s10197_s4 + $0xc8] sm:$0xff] }
 0x1a2   : > { %6109 = vmatprep.subr.msk.mxu1 %vm745_vm1, %v711_v29  ;;  %6190 = vmatpush3.xpose.msk.msra.mxu0 %vm745_vm1, %v711_v29 }
 0x1a3   : > { %6110 = vmatpush3.xpose.msk.msra.mxu1 %vm745_vm1, %v711_v29  ;;  %6191 = vmatprep.subr.mxu0 %v10201_v17  ;;  %v732_v29 = vld [vmem:[%s10197_s4 + $0x98] sm:$0xff] }
 0x1a4   : > { %6111 = vmatprep.subr.msk.mxu1 %vm745_vm1, %v710_v32  ;;  %v672_v38 = vpop.permute.xlu0 %671  ;;  %v666_v49 = vpop.permute.xlu1 %665 }
 0x1a5   : > { %v708_v41 = vsel %vm295_vm0, %v672_v38, 1.0  ;;  %v705_v51 = vsel %vm295_vm0, %v666_v49, 1.0  ;;  %v736_v38 = vld [vmem:[%s10197_s4 + $0xb8] sm:$0xff]  ;;  %v742_v49 = vld [vmem:[%s10197_s4 + $0xe8] sm:$0xff] }
 0x1a6   : > { %6192 = vmatpush3.xpose.msk.msra.mxu0 %vm745_vm1, %v710_v32 }
 0x1a7   : > { %6112 = vmatpush3.xpose.msk.msra.mxu1 %vm745_vm1, %v710_v32  ;;  %6193 = vmatprep.subr.mxu0 %v10201_v17  ;;  %v733_v32 = vld [vmem:[%s10197_s4 + $0xa0] sm:$0xff] }
 0x1a8   : > { %6113 = vmatprep.subr.msk.mxu1 %vm745_vm1, %v709_v36  ;;  %v668_v47 = vpop.permute.xlu0 %667  ;;  %v662_v57 = vpop.permute.xlu1 %661 }
 0x1a9   : > { %v706_v48 = vsel %vm295_vm0, %v668_v47, 1.0  ;;  %v703_v20 = vsel %vm295_vm0, %v662_v57, 1.0  ;;  %v740_v47 = vld [vmem:[%s10197_s4 + $0xd8] sm:$0xff] }
 0x1aa   : > { %6194 = vmatpush3.xpose.msk.msra.mxu0 %vm745_vm1, %v709_v36 }
 0x1ab   : > { %6114 = vmatpush3.xpose.msk.msra.mxu1 %vm745_vm1, %v709_v36  ;;  %6195 = vmatprep.subr.mxu0 %v10201_v17  ;;  %v735_v36 = vld [vmem:[%s10197_s4 + $0xb0] sm:$0xff] }
 0x1ac   : > { %6115 = vmatprep.subr.msk.mxu1 %vm745_vm1, %v708_v41  ;;  %v664_v54 = vpop.permute.xlu0 %663  ;;  %v658_v59 = vpop.permute.xlu1 %657 }
 0x1ad   : > { %v704_v56 = vsel %vm295_vm0, %v664_v54, 1.0  ;;  %v701_v61 = vsel %vm295_vm0, %v658_v59, 1.0  ;;  %v744_v54 = vld [vmem:[%s10197_s4 + $0xf8] sm:$0xff] }
 0x1ae   : > { %6196 = vmatpush3.xpose.msk.msra.mxu0 %vm745_vm1, %v708_v41 }
 0x1af   : > { %6116 = vmatpush3.xpose.msk.msra.mxu1 %vm745_vm1, %v708_v41  ;;  %6197 = vmatprep.subr.mxu0 %v10201_v17  ;;  %v737_v41 = vld [vmem:[%s10197_s4 + $0xc0] sm:$0xff] }
 0x1b0   : > { %6117 = vmatprep.subr.msk.mxu1 %vm745_vm1, %v707_v46  ;;  %v660_v50 = vpop.permute.xlu0 %659  ;;  %v654_v0 = vpop.permute.xlu1 %653 }
 0x1b1   : > { %v702_v58 = vsel %vm295_vm0, %v660_v50, 1.0  ;;  %v699_v1 = vsel %vm295_vm0, %v654_v0, 1.0 }
 0x1b2   : > { %6198 = vmatpush3.xpose.msk.msra.mxu0 %vm745_vm1, %v707_v46 }
 0x1b3   : > { %6118 = vmatpush3.xpose.msk.msra.mxu1 %vm745_vm1, %v707_v46  ;;  %6199 = vmatprep.subr.mxu0 %v10201_v17  ;;  %v739_v46 = vld [vmem:[%s10197_s4 + $0xd0] sm:$0xff] }
 0x1b4   : > { %6119 = vmatprep.subr.msk.mxu1 %vm745_vm1, %v706_v48  ;;  %v656_v62 = vpop.permute.xlu0 %655  ;;  %v650_v15 = vpop.permute.xlu1 %649 }
 0x1b5   : > { %v700_v63 = vsel %vm295_vm0, %v656_v62, 1.0  ;;  %v697_v6 = vsel %vm295_vm0, %v650_v15, 1.0 }
 0x1b6   : > { %6200 = vmatpush3.xpose.msk.msra.mxu0 %vm745_vm1, %v706_v48 }
 0x1b7   : > { %6120 = vmatpush3.xpose.msk.msra.mxu1 %vm745_vm1, %v706_v48  ;;  %6201 = vmatprep.subr.mxu0 %v10201_v17  ;;  %v741_v48 = vld [vmem:[%s10197_s4 + $0xe0] sm:$0xff] }
 0x1b8   : > { %6121 = vmatprep.subr.msk.mxu1 %vm745_vm1, %v705_v51  ;;  %v652_v2 = vpop.permute.xlu0 %651 }
 0x1b9   : > { %v698_v3 = vsel %vm295_vm0, %v652_v2, 1.0 }
 0x1ba   : > { %6202 = vmatpush3.xpose.msk.msra.mxu0 %vm745_vm1, %v705_v51 }
 0x1bb   : > { %6122 = vmatpush3.xpose.msk.msra.mxu1 %vm745_vm1, %v705_v51  ;;  %6203 = vmatprep.subr.mxu0 %v10201_v17  ;;  %v743_v51 = vld [vmem:[%s10197_s4 + $0xf0] sm:$0xff] }
 0x1bc   : > { %6123 = vmatprep.subr.msk.mxu1 %vm745_vm1, %v704_v56 }
 0x1be   : > { %6204 = vmatpush3.xpose.msk.msra.mxu0 %vm745_vm1, %v704_v56 }
 0x1bf   : > { %6124 = vmatpush3.xpose.msk.msra.mxu1 %vm745_vm1, %v704_v56  ;;  %6205 = vmatprep.subr.mxu0 %v10201_v17 }
 0x1c0   : > { %6125 = vmatprep.subr.msk.mxu1 %vm745_vm1, %v703_v20 }
 0x1c2   : > { %6206 = vmatpush3.xpose.msk.msra.mxu0 %vm745_vm1, %v703_v20 }
 0x1c3   : > { %6126 = vmatpush3.xpose.msk.msra.mxu1 %vm745_vm1, %v703_v20  ;;  %6207 = vmatprep.subr.mxu0 %v10201_v17 }
 0x1c4   : > { %6127 = vmatprep.subr.msk.mxu1 %vm745_vm1, %v702_v58 }
 0x1c6   : > { %6208 = vmatpush3.xpose.msk.msra.mxu0 %vm745_vm1, %v702_v58 }
 0x1c7   : > { %6128 = vmatpush3.xpose.msk.msra.mxu1 %vm745_vm1, %v702_v58  ;;  %6209 = vmatprep.subr.mxu0 %v10201_v17 }
 0x1c8   : > { %6129 = vmatprep.subr.msk.mxu1 %vm745_vm1, %v701_v61 }
 0x1ca   : > { %6210 = vmatpush3.xpose.msk.msra.mxu0 %vm745_vm1, %v701_v61 }
 0x1cb   : > { %6130 = vmatpush3.xpose.msk.msra.mxu1 %vm745_vm1, %v701_v61  ;;  %6211 = vmatprep.subr.mxu0 %v10201_v17 }
 0x1cc   : > { %6131 = vmatprep.subr.msk.mxu1 %vm745_vm1, %v700_v63 }
 0x1ce   : > { %6212 = vmatpush3.xpose.msk.msra.mxu0 %vm745_vm1, %v700_v63 }
 0x1cf   : > { %6132 = vmatpush3.xpose.msk.msra.mxu1 %vm745_vm1, %v700_v63  ;;  %6213 = vmatprep.subr.mxu0 %v10201_v17 }
 0x1d0   : > { %6133 = vmatprep.subr.msk.mxu1 %vm745_vm1, %v699_v1 }
 0x1d2   : > { %6214 = vmatpush3.xpose.msk.msra.mxu0 %vm745_vm1, %v699_v1 }
 0x1d3   : > { %6134 = vmatpush3.xpose.msk.msra.mxu1 %vm745_vm1, %v699_v1  ;;  %6215 = vmatprep.subr.mxu0 %v10201_v17 }
 0x1d4   : > { %6135 = vmatprep.subr.msk.mxu1 %vm745_vm1, %v698_v3 }
 0x1d6   : > { %6216 = vmatpush3.xpose.msk.msra.mxu0 %vm745_vm1, %v698_v3 }
 0x1d7   : > { %6136 = vmatpush3.xpose.msk.msra.mxu1 %vm745_vm1, %v698_v3  ;;  %6217 = vmatprep.subr.mxu0 %v10201_v17 }
 0x1d8   : > { %6137 = vmatprep.subr.msk.mxu1 %vm745_vm1, %v697_v6 }
 0x1da   : > { %6218 = vmatpush3.xpose.msk.msra.mxu0 %vm745_vm1, %v697_v6 }
 0x1db   : > { %6138 = vmatpush3.xpose.msk.msra.mxu1 %vm745_vm1, %v697_v6 }
 0x1dd   : > { %6220 = vmatmul.mubr.msk.f32.vlgmr.msra.gmra.mxu0 %vm745_vm1, %v1115_v8 }
 0x1de   : > { %6140 = vmatmul.mubr.msk.f32.vlgmr.msra.gmra.mxu1 %vm745_vm1, %v714_v31  ;;  %6230 = vmatprep.mubr.msk.f32.mxu0 %vm295_vm0, %v7295_v25 }
 0x1df   : > { %6142 = vmatprep.mubr.msk.f32.mxu1 %vm745_vm1, %v715_v10 }
 0x1e2   : > { %6143 = vmatmul.mubr.msk.f32.gmra.mxu1 %vm745_vm1, %v716_v11 }
 0x1e3   : > { %6145 = vmatprep.mubr.msk.f32.mxu1 %vm745_vm1, %v717_v35 }
 0x1e6   : > { %6146 = vmatmul.mubr.msk.f32.gmra.mxu1 %vm745_vm1, %v718_v13 }
 0x1e7   : > { %6148 = vmatprep.mubr.msk.f32.mxu1 %vm745_vm1, %v719_v14 }
 0x1ea   : > { %6149 = vmatmul.mubr.msk.f32.gmra.mxu1 %vm745_vm1, %v720_v33 }
 0x1eb   : > { %6151 = vmatprep.mubr.msk.f32.mxu1 %vm745_vm1, %v721_v18 }
 0x1ee   : > { %6152 = vmatmul.mubr.msk.f32.gmra.mxu1 %vm745_vm1, %v722_v21 }
 0x1ef   : > { %6154 = vmatprep.mubr.msk.f32.mxu1 %vm745_vm1, %v723_v40 }
 0x1f2   : > { %6155 = vmatmul.mubr.msk.f32.gmra.mxu1 %vm745_vm1, %v724_v45 }
 0x1f3   : > { %6157 = vmatprep.mubr.msk.f32.mxu1 %vm745_vm1, %v725_v23 }
 0x1f6   : > { %6158 = vmatmul.mubr.msk.f32.gmra.mxu1 %vm745_vm1, %v726_v52 }
 0x1f7   : > { %6160 = vmatprep.mubr.msk.f32.mxu1 %vm745_vm1, %v727_v44 }
 0x1fa   : > { %6161 = vmatmul.mubr.msk.f32.gmra.mxu1 %vm745_vm1, %v728_v60 }
 0x1fb   : > { %6163 = vmatprep.mubr.msk.f32.mxu1 %vm745_vm1, %v729_v5 }
 0x1fe   : > { %6164 = vmatmul.mubr.msk.f32.gmra.mxu1 %vm745_vm1, %v730_v28 }
 0x1ff   : > { %6166 = vmatprep.mubr.msk.f32.mxu1 %vm745_vm1, %v731_v39 }
 0x202   : > { %6167 = vmatmul.mubr.msk.f32.gmra.mxu1 %vm745_vm1, %v732_v29 }
 0x203   : > { %6169 = vmatprep.mubr.msk.f32.mxu1 %vm745_vm1, %v733_v32 }
 0x206   : > { %6170 = vmatmul.mubr.msk.f32.gmra.mxu1 %vm745_vm1, %v734_v34 }
 0x207   : > { %6172 = vmatprep.mubr.msk.f32.mxu1 %vm745_vm1, %v735_v36 }
 0x20a   : > { %6173 = vmatmul.mubr.msk.f32.gmra.mxu1 %vm745_vm1, %v736_v38 }
 0x20b   : > { %6175 = vmatprep.mubr.msk.f32.mxu1 %vm745_vm1, %v737_v41 }
 0x20e   : > { %6176 = vmatmul.mubr.msk.f32.gmra.mxu1 %vm745_vm1, %v738_v43 }
 0x20f   : > { %6178 = vmatprep.mubr.msk.f32.mxu1 %vm745_vm1, %v739_v46 }
 0x212   : > { %6179 = vmatmul.mubr.msk.f32.gmra.mxu1 %vm745_vm1, %v740_v47 }
 0x213   : > { %6181 = vmatprep.mubr.msk.f32.mxu1 %vm745_vm1, %v741_v48 }
 0x216   : > { %6182 = vmatmul.mubr.msk.f32.gmra.mxu1 %vm745_vm1, %v742_v49 }
 0x217   : > { %6184 = vmatprep.mubr.msk.f32.mxu1 %vm745_vm1, %v743_v51 }
 0x21a   : > { %6185 = vmatmul.mubr.msk.f32.gmra.mxu1 %vm745_vm1, %v744_v54 }
 0x21b   : > { %6294 = vmatprep.mubr.msk.f32.mxu1 %vm295_vm0, %v7295_v25 }
 0x29d   : > { %v7579_v18 = vpop.f32.mrf.mxu0 }
 0x29e   : > { %v6141_v56 = vpop.f32.mrf.mxu1 }
 0x29f   : > { %v6221_v40 = vpop.f32.mrf.mxu0 }
 0x2a0   : > { %v956_v57 = vpop.f32.mrf.mxu1 }
 0x2a2   : > { %v6144_v20 = vpop.f32.mrf.mxu1 }
 0x2a3   : > { %6222 = vmatprep.subr.mxu0 %v6144_v20 }
 0x2a4   : > { %v966_v50 = vpop.f32.mrf.mxu1  ;;  %6223 = vmatpush3.msra.mxu0 %v6144_v20 }
 0x2a5   : > { %6224 = vmatprep.subr.mxu0 %v966_v50 }
 0x2a6   : > { %v6147_v58 = vpop.f32.mrf.mxu1  ;;  %6225 = vmatpush3.msra.mxu0 %v966_v50 }
 0x2a7   : > { %6226 = vmatprep.subr.mxu0 %v6141_v56 }
 0x2a8   : > { %v976_v59 = vpop.f32.mrf.mxu1  ;;  %6227 = vmatpush3.msra.mxu0 %v6141_v56 }
 0x2a9   : > { %6228 = vmatprep.subr.mxu0 %v956_v57 }
 0x2aa   : > { %v6150_v61 = vpop.f32.mrf.mxu1  ;;  %6229 = vmatpush3.msra.mxu0 %v956_v57 }
 0x2ab   : > { %6231 = vmatmul.mubr.msk.f32.vlgmr.msra.gmra.mxu0 %vm295_vm0, %v7307_v27  ;;  %6254 = vmatprep.subr.mxu0 %v6150_v61 }
 0x2ac   : > { %v986_v62 = vpop.f32.mrf.mxu1  ;;  %6233 = vmatprep.mubr.msk.f32.mxu0 %vm295_vm0, %v7285_v22  ;;  %6255 = vmatpush3.msra.mxu0 %v6150_v61 }
 0x2ad   : > { %6256 = vmatprep.subr.mxu0 %v986_v62 }
 0x2ae   : > { %v6153_v63 = vpop.f32.mrf.mxu1  ;;  %6257 = vmatpush3.msra.mxu0 %v986_v62 }
 0x2af   : > { %6234 = vmatmul.mubr.msk.f32.gmra.mxu0 %vm295_vm0, %v7302_v53  ;;  %6258 = vmatprep.subr.mxu0 %v6147_v58 }
 0x2b0   : > { %v996_v0 = vpop.f32.mrf.mxu1  ;;  %6236 = vmatprep.mubr.msk.f32.mxu0 %vm295_vm0, %v7275_v16  ;;  %6259 = vmatpush3.msra.mxu0 %v6147_v58 }
 0x2b1   : > { %6260 = vmatprep.subr.mxu0 %v976_v59 }
 0x2b2   : > { %v6156_v1 = vpop.f32.mrf.mxu1  ;;  %6261 = vmatpush3.msra.mxu0 %v976_v59 }
 0x2b3   : > { %6237 = vmatmul.mubr.msk.f32.gmra.mxu0 %vm295_vm0, %v7292_v24  ;;  %6286 = vmatprep.subr.mxu1 %v6156_v1 }
 0x2b4   : > { %v1006_v2 = vpop.f32.mrf.mxu1  ;;  %6239 = vmatprep.mubr.msk.f32.mxu0 %vm295_vm0, %v7265_v9  ;;  %6287 = vmatpush3.msra.mxu1 %v6156_v1 }
 0x2b5   : > { %6288 = vmatprep.subr.mxu1 %v1006_v2 }
 0x2b6   : > { %6289 = vmatpush3.msra.mxu1 %v1006_v2  ;;  %v6159_v3 = vpop.f32.mrf.mxu1 }
 0x2b7   : > { %6240 = vmatmul.mubr.msk.f32.gmra.mxu0 %vm295_vm0, %v7282_v19  ;;  %6290 = vmatprep.subr.mxu1 %v6153_v63 }
 0x2b8   : > { %6242 = vmatprep.mubr.msk.f32.mxu0 %vm295_vm0, %v7255_v37  ;;  %6291 = vmatpush3.msra.mxu1 %v6153_v63  ;;  %v1016_v15 = vpop.f32.mrf.mxu1 }
 0x2b9   : > { %6292 = vmatprep.subr.mxu1 %v996_v0 }
 0x2ba   : > { %6293 = vmatpush3.msra.mxu1 %v996_v0  ;;  %v6162_v6 = vpop.f32.mrf.mxu1 }
 0x2bb   : > { %6243 = vmatmul.mubr.msk.f32.gmra.mxu0 %vm295_vm0, %v7272_v12  ;;  %6295 = vmatmul.mubr.msk.f32.vlgmr.msra.gmra.mxu1 %vm295_vm0, %v7307_v27 }
 0x2bc   : > { %6245 = vmatprep.mubr.msk.f32.mxu0 %vm295_vm0, %v7245_v30  ;;  %6297 = vmatprep.mubr.msk.f32.mxu1 %vm295_vm0, %v7285_v22  ;;  %v1026_v8 = vpop.f32.mrf.mxu1 }
 0x2bd   : > { %6318 = vmatprep.subr.mxu0 %v6162_v6 }
 0x2be   : > { %v6165_v31 = vpop.f32.mrf.mxu1 }
 0x2bf   : > { %6246 = vmatmul.mubr.msk.f32.gmra.mxu0 %vm295_vm0, %v7262_v4  ;;  %6298 = vmatmul.mubr.msk.f32.gmra.mxu1 %vm295_vm0, %v7302_v53 }
 0x2c0   : > { %6248 = vmatprep.mubr.msk.f32.mxu0 %vm295_vm0, %v7237_v42  ;;  %6300 = vmatprep.mubr.msk.f32.mxu1 %vm295_vm0, %v7275_v16  ;;  %v1036_v10 = vpop.f32.mrf.mxu1 }
 0x2c2   : > { %v6168_v11 = vpop.f32.mrf.mxu1 }
 0x2c3   : > { %6249 = vmatmul.mubr.msk.f32.gmra.mxu0 %vm295_vm0, %v7231_v26  ;;  %6301 = vmatmul.mubr.msk.f32.gmra.mxu1 %vm295_vm0, %v7292_v24 }
 0x2c4   : > { %6251 = vmatprep.mubr.msk.f32.mxu0 %vm295_vm0, %v7252_v7  ;;  %6303 = vmatprep.mubr.msk.f32.mxu1 %vm295_vm0, %v7265_v9  ;;  %v1046_v35 = vpop.f32.mrf.mxu1 }
 0x2c5   : > { %6350 = vmatprep.subr.mxu1 %v6168_v11 }
 0x2c6   : > { %6351 = vmatpush3.msra.mxu1 %v6168_v11  ;;  %v7567_v13 = vpop.f32.mrf.mxu1 }
 0x2c7   : > { %6252 = vmatmul.mubr.msk.f32.gmra.mxu0 %vm295_vm0, %v7242_v55  ;;  %6304 = vmatmul.mubr.msk.f32.gmra.mxu1 %vm295_vm0, %v7282_v19 }
 0x2c8   : > { %6262 = vmatprep.mubr.msk.f32.mxu0 %vm295_vm0, %v7295_v25  ;;  %6306 = vmatprep.mubr.msk.f32.mxu1 %vm295_vm0, %v7255_v37  ;;  %v7577_v14 = vpop.f32.mrf.mxu1 }
 0x2c9   : > { %6352 = vmatprep.subr.mxu1 %v1046_v35 }
 0x2ca   : > { %6353 = vmatpush3.msra.mxu1 %v1046_v35  ;;  %v6174_v33 = vpop.f32.mrf.mxu1 }
 0x2cb   : > { %6263 = vmatmul.mubr.msk.f32.vlgmr.msra.gmra.mxu0 %vm295_vm0, %v7307_v27  ;;  %6307 = vmatmul.mubr.msk.f32.gmra.mxu1 %vm295_vm0, %v7272_v12 }
 0x2cc   : > { %6319 = vmatpush3.msra.mxu0 %v6162_v6  ;;  %6265 = vmatprep.mubr.msk.f32.mxu0 %vm295_vm0, %v7285_v22  ;;  %v1066_v21 = vpop.f32.mrf.mxu1 }
 0x2cd   : > { %6309 = vmatprep.mubr.msk.f32.mxu1 %vm295_vm0, %v7245_v30  ;;  %6320 = vmatprep.subr.mxu0 %v1026_v8 }
 0x2ce   : > { %6321 = vmatpush3.msra.mxu0 %v1026_v8  ;;  %6354 = vmatprep.subr.mxu1 %v6165_v31  ;;  %v6177_v45 = vpop.f32.mrf.mxu1 }
 0x2cf   : > { %6322 = vmatprep.subr.mxu0 %v6159_v3  ;;  %6266 = vmatmul.mubr.msk.f32.gmra.mxu0 %vm295_vm0, %v7302_v53 }
 0x2d0   : > { %6310 = vmatmul.mubr.msk.f32.gmra.mxu1 %vm295_vm0, %v7262_v4  ;;  %6323 = vmatpush3.msra.mxu0 %v6159_v3  ;;  %v1076_v23 = vpop.f32.mrf.mxu1 }
 0x2d1   : > { %6268 = vmatprep.mubr.msk.f32.mxu0 %vm295_vm0, %v7275_v16  ;;  %6312 = vmatprep.mubr.msk.f32.mxu1 %vm295_vm0, %v7237_v42 }
 0x2d2   : > { %6324 = vmatprep.subr.mxu0 %v1016_v15  ;;  %6355 = vmatpush3.msra.mxu1 %v6165_v31  ;;  %v6180_v52 = vpop.f32.mrf.mxu1 }
 0x2d3   : > { %6325 = vmatpush3.msra.mxu0 %v1016_v15  ;;  %6356 = vmatprep.subr.mxu1 %v1036_v10 }
 0x2d4   : > { %6269 = vmatmul.mubr.msk.f32.gmra.mxu0 %vm295_vm0, %v7292_v24  ;;  %6313 = vmatmul.mubr.msk.f32.gmra.mxu1 %vm295_vm0, %v7231_v26  ;;  %v1086_v44 = vpop.f32.mrf.mxu1 }
 0x2d5   : > { %6271 = vmatprep.mubr.msk.f32.mxu0 %vm295_vm0, %v7265_v9  ;;  %6315 = vmatprep.mubr.msk.f32.mxu1 %vm295_vm0, %v7252_v7 }
 0x2d6   : > { %6357 = vmatpush3.msra.mxu1 %v1036_v10  ;;  %6382 = vmatprep.subr.mxu0 %v6174_v33  ;;  %v6183_v60 = vpop.f32.mrf.mxu1 }
 0x2d7   : > { %6414 = vmatprep.subr.mxu1 %v6180_v52 }
 0x2d8   : > { %6272 = vmatmul.mubr.msk.f32.gmra.mxu0 %vm295_vm0, %v7282_v19  ;;  %6316 = vmatmul.mubr.msk.f32.gmra.mxu1 %vm295_vm0, %v7242_v55  ;;  %v1096_v5 = vpop.f32.mrf.mxu1 }
 0x2d9   : > { %6274 = vmatprep.mubr.msk.f32.mxu0 %vm295_vm0, %v7255_v37  ;;  %6358 = vmatprep.mubr.msk.f32.mxu1 %vm295_vm0, %v7295_v25 }
 0x2da   : > { %v6186_v28 = vpop.f32.mrf.mxu1 }
 0x2dc   : > { %6275 = vmatmul.mubr.msk.f32.gmra.mxu0 %vm295_vm0, %v7272_v12  ;;  %6359 = vmatmul.mubr.msk.f32.vlgmr.msra.gmra.mxu1 %vm295_vm0, %v7307_v27  ;;  %v1106_v39 = vpop.f32.mrf.mxu1 }
 0x2dd   : > { %6277 = vmatprep.mubr.msk.f32.mxu0 %vm295_vm0, %v7245_v30  ;;  %6361 = vmatprep.mubr.msk.f32.mxu1 %vm295_vm0, %v7285_v22 }
 0x2de   : > { %6415 = vmatpush3.msra.mxu1 %v6180_v52 }
 0x2df   : > { %6416 = vmatprep.subr.mxu1 %v1086_v44 }
 0x2e0   : > { %6278 = vmatmul.mubr.msk.f32.gmra.mxu0 %vm295_vm0, %v7262_v4  ;;  %6362 = vmatmul.mubr.msk.f32.gmra.mxu1 %vm295_vm0, %v7302_v53 }
 0x2e1   : > { %6280 = vmatprep.mubr.msk.f32.mxu0 %vm295_vm0, %v7237_v42  ;;  %6364 = vmatprep.mubr.msk.f32.mxu1 %vm295_vm0, %v7275_v16 }
 0x2e2   : > { %6417 = vmatpush3.msra.mxu1 %v1086_v44 }
 0x2e3   : > { %6418 = vmatprep.subr.mxu1 %v6177_v45 }
 0x2e4   : > { %6281 = vmatmul.mubr.msk.f32.gmra.mxu0 %vm295_vm0, %v7231_v26  ;;  %6365 = vmatmul.mubr.msk.f32.gmra.mxu1 %vm295_vm0, %v7292_v24 }
 0x2e5   : > { %6283 = vmatprep.mubr.msk.f32.mxu0 %vm295_vm0, %v7252_v7  ;;  %6367 = vmatprep.mubr.msk.f32.mxu1 %vm295_vm0, %v7265_v9 }
 0x2e6   : > { %6419 = vmatpush3.msra.mxu1 %v6177_v45 }
 0x2e7   : > { %6420 = vmatprep.subr.mxu1 %v1076_v23 }
 0x2e8   : > { %6284 = vmatmul.mubr.msk.f32.gmra.mxu0 %vm295_vm0, %v7242_v55  ;;  %6368 = vmatmul.mubr.msk.f32.gmra.mxu1 %vm295_vm0, %v7282_v19 }
 0x2e9   : > { %6326 = vmatprep.mubr.msk.f32.mxu0 %vm295_vm0, %v7295_v25  ;;  %6370 = vmatprep.mubr.msk.f32.mxu1 %vm295_vm0, %v7255_v37 }
 0x2ea   : > { %6421 = vmatpush3.msra.mxu1 %v1076_v23 }
 0x2ec   : > { %6327 = vmatmul.mubr.msk.f32.vlgmr.msra.gmra.mxu0 %vm295_vm0, %v7307_v27  ;;  %6371 = vmatmul.mubr.msk.f32.gmra.mxu1 %vm295_vm0, %v7272_v12 }
 0x2ed   : > { %6383 = vmatpush3.msra.mxu0 %v6174_v33  ;;  %6329 = vmatprep.mubr.msk.f32.mxu0 %vm295_vm0, %v7285_v22 }
 0x2ee   : > { %6373 = vmatprep.mubr.msk.f32.mxu1 %vm295_vm0, %v7245_v30  ;;  %6384 = vmatprep.subr.mxu0 %v1066_v21 }
 0x2ef   : > { %6385 = vmatpush3.msra.mxu0 %v1066_v21 }
 0x2f0   : > { %6386 = vmatprep.subr.mxu0 %v7567_v13  ;;  %6330 = vmatmul.mubr.msk.f32.gmra.mxu0 %vm295_vm0, %v7302_v53 }
 0x2f1   : > { %6374 = vmatmul.mubr.msk.f32.gmra.mxu1 %vm295_vm0, %v7262_v4  ;;  %6387 = vmatpush3.msra.mxu0 %v7567_v13 }
 0x2f2   : > { %6332 = vmatprep.mubr.msk.f32.mxu0 %vm295_vm0, %v7275_v16  ;;  %6376 = vmatprep.mubr.msk.f32.mxu1 %vm295_vm0, %v7237_v42 }
 0x2f3   : > { %6388 = vmatprep.subr.mxu0 %v7577_v14 }
 0x2f4   : > { %6389 = vmatpush3.msra.mxu0 %v7577_v14 }
 0x2f5   : > { %6333 = vmatmul.mubr.msk.f32.gmra.mxu0 %vm295_vm0, %v7292_v24  ;;  %6377 = vmatmul.mubr.msk.f32.gmra.mxu1 %vm295_vm0, %v7231_v26 }
 0x2f6   : > { %6335 = vmatprep.mubr.msk.f32.mxu0 %vm295_vm0, %v7265_v9  ;;  %6379 = vmatprep.mubr.msk.f32.mxu1 %vm295_vm0, %v7252_v7 }
 0x2f7   : > { %6446 = vmatprep.subr.mxu0 %v6186_v28 }
 0x2f9   : > { %6336 = vmatmul.mubr.msk.f32.gmra.mxu0 %vm295_vm0, %v7282_v19  ;;  %6380 = vmatmul.mubr.msk.f32.gmra.mxu1 %vm295_vm0, %v7242_v55 }
 0x2fa   : > { %6338 = vmatprep.mubr.msk.f32.mxu0 %vm295_vm0, %v7255_v37  ;;  %6422 = vmatprep.mubr.msk.f32.mxu1 %vm295_vm0, %v7295_v25 }
 0x2fd   : > { %6339 = vmatmul.mubr.msk.f32.gmra.mxu0 %vm295_vm0, %v7272_v12  ;;  %6423 = vmatmul.mubr.msk.f32.vlgmr.msra.gmra.mxu1 %vm295_vm0, %v7307_v27 }
 0x2fe   : > { %6341 = vmatprep.mubr.msk.f32.mxu0 %vm295_vm0, %v7245_v30  ;;  %6425 = vmatprep.mubr.msk.f32.mxu1 %vm295_vm0, %v7285_v22 }
 0x301   : > { %6342 = vmatmul.mubr.msk.f32.gmra.mxu0 %vm295_vm0, %v7262_v4  ;;  %6426 = vmatmul.mubr.msk.f32.gmra.mxu1 %vm295_vm0, %v7302_v53 }
 0x302   : > { %6344 = vmatprep.mubr.msk.f32.mxu0 %vm295_vm0, %v7237_v42  ;;  %6428 = vmatprep.mubr.msk.f32.mxu1 %vm295_vm0, %v7275_v16 }
 0x305   : > { %6345 = vmatmul.mubr.msk.f32.gmra.mxu0 %vm295_vm0, %v7231_v26  ;;  %6429 = vmatmul.mubr.msk.f32.gmra.mxu1 %vm295_vm0, %v7292_v24 }
 0x306   : > { %6347 = vmatprep.mubr.msk.f32.mxu0 %vm295_vm0, %v7252_v7  ;;  %6431 = vmatprep.mubr.msk.f32.mxu1 %vm295_vm0, %v7265_v9 }
 0x309   : > { %6348 = vmatmul.mubr.msk.f32.gmra.mxu0 %vm295_vm0, %v7242_v55  ;;  %6432 = vmatmul.mubr.msk.f32.gmra.mxu1 %vm295_vm0, %v7282_v19 }
 0x30a   : > { %6390 = vmatprep.mubr.msk.f32.mxu0 %vm295_vm0, %v7295_v25  ;;  %6434 = vmatprep.mubr.msk.f32.mxu1 %vm295_vm0, %v7255_v37 }
 0x30d   : > { %6391 = vmatmul.mubr.msk.f32.vlgmr.msra.gmra.mxu0 %vm295_vm0, %v7307_v27  ;;  %6435 = vmatmul.mubr.msk.f32.gmra.mxu1 %vm295_vm0, %v7272_v12 }
 0x30e   : > { %6447 = vmatpush3.msra.mxu0 %v6186_v28  ;;  %6393 = vmatprep.mubr.msk.f32.mxu0 %vm295_vm0, %v7285_v22 }
 0x30f   : > { %6437 = vmatprep.mubr.msk.f32.mxu1 %vm295_vm0, %v7245_v30  ;;  %6448 = vmatprep.subr.mxu0 %v1106_v39 }
 0x310   : > { %6449 = vmatpush3.msra.mxu0 %v1106_v39 }
 0x311   : > { %6450 = vmatprep.subr.mxu0 %v6183_v60  ;;  %6394 = vmatmul.mubr.msk.f32.gmra.mxu0 %vm295_vm0, %v7302_v53 }
 0x312   : > { %6438 = vmatmul.mubr.msk.f32.gmra.mxu1 %vm295_vm0, %v7262_v4  ;;  %6451 = vmatpush3.msra.mxu0 %v6183_v60 }
 0x313   : > { %6396 = vmatprep.mubr.msk.f32.mxu0 %vm295_vm0, %v7275_v16  ;;  %6440 = vmatprep.mubr.msk.f32.mxu1 %vm295_vm0, %v7237_v42 }
 0x314   : > { %6452 = vmatprep.subr.mxu0 %v1096_v5 }
 0x315   : > { %6453 = vmatpush3.msra.mxu0 %v1096_v5 }
 0x316   : > { %6397 = vmatmul.mubr.msk.f32.gmra.mxu0 %vm295_vm0, %v7292_v24  ;;  %6441 = vmatmul.mubr.msk.f32.gmra.mxu1 %vm295_vm0, %v7231_v26 }
 0x317   : > { %6399 = vmatprep.mubr.msk.f32.mxu0 %vm295_vm0, %v7265_v9  ;;  %6443 = vmatprep.mubr.msk.f32.mxu1 %vm295_vm0, %v7252_v7 }
 0x31a   : > { %6400 = vmatmul.mubr.msk.f32.gmra.mxu0 %vm295_vm0, %v7282_v19  ;;  %6444 = vmatmul.mubr.msk.f32.gmra.mxu1 %vm295_vm0, %v7242_v55 }
 0x31b   : > { %6402 = vmatprep.mubr.msk.f32.mxu0 %vm295_vm0, %v7255_v37 }
 0x31e   : > { %6403 = vmatmul.mubr.msk.f32.gmra.mxu0 %vm295_vm0, %v7272_v12 }
 0x31f   : > { %6405 = vmatprep.mubr.msk.f32.mxu0 %vm295_vm0, %v7245_v30 }
 0x322   : > { %6406 = vmatmul.mubr.msk.f32.gmra.mxu0 %vm295_vm0, %v7262_v4 }
 0x323   : > { %6408 = vmatprep.mubr.msk.f32.mxu0 %vm295_vm0, %v7237_v42 }
 0x326   : > { %6409 = vmatmul.mubr.msk.f32.gmra.mxu0 %vm295_vm0, %v7231_v26 }
 0x327   : > { %6411 = vmatprep.mubr.msk.f32.mxu0 %vm295_vm0, %v7252_v7 }
 0x32a   : > { %6412 = vmatmul.mubr.msk.f32.gmra.mxu0 %vm295_vm0, %v7242_v55 }
 0x32b   : > { %6454 = vmatprep.mubr.msk.f32.mxu0 %vm295_vm0, %v7295_v25 }
 0x32e   : > { %6455 = vmatmul.mubr.msk.f32.vlgmr.msra.gmra.mxu0 %vm295_vm0, %v7307_v27 }
 0x32f   : > { %6457 = vmatprep.mubr.msk.f32.mxu0 %vm295_vm0, %v7285_v22 }
 0x332   : > { %6458 = vmatmul.mubr.msk.f32.gmra.mxu0 %vm295_vm0, %v7302_v53 }
 0x333   : > { %6460 = vmatprep.mubr.msk.f32.mxu0 %vm295_vm0, %v7275_v16 }
 0x336   : > { %6461 = vmatmul.mubr.msk.f32.gmra.mxu0 %vm295_vm0, %v7292_v24 }
 0x337   : > { %6463 = vmatprep.mubr.msk.f32.mxu0 %vm295_vm0, %v7265_v9 }
 0x33a   : > { %6464 = vmatmul.mubr.msk.f32.gmra.mxu0 %vm295_vm0, %v7282_v19 }
 0x33b   : > { %6466 = vmatprep.mubr.msk.f32.mxu0 %vm295_vm0, %v7255_v37  ;;  %v1190_v37 = vlaneseq }
 0x33d   : > { %v7790_v9 = vshrl.u32 %v1190_v37, 7 }
 0x33e   : > { %6467 = vmatmul.mubr.msk.f32.gmra.mxu0 %vm295_vm0, %v7272_v12 }
 0x33f   : > { %6469 = vmatprep.mubr.msk.f32.mxu0 %vm295_vm0, %v7245_v30  ;;  %v1277_v30 = vsub.s32 0, %v7790_v9  ;;  %v1688_v36 = vsub.s32 2, %v7790_v9  ;;  %v1474_v15 = vsub.s32 1, %v7790_v9  ;;  %v1902_v13 = vsub.s32 3, %v7790_v9 }
 0x340   : > { %v2116_v14 = vsub.s32 4, %v7790_v9  ;;  %v2330_v52 = vsub.s32 5, %v7790_v9  ;;  %v2544_v44 = vsub.s32 6, %v7790_v9 }
 0x341   : > { %v7814_v49 = vrot.slane %v7579_v18, %v1688_v36  ;;  %v7847_v40 = vrot.slane %v7579_v18, %v1474_v15 }
 0x342   : > { %6470 = vmatmul.mubr.msk.f32.gmra.mxu0 %vm295_vm0, %v7262_v4  ;;  %v1278_v4 = vrot.slane %v7579_v18, %v1277_v30  ;;  %v7863_v30 = vrot.slane %v7579_v18, %v1902_v13 }
 0x343   : > { %6472 = vmatprep.mubr.msk.f32.mxu0 %vm295_vm0, %v7237_v42 }
 0x346   : > { %6473 = vmatmul.mubr.msk.f32.gmra.mxu0 %vm295_vm0, %v7231_v26 }
 0x347   : > { %6475 = vmatprep.mubr.msk.f32.mxu0 %vm295_vm0, %v7252_v7 }
 0x34a   : > { %6476 = vmatmul.mubr.msk.f32.gmra.mxu0 %vm295_vm0, %v7242_v55 }
 0x36b   : > { %v6232_v12 = vpop.f32.mrf.mxu0 }
 0x36c   : > { %v7794_v16 = vadd.f32 %v6232_v12, %v1278_v4  ;;  %v7968_v12 = vstv %s7899_s24  ;;  %s6869_s24 = scalar_lea.vmem %s6868_s23, 4096 }
 0x36d   : > { %v1377_v42 = vpop.f32.mrf.mxu0  ;;  %p6871_p6 = scmp.lt.s32.totalorder %s6869_s24, %s6863_s21 }
 0x36e   : > { %10340 = vst [vmem:[#allocation12_spill] sm:$0xff] %v7794_v16  ;;  %v7796_v19 = vadd.f32 %v1377_v42, %v1278_v4 }
 0x36f   : > { %v6235_v26 = vpop.f32.mrf.mxu0  ;;  %p6872_p7 = por %p6871_p6, %p6870_p5 }
 0x370   : > { %10341 = vst [vmem:[#allocation13_spill] sm:$0xff] %v7796_v19  ;;  %v7798_v22 = vadd.f32 %v6235_v26, %v1278_v4 }
 0x371   : > { %v1387_v7 = vpop.f32.mrf.mxu0  ;;  %p6873_p8 = pnand %p6872_p7, %p6866_p4 }
 0x372   : > { %10342 = vst [vmem:[#allocation14_spill] sm:$0xff] %v7798_v22  ;;  %v7800_v24 = vadd.f32 %v1387_v7, %v1278_v4 }
 0x373   : > { %v6238_v55 = vpop.f32.mrf.mxu0 }
 0x374   : > { %10343 = vst [vmem:[#allocation15_spill] sm:$0xff] %v7800_v24  ;;  %v7802_v25 = vadd.f32 %v6238_v55, %v1278_v4 }
 0x375   : > { %v1397_v53 = vpop.f32.mrf.mxu0 }
 0x376   : > { %10344 = vst [vmem:[#allocation16_spill] sm:$0xff] %v7802_v25  ;;  %v7804_v27 = vadd.f32 %v1397_v53, %v1278_v4 }
 0x377   : > { %v6241_v29 = vpop.f32.mrf.mxu0 }
 0x378   : > { %10345 = vst [vmem:[#allocation17_spill] sm:$0xff] %v7804_v27  ;;  %v7806_v32 = vadd.f32 %v6241_v29, %v1278_v4  ;;  %v7881_v29 = vrot.slane %v7579_v18, %v2330_v52 }
 0x379   : > { %v1407_v34 = vpop.f32.mrf.mxu0 }
 0x37a   : > { %10346 = vst [vmem:[#allocation18_spill] sm:$0xff] %v7806_v32  ;;  %v7809_v38 = vadd.f32 %v1407_v34, %v1278_v4  ;;  %v7884_v34 = vrot.slane %v7579_v18, %v2544_v44 }
 0x37b   : > { %v6244_v41 = vpop.f32.mrf.mxu0  ;;  %v6296_v43 = vpop.f32.mrf.mxu1 }
 0x37c   : > { %10347 = vst [vmem:[#allocation19_spill] sm:$0xff] %v7809_v38  ;;  %v7811_v46 = vadd.f32 %v6244_v41, %v1278_v4  ;;  %v7870_v7 = vadd.f32 %v6296_v43, %v7814_v49  ;;  %v10207_v41 = vmov 0  }
 0x37d   : > { %v1417_v47 = vpop.f32.mrf.mxu0  ;;  %v1756_v48 = vpop.f32.mrf.mxu1 }
 0x37e   : > { %10348 = vst [vmem:[#allocation20_spill] sm:$0xff] %v7811_v46  ;;  %v7816_v51 = vadd.f32 %v1417_v47, %v1278_v4  ;;  %10364 = vst [vmem:[#allocation36_spill] sm:$0xff] %v7870_v7 }
 0x37f   : > { %v6247_v54 = vpop.f32.mrf.mxu0  ;;  %v6299_v56 = vpop.f32.mrf.mxu1 }
 0x380   : > { %10349 = vst [vmem:[#allocation21_spill] sm:$0xff] %v7816_v51  ;;  %v7818_v57 = vadd.f32 %v6247_v54, %v1278_v4  ;;  %v7821_v20 = vadd.f32 %v6299_v56, %v7814_v49  ;;  %v7890_v54 = vadd.f32 %v1756_v48, %v7814_v49 }
 0x381   : > { %v1427_v50 = vpop.f32.mrf.mxu0  ;;  %v1766_v58 = vpop.f32.mrf.mxu1 }
 0x382   : > { %10350 = vst [vmem:[#allocation22_spill] sm:$0xff] %v7818_v57  ;;  %10351 = vst [vmem:[#allocation23_spill] sm:$0xff] %v7821_v20  ;;  %v7823_v59 = vadd.f32 %v1427_v50, %v1278_v4  ;;  %v7826_v61 = vadd.f32 %v1766_v58, %v7814_v49 }
 0x383   : > { %v6250_v62 = vpop.f32.mrf.mxu0  ;;  %v6302_v63 = vpop.f32.mrf.mxu1  ;;  %10367 = vst [vmem:[#allocation39_spill] sm:$0xff] %v7890_v54 }
 0x384   : > { %10352 = vst [vmem:[#allocation24_spill] sm:$0xff] %v7823_v59  ;;  %10353 = vst [vmem:[#allocation25_spill] sm:$0xff] %v7826_v61  ;;  %v7828_v0 = vadd.f32 %v6250_v62, %v1278_v4  ;;  %v7831_v1 = vadd.f32 %v6302_v63, %v7814_v49 }
 0x385   : > { %v1437_v2 = vpop.f32.mrf.mxu0  ;;  %v1776_v3 = vpop.f32.mrf.mxu1 }
 0x386   : > { %10354 = vst [vmem:[#allocation26_spill] sm:$0xff] %v7828_v0  ;;  %10355 = vst [vmem:[#allocation27_spill] sm:$0xff] %v7831_v1  ;;  %v7834_v6 = vadd.f32 %v1437_v2, %v1278_v4  ;;  %v7837_v8 = vadd.f32 %v1776_v3, %v7814_v49 }
 0x387   : > { %v6253_v31 = vpop.f32.mrf.mxu0  ;;  %v6305_v10 = vpop.f32.mrf.mxu1 }
 0x388   : > { %10356 = vst [vmem:[#allocation28_spill] sm:$0xff] %v7834_v6  ;;  %10357 = vst [vmem:[#allocation29_spill] sm:$0xff] %v7837_v8  ;;  %v7839_v11 = vadd.f32 %v6253_v31, %v1278_v4  ;;  %v7842_v35 = vadd.f32 %v6305_v10, %v7814_v49 }
 0x389   : > { %v1447_v33 = vpop.f32.mrf.mxu0  ;;  %v1786_v21 = vpop.f32.mrf.mxu1 }
 0x38a   : > { %10358 = vst [vmem:[#allocation30_spill] sm:$0xff] %v7839_v11  ;;  %10359 = vst [vmem:[#allocation31_spill] sm:$0xff] %v7842_v35  ;;  %v7849_v45 = vadd.f32 %v1447_v33, %v1278_v4  ;;  %v7852_v23 = vadd.f32 %v1786_v21, %v7814_v49  ;;  %v7866_v4 = vrot.slane %v7579_v18, %v2116_v14 }
 0x38b   : > { %v6264_v60 = vpop.f32.mrf.mxu0  ;;  %v6308_v5 = vpop.f32.mrf.mxu1 }
 0x38c   : > { %10360 = vst [vmem:[#allocation32_spill] sm:$0xff] %v7849_v45  ;;  %10361 = vst [vmem:[#allocation33_spill] sm:$0xff] %v7852_v23  ;;  %v7857_v28 = vadd.f32 %v6264_v60, %v7847_v40  ;;  %v7860_v39 = vadd.f32 %v6308_v5, %v7814_v49  ;;  %v7933_v60 = vadd.s32 8, %v7790_v9 }
 0x38d   : > { %v1542_v42 = vpop.f32.mrf.mxu0  ;;  %v1796_v26 = vpop.f32.mrf.mxu1 }
 0x38e   : > { %10362 = vst [vmem:[#allocation34_spill] sm:$0xff] %v7857_v28  ;;  %10363 = vst [vmem:[#allocation35_spill] sm:$0xff] %v7860_v39  ;;  %vm1639_vm3 = vcmp.gt.f32.partialorder %v7857_v28, %v7794_v16  ;;  %v7875_v55 = vadd.f32 %v1542_v42, %v7847_v40  ;;  %v7878_v53 = vadd.f32 %v1796_v26, %v7814_v49 }
 0x38f   : > { %v1655_v36 = vsel %vm1639_vm3, %v7857_v28, %v7794_v16  ;;  %v1671_v43 = vsel %vm1639_vm3, 1, %v10207_v41  ;;  %v6267_v47 = vpop.f32.mrf.mxu0  ;;  %vm1211_vm2 = vcmp.lt.s32.totalorder %v7933_v60, %v7968_v12 }
 0x390   : > { %10365 = vst [vmem:[#allocation37_spill] sm:$0xff] %v7875_v55  ;;  %10366 = vst [vmem:[#allocation38_spill] sm:$0xff] %v7878_v53  ;;  %vm1853_vm4 = vcmp.gt.f32.partialorder %v7870_v7, %v1655_v36  ;;  %vm1638_vm5 = vcmp.gt.f32.partialorder %v7875_v55, %v7796_v19  ;;  %v7896_v56 = vadd.f32 %v6267_v47, %v7847_v40  ;;  %v6311_v50 = vpop.f32.mrf.mxu1 }
 0x391   : > { %v1654_v58 = vsel %vm1638_vm5, %v7875_v55, %v7796_v19  ;;  %v1670_v62 = vsel %vm1638_vm5, 1, %v10207_v41  ;;  %v7905_v63 = vadd.f32 %v6311_v50, %v7814_v49  ;;  %v1552_v48 = vpop.f32.mrf.mxu0  ;;  %v7908_v2 = vsel %vm1853_vm4, %v7870_v7, %v1655_v36 }
 0x392   : > { %10368 = vst [vmem:[#allocation40_spill] sm:$0xff] %v7896_v56  ;;  %vm1852_vm6 = vcmp.gt.f32.partialorder %v7890_v54, %v1654_v58  ;;  %vm1641_vm7 = vcmp.gt.f32.partialorder %v7896_v56, %v7798_v22  ;;  %v7914_v3 = vadd.f32 %v1552_v48, %v7847_v40  ;;  %v1806_v15 = vpop.f32.mrf.mxu1  ;;  %v7916_v31 = vsel %vm1853_vm4, 2, %v1671_v43 }
 0x393   : > { %10369 = vst [vmem:[#allocation41_spill] sm:$0xff] %v7905_v63  ;;  %v1657_v10 = vsel %vm1641_vm7, %v7896_v56, %v7798_v22  ;;  %v1673_v13 = vsel %vm1641_vm7, 1, %v10207_v41  ;;  %v7922_v14 = vadd.f32 %v1806_v15, %v7814_v49  ;;  %v7925_v33 = vsel %vm1852_vm6, %v7890_v54, %v1654_v58 }
 0x394   : > { %10370 = vst [vmem:[#allocation42_spill] sm:$0xff] %v7914_v3  ;;  %vm1855_vm8 = vcmp.gt.f32.partialorder %v7821_v20, %v1657_v10  ;;  %vm1640_vm9 = vcmp.gt.f32.partialorder %v7914_v3, %v7800_v24  ;;  %v6270_v21 = vpop.f32.mrf.mxu0  ;;  %v6314_v52 = vpop.f32.mrf.mxu1  ;;  %v7930_v44 = vsel %vm1852_vm6, 2, %v1670_v62  ;;  %v1208_v62 = vand.u32 127, %v1190_v37 }
 0x395   : > { %10371 = vst [vmem:[#allocation43_spill] sm:$0xff] %v7922_v14  ;;  %v1656_v5 = vsel %vm1640_vm9, %v7914_v3, %v7800_v24  ;;  %v1672_v42 = vsel %vm1640_vm9, 1, %v10207_v41  ;;  %v7939_v26 = vadd.f32 %v6270_v21, %v7847_v40  ;;  %v7942_v36 = vadd.f32 %v6314_v52, %v7814_v49 }
 0x396   : > { %vm1854_vm10 = vcmp.gt.f32.partialorder %v7826_v61, %v1656_v5  ;;  %v1562_v43 = vpop.f32.mrf.mxu0  ;;  %v1816_v47 = vpop.f32.mrf.mxu1  ;;  %v7946_v50 = vsel %vm1855_vm8, %v7821_v20, %v1657_v10  ;;  %v7948_v58 = vsel %vm1855_vm8, 2, %v1673_v13  ;;  %vm8027_vm5 = vcmp.lt.s32.totalorder %v1208_v62, %v7968_v12 }
 0x397   : > { %10372 = vst [vmem:[#allocation44_spill] sm:$0xff] %v7939_v26  ;;  %10373 = vst [vmem:[#allocation45_spill] sm:$0xff] %v7942_v36  ;;  %vm1643_vm11 = vcmp.gt.f32.partialorder %v7939_v26, %v7802_v25  ;;  %v7954_v48 = vadd.f32 %v1562_v43, %v7847_v40  ;;  %v7957_v15 = vadd.f32 %v1816_v47, %v7814_v49  ;;  %v7965_v37 = vsel %vm1854_vm10, 2, %v1672_v42 }
 0x398   : > { %v7960_v21 = vsel %vm1854_vm10, %v7826_v61, %v1656_v5  ;;  %v1659_v10 = vsel %vm1643_vm11, %v7939_v26, %v7802_v25  ;;  %v1675_v13 = vsel %vm1643_vm11, 1, %v10207_v41  ;;  %v6273_v52 = vpop.f32.mrf.mxu0  ;;  %v6317_v17 = vpop.f32.mrf.mxu1  ;;  %vm8067_vm8 = vmand %vm1211_vm2, %vm8027_vm5 }
 0x399   : > { %10374 = vst [vmem:[#allocation46_spill] sm:$0xff] %v7954_v48  ;;  %10375 = vst [vmem:[#allocation47_spill] sm:$0xff] %v7957_v15  ;;  %vm1857_vm12 = vcmp.gt.f32.partialorder %v7831_v1, %v1659_v10  ;;  %vm1642_vm13 = vcmp.gt.f32.partialorder %v7954_v48, %v7804_v27  ;;  %v7974_v43 = vadd.f32 %v6273_v52, %v7847_v40 }
 0x39a   : > { %v7977_v5 = vadd.f32 %v6317_v17, %v7814_v49  ;;  %v1658_v47 = vsel %vm1642_vm13, %v7954_v48, %v7804_v27  ;;  %v1674_v26 = vsel %vm1642_vm13, 1, %v10207_v41  ;;  %v1572_v42 = vpop.f32.mrf.mxu0  ;;  %v1826_v25 = vpop.f32.mrf.mxu1  ;;  %v7983_v61 = vsel %vm1857_vm12, %v7831_v1, %v1659_v10 }
 0x39b   : > { %10376 = vst [vmem:[#allocation48_spill] sm:$0xff] %v7974_v43  ;;  %v7985_v3 = vsel %vm1857_vm12, 2, %v1675_v13  ;;  %vm1856_vm14 = vcmp.gt.f32.partialorder %v7837_v8, %v1658_v47  ;;  %vm1645_vm15 = vcmp.gt.f32.partialorder %v7974_v43, %v7806_v32  ;;  %v7991_v17 = vadd.f32 %v1572_v42, %v7847_v40 }
 0x39c   : > { %10377 = vst [vmem:[#allocation49_spill] sm:$0xff] %v7977_v5  ;;  %v7994_v52 = vadd.f32 %v1826_v25, %v7814_v49  ;;  %v1661_v41 = vsel %vm1645_vm15, %v7974_v43, %v7806_v32  ;;  %v10380_v48 = vmov 0   ;;  %v6276_v10 = vpop.f32.mrf.mxu0  ;;  %v6360_v1 = vpop.f32.mrf.mxu1  ;;  %v8000_v13 = vsel %vm1856_vm14, %v7837_v8, %v1658_v47 }
 0x39d   : > { %10378 = vst [vmem:[#allocation50_spill] sm:$0xff] %v7991_v17  ;;  %v1677_v27 = vsel %vm1645_vm15, 1, %v10380_v48  ;;  %v8002_v24 = vsel %vm1856_vm14, 2, %v1674_v26  ;;  %vm1859_vm0 = vcmp.gt.f32.partialorder %v7842_v35, %v1661_v41  ;;  %vm1644_vm1 = vcmp.gt.f32.partialorder %v7991_v17, %v7809_v38 }
 0x39e   : > { %10379 = vst [vmem:[#allocation51_spill] sm:$0xff] %v7994_v52  ;;  %v8008_v25 = vadd.f32 %v6276_v10, %v7847_v40  ;;  %v1660_v49 = vsel %vm1644_vm1, %v7991_v17, %v7809_v38  ;;  %v1676_v42 = vsel %vm1644_vm1, 1, %v10380_v48  ;;  %v1582_v47 = vpop.f32.mrf.mxu0  ;;  %v2184_v43 = vpop.f32.mrf.mxu1  ;;  %v8016_v26 = vsel %vm1859_vm0, %v7842_v35, %v1661_v41 }
 0x39f   : > { %v8018_v32 = vsel %vm1859_vm0, 2, %v1677_v27  ;;  %vm1858_vm3 = vcmp.gt.f32.partialorder %v7852_v23, %v1660_v49  ;;  %v8024_v10 = vadd.f32 %v1582_v47, %v7847_v40  ;;  %v10383_v17 = vmov 0 }
 0x3a0   : > { %10381 = vst [vmem:[#allocation52_spill] sm:$0xff] %v8008_v25  ;;  %vm1647_vm4 = vcmp.gt.f32.partialorder %v8008_v25, %v7811_v46  ;;  %v10384_v17 = vsel %vm8027_vm5, 4294967295, %v10383_v17  ;;  %v6279_v27 = vpop.f32.mrf.mxu0  ;;  %v8034_v35 = vpop.f32.mrf.mxu1  ;;  %v8037_v8 = vsel %vm1858_vm3, %v7852_v23, %v1660_v49  ;;  %v8039_v20 = vsel %vm1858_vm3, 2, %v1676_v42 }
 0x3a1   : > { %10382 = vst [vmem:[#allocation53_spill] sm:$0xff] %v8024_v10  ;;  %10385 = vst [vmem:[#allocation54_spill] sm:$0xff] %v10384_v17  ;;  %v1663_v38 = vsel %vm1647_vm4, %v8008_v25, %v7811_v46  ;;  %v1679_v41 = vsel %vm1647_vm4, 1, %v10380_v48  ;;  %v10386_v47 = vsub.s32 7, %v7790_v9  ;;  %vm1646_vm7 = vcmp.gt.f32.partialorder %v8024_v10, %v7816_v51 }
 0x3a2   : > { %vm1861_vm6 = vcmp.gt.f32.partialorder %v7860_v39, %v1663_v38  ;;  %v8050_v25 = vadd.f32 %v6279_v27, %v7847_v40  ;;  %v1662_v46 = vsel %vm1646_vm7, %v8024_v10, %v7816_v51  ;;  %v1678_v49 = vsel %vm1646_vm7, 1, %v10380_v48  ;;  %v1592_v42 = vpop.f32.mrf.mxu0  ;;  %v8055_v23 = vpop.f32.mrf.mxu1 }
 0x3a3   : > { %v8044_v62 = vrot.slane %v7579_v18, %v10386_v47  ;;  %v8058_v56 = vsel %vm1861_vm6, %v7860_v39, %v1663_v38  ;;  %v8060_v18 = vsel %vm1861_vm6, 2, %v1679_v41  ;;  %v10389_v27 = vmov 0 }
 0x3a4   : > { %10388 = vst [vmem:[#allocation56_spill] sm:$0xff] %v8050_v25  ;;  %v10390_v27 = vsel %vm8067_vm8, 4294967295, %v10389_v27  ;;  %vm1860_vm9 = vcmp.gt.f32.partialorder %v7878_v53, %v1662_v46  ;;  %vm1649_vm10 = vcmp.gt.f32.partialorder %v8050_v25, %v7818_v57  ;;  %v8075_v47 = vadd.f32 %v1592_v42, %v7847_v40  ;;  %v6282_v51 = vpop.f32.mrf.mxu0  ;;  %v8085_v39 = vpop.f32.mrf.mxu1 }
 0x3a5   : > { %10387 = vst [vmem:[#allocation55_spill] sm:$0xff] %v8044_v62  ;;  %10391 = vst [vmem:[#allocation57_spill] sm:$0xff] %v10390_v27  ;;  %v10393_v38 = vmov 0.0   ;;  %v1665_v60 = vsel %vm1649_vm10, %v8050_v25, %v7818_v57  ;;  %v1681_v10 = vsel %vm1649_vm10, 1, %v10380_v48  ;;  %v8088_v22 = vsel %vm1860_vm9, %v7878_v53, %v1662_v46 }
 0x3a6   : > { %10392 = vst [vmem:[#allocation58_spill] sm:$0xff] %v8075_v47  ;;  %v8080_v41 = vsel %vm8067_vm8, 1.0, %v10393_v38  ;;  %v8090_v54 = vsel %vm1860_vm9, 2, %v1678_v49  ;;  %v8093_v42 = vadd.f32 %v6360_v1, %v7866_v4  ;;  %vm1863_vm11 = vcmp.gt.f32.partialorder %v7905_v63, %v1665_v60  ;;  %v1602_v46 = vpop.f32.mrf.mxu0  ;;  %v8104_v53 = vpop.f32.mrf.mxu1 }
 0x3a7   : > { %10394 = vst [vmem:[#allocation59_spill] sm:$0xff] %v8080_v41  ;;  %vm1648_vm12 = vcmp.gt.f32.partialorder %v8075_v47, %v7823_v59  ;;  %v8099_v25 = vadd.f32 %v6282_v51, %v7847_v40  ;;  %v8107_v49 = vsel %vm1863_vm11, %v7905_v63, %v1665_v60  ;;  %v8109_v1 = vsel %vm1863_vm11, 2, %v1681_v10 }
 0x3a8   : > { %10395 = vst [vmem:[#allocation60_spill] sm:$0xff] %v8093_v42  ;;  %v1664_v57 = vsel %vm1648_vm12, %v8075_v47, %v7823_v59  ;;  %v1680_v41 = vsel %vm1648_vm12, 1, %v10380_v48  ;;  %v8112_v55 = vadd.f32 %v2184_v43, %v7866_v4  ;;  %v8118_v51 = vadd.f32 %v1602_v46, %v7847_v40  ;;  %v6285_v60 = vpop.f32.mrf.mxu0  ;;  %v6369_v63 = vpop.f32.mrf.mxu1 }
 0x3a9   : > { %10396 = vst [vmem:[#allocation61_spill] sm:$0xff] %v8099_v25  ;;  %vm1862_vm13 = vcmp.gt.f32.partialorder %v7922_v14, %v1664_v57  ;;  %vm1651_vm14 = vcmp.gt.f32.partialorder %v8099_v25, %v7828_v0  ;;  %v8132_v46 = vadd.f32 %v6285_v60, %v7847_v40  ;;  %v8135_v19 = vadd.f32 %v6369_v63, %v7866_v4 }
 0x3aa   : > { %10397 = vst [vmem:[#allocation62_spill] sm:$0xff] %v8112_v55  ;;  %10398 = vst [vmem:[#allocation63_spill] sm:$0xff] %v8118_v51  ;;  %v1667_v47 = vsel %vm1651_vm14, %v8099_v25, %v7828_v0  ;;  %v1683_v59 = vsel %vm1651_vm14, 1, %v10380_v48  ;;  %v8124_v10 = vsel %vm1862_vm13, %v7922_v14, %v1664_v57  ;;  %v8126_v43 = vsel %vm1862_vm13, 2, %v1680_v41  ;;  %v1612_v57 = vpop.f32.mrf.mxu0  ;;  %v2214_v14 = vpop.f32.mrf.mxu1 }
 0x3ab   : > { %vm1865_vm15 = vcmp.gt.f32.partialorder %v7942_v36, %v1667_v47  ;;  %vm1650_vm0 = vcmp.gt.f32.partialorder %v8118_v51, %v7834_v6  ;;  %10399 = vst [vmem:[#allocation64_spill] sm:$0xff] %v8132_v46  ;;  %10400 = vst [vmem:[#allocation65_spill] sm:$0xff] %v8135_v19  ;;  %vm1653_vm2 = vcmp.gt.f32.partialorder %v8132_v46, %v7839_v11 }
 0x3ac   : > { %v1666_v25 = vsel %vm1650_vm0, %v8118_v51, %v7834_v6  ;;  %v1682_v0 = vsel %vm1650_vm0, 1, %v10380_v48  ;;  %v8141_v41 = vsel %vm1865_vm15, %v7942_v36, %v1667_v47  ;;  %v8143_v27 = vsel %vm1865_vm15, 2, %v1683_v59  ;;  %v6328_v47 = vpop.f32.mrf.mxu0  ;;  %v6372_v36 = vpop.f32.mrf.mxu1 }
 0x3ad   : > { %vm1864_vm1 = vcmp.gt.f32.partialorder %v7957_v15, %v1666_v25  ;;  %v8149_v63 = vadd.f32 %v1612_v57, %v7847_v40  ;;  %v8152_v60 = vadd.f32 %v2214_v14, %v7866_v4  ;;  %v1669_v51 = vsel %vm1653_vm2, %v8132_v46, %v7839_v11 }
 0x3ae   : > { %v1685_v6 = vsel %vm1653_vm2, 1, %v10380_v48  ;;  %v8158_v59 = vsel %vm1864_vm1, %v7957_v15, %v1666_v25  ;;  %v8160_v7 = vsel %vm1864_vm1, 2, %v1682_v0  ;;  %vm1867_vm3 = vcmp.gt.f32.partialorder %v7977_v5, %v1669_v51  ;;  %v1970_v25 = vpop.f32.mrf.mxu0  ;;  %v2224_v11 = vpop.f32.mrf.mxu1 }
 0x3af   : > { %10401 = vst [vmem:[#allocation66_spill] sm:$0xff] %v8149_v63  ;;  %10402 = vst [vmem:[#allocation67_spill] sm:$0xff] %v8152_v60  ;;  %vm1652_vm4 = vcmp.gt.f32.partialorder %v8149_v63, %v7849_v45  ;;  %v8166_v40 = vadd.f32 %v6328_v47, %v7863_v30  ;;  %v8169_v14 = vadd.f32 %v6372_v36, %v7866_v4  ;;  %v8177_v15 = vsel %vm1867_vm3, 2, %v1685_v6 }
 0x3b0   : > { %v1668_v57 = vsel %vm1652_vm4, %v8149_v63, %v7849_v45  ;;  %v1684_v46 = vsel %vm1652_vm4, 1, %v10380_v48  ;;  %v8175_v0 = vsel %vm1867_vm3, %v7977_v5, %v1669_v51  ;;  %v8183_v36 = vadd.f32 %v1970_v25, %v7863_v30  ;;  %v6331_v51 = vpop.f32.mrf.mxu0 }
 0x3b1   : > { %10403 = vst [vmem:[#allocation68_spill] sm:$0xff] %v8166_v40  ;;  %10404 = vst [vmem:[#allocation69_spill] sm:$0xff] %v8169_v14  ;;  %vm1866_vm6 = vcmp.gt.f32.partialorder %v7994_v52, %v1668_v57  ;;  %vm2067_vm7 = vcmp.gt.f32.partialorder %v8166_v40, %v7908_v2  ;;  %v8186_v47 = vadd.f32 %v2224_v11, %v7866_v4 }
 0x3b2   : > { %10405 = vst [vmem:[#allocation70_spill] sm:$0xff] %v8183_v36  ;;  %v2083_v48 = vsel %vm2067_vm7, %v8166_v40, %v7908_v2  ;;  %v2099_v63 = vsel %vm2067_vm7, 3, %v7916_v31  ;;  %v8192_v6 = vsel %vm1866_vm6, %v7994_v52, %v1668_v57  ;;  %v8194_v45 = vsel %vm1866_vm6, 2, %v1684_v46  ;;  %v6375_v2 = vpop.f32.mrf.mxu1  ;;  %v1980_v25 = vpop.f32.mrf.mxu0 }
 0x3b3   : > { %10406 = vst [vmem:[#allocation71_spill] sm:$0xff] %v8186_v47  ;;  %v8198_v5 = vadd.f32 %v8034_v35, %v7866_v4  ;;  %vm2281_vm9 = vcmp.gt.f32.partialorder %v8093_v42, %v2083_v48  ;;  %vm2066_vm10 = vcmp.gt.f32.partialorder %v8183_v36, %v7925_v33  ;;  %v8204_v11 = vadd.f32 %v6331_v51, %v7863_v30 }
 0x3b4   : > { %v2082_v31 = vsel %vm2066_vm10, %v8183_v36, %v7925_v33  ;;  %v2098_v57 = vsel %vm2066_vm10, 3, %v7930_v44  ;;  %v8210_v46 = vadd.f32 %v6375_v2, %v7866_v4  ;;  %v8213_v35 = vsel %vm2281_vm9, %v8093_v42, %v2083_v48  ;;  %v2234_v52 = vpop.f32.mrf.mxu1 }
 0x3b5   : > { %10407 = vst [vmem:[#allocation72_spill] sm:$0xff] %v8198_v5  ;;  %10408 = vst [vmem:[#allocation73_spill] sm:$0xff] %v8204_v11  ;;  %vm2280_vm11 = vcmp.gt.f32.partialorder %v8112_v55, %v2082_v31  ;;  %vm2069_vm12 = vcmp.gt.f32.partialorder %v8204_v11, %v7946_v50  ;;  %v8219_v51 = vadd.f32 %v1980_v25, %v7863_v30  ;;  %v8221_v40 = vsel %vm2281_vm9, 4, %v2099_v63  ;;  %v6334_v63 = vpop.f32.mrf.mxu0 }
 0x3b6   : > { %10409 = vst [vmem:[#allocation74_spill] sm:$0xff] %v8210_v46  ;;  %v2085_v33 = vsel %vm2069_vm12, %v8204_v11, %v7946_v50  ;;  %v2101_v44 = vsel %vm2069_vm12, 3, %v7948_v58  ;;  %v8227_v2 = vadd.f32 %v2234_v52, %v7866_v4  ;;  %v8230_v48 = vsel %vm2280_vm11, %v8112_v55, %v2082_v31  ;;  %v6378_v25 = vpop.f32.mrf.mxu1 }
 0x3b7   : > { %10410 = vst [vmem:[#allocation75_spill] sm:$0xff] %v8219_v51  ;;  %v8234_v36 = vadd.f32 %v8055_v23, %v7866_v4  ;;  %vm2283_vm13 = vcmp.gt.f32.partialorder %v8198_v5, %v2085_v33  ;;  %vm2068_vm14 = vcmp.gt.f32.partialorder %v8219_v51, %v7960_v21  ;;  %v8239_v50 = vsel %vm2280_vm11, 4, %v2098_v57  ;;  %v1990_v55 = vpop.f32.mrf.mxu0 }
 0x3b8   : > { %10411 = vst [vmem:[#allocation76_spill] sm:$0xff] %v8227_v2  ;;  %v2084_v58 = vsel %vm2068_vm14, %v8219_v51, %v7960_v21  ;;  %v2100_v52 = vsel %vm2068_vm14, 3, %v7965_v37  ;;  %v8245_v31 = vadd.f32 %v6334_v63, %v7863_v30  ;;  %v8248_v23 = vadd.f32 %v6378_v25, %v7866_v4  ;;  %v2244_v57 = vpop.f32.mrf.mxu1 }
 0x3b9   : > { %10412 = vst [vmem:[#allocation77_spill] sm:$0xff] %v8234_v36  ;;  %v8252_v11 = vadd.f32 %v8085_v39, %v7866_v4  ;;  %vm2282_vm15 = vcmp.gt.f32.partialorder %v8234_v36, %v2084_v58  ;;  %v8256_v42 = vsel %vm2283_vm13, %v8198_v5, %v2085_v33  ;;  %v8258_v21 = vsel %vm2283_vm13, 4, %v2101_v44  ;;  %v6337_v51 = vpop.f32.mrf.mxu0 }
 0x3ba   : > { %10413 = vst [vmem:[#allocation78_spill] sm:$0xff] %v8245_v31  ;;  %10414 = vst [vmem:[#allocation79_spill] sm:$0xff] %v8248_v23  ;;  %vm2071_vm0 = vcmp.gt.f32.partialorder %v8245_v31, %v7983_v61  ;;  %v8263_v37 = vadd.f32 %v1990_v55, %v7863_v30  ;;  %v8266_v63 = vadd.f32 %v2244_v57, %v7866_v4  ;;  %v6381_v5 = vpop.f32.mrf.mxu1  ;;  %v8278_v28 = vsel %vm2282_vm15, 4, %v2100_v52 }
 0x3bb   : > { %10415 = vst [vmem:[#allocation80_spill] sm:$0xff] %v8252_v11  ;;  %v8269_v39 = vsel %vm2282_vm15, %v8234_v36, %v2084_v58  ;;  %v8273_v25 = vadd.f32 %v8104_v53, %v7866_v4  ;;  %v2087_v33 = vsel %vm2071_vm0, %v8245_v31, %v7983_v61  ;;  %v2103_v44 = vsel %vm2071_vm0, 3, %v7985_v3  ;;  %v2000_v58 = vpop.f32.mrf.mxu0 }
 0x3bc   : > { %10416 = vst [vmem:[#allocation81_spill] sm:$0xff] %v8263_v37  ;;  %10417 = vst [vmem:[#allocation82_spill] sm:$0xff] %v8266_v63  ;;  %vm2285_vm1 = vcmp.gt.f32.partialorder %v8252_v11, %v2087_v33  ;;  %vm2070_vm2 = vcmp.gt.f32.partialorder %v8263_v37, %v8000_v13  ;;  %v8284_v55 = vadd.f32 %v6337_v51, %v7863_v30  ;;  %v2254_v57 = vpop.f32.mrf.mxu1 }
 0x3bd   : > { %10418 = vst [vmem:[#allocation83_spill] sm:$0xff] %v8273_v25  ;;  %v8287_v53 = vadd.f32 %v6381_v5, %v7866_v4  ;;  %v2086_v61 = vsel %vm2070_vm2, %v8263_v37, %v8000_v13  ;;  %v2102_v3 = vsel %vm2070_vm2, 3, %v8002_v24  ;;  %v8293_v52 = vsel %vm2285_vm1, %v8252_v11, %v2087_v33  ;;  %v6340_v33 = vpop.f32.mrf.mxu0 }
 0x3be   : > { %10419 = vst [vmem:[#allocation84_spill] sm:$0xff] %v8284_v55  ;;  %v8295_v31 = vsel %vm2285_vm1, 4, %v2103_v44  ;;  %vm2284_vm3 = vcmp.gt.f32.partialorder %v8273_v25, %v2086_v61  ;;  %vm2073_vm4 = vcmp.gt.f32.partialorder %v8284_v55, %v8016_v26  ;;  %v8301_v5 = vadd.f32 %v2000_v58, %v7863_v30  ;;  %v8309_v37 = vpop.f32.mrf.mxu1 }
 0x3bf   : > { %10420 = vst [vmem:[#allocation85_spill] sm:$0xff] %v8287_v53  ;;  %v8304_v51 = vadd.f32 %v2254_v57, %v7866_v4  ;;  %v2089_v24 = vsel %vm2073_vm4, %v8284_v55, %v8016_v26  ;;  %v2105_v13 = vsel %vm2073_vm4, 3, %v8018_v32  ;;  %v8312_v44 = vsel %vm2284_vm3, %v8273_v25, %v2086_v61  ;;  %v2010_v61 = vpop.f32.mrf.mxu0 }
 0x3c0   : > { %10421 = vst [vmem:[#allocation86_spill] sm:$0xff] %v8301_v5  ;;  %v8314_v11 = vsel %vm2284_vm3, 4, %v2102_v3  ;;  %vm2287_vm6 = vcmp.gt.f32.partialorder %v8135_v19, %v2089_v24  ;;  %vm2072_vm7 = vcmp.gt.f32.partialorder %v8301_v5, %v8037_v8  ;;  %v8320_v4 = vadd.f32 %v6340_v33, %v7863_v30  ;;  %v8327_v58 = vpop.f32.mrf.mxu1 }
 0x3c1   : > { %10422 = vst [vmem:[#allocation87_spill] sm:$0xff] %v8304_v51  ;;  %vm1210_vm9 = vcmp.lt.s32.totalorder %v7790_v9, %v7968_v12  ;;  %v2088_v32 = vsel %vm2072_vm7, %v8301_v5, %v8037_v8  ;;  %v2104_v26 = vsel %vm2072_vm7, 3, %v8039_v20  ;;  %v8330_v3 = vsel %vm2287_vm6, %v8135_v19, %v2089_v24  ;;  %v6343_v55 = vpop.f32.mrf.mxu0 }
 0x3c2   : > { %10423 = vst [vmem:[#allocation88_spill] sm:$0xff] %v8320_v4  ;;  %v8332_v57 = vsel %vm2287_vm6, 4, %v2105_v13  ;;  %vm2286_vm10 = vcmp.gt.f32.partialorder %v8152_v60, %v2088_v32  ;;  %vm2075_vm11 = vcmp.gt.f32.partialorder %v8320_v4, %v8058_v56  ;;  %v8338_v33 = vadd.f32 %v2010_v61, %v7863_v30  ;;  %v8344_v24 = vpop.f32.mrf.mxu1  ;;  %vm8426_vm7 = vmand %vm1210_vm9, %vm8027_vm5 }
 0x3c3   : > { %v1194_v8 = vadd.s32 24, %v7790_v9  ;;  %v2091_v20 = vsel %vm2075_vm11, %v8320_v4, %v8058_v56  ;;  %v2107_v5 = vsel %vm2075_vm11, 3, %v8060_v18  ;;  %v8347_v13 = vsel %vm2286_vm10, %v8152_v60, %v2088_v32  ;;  %v2020_v25 = vpop.f32.mrf.mxu0 }
 0x3c4   : > { %10424 = vst [vmem:[#allocation89_spill] sm:$0xff] %v8338_v33  ;;  %v8349_v19 = vsel %vm2286_vm10, 4, %v2104_v26  ;;  %vm2289_vm12 = vcmp.gt.f32.partialorder %v8169_v14, %v2091_v20  ;;  %vm2074_vm13 = vcmp.gt.f32.partialorder %v8338_v33, %v8088_v22  ;;  %v8355_v61 = vadd.f32 %v6343_v55, %v7863_v30  ;;  %v8361_v32 = vpop.f32.mrf.mxu1 }
 0x3c5   : > { %v1193_v56 = vadd.s32 16, %v7790_v9  ;;  %v2090_v18 = vsel %vm2074_vm13, %v8338_v33, %v8088_v22  ;;  %v2106_v4 = vsel %vm2074_vm13, 3, %v8090_v54  ;;  %v8364_v26 = vsel %vm2289_vm12, %v8169_v14, %v2091_v20  ;;  %v6346_v33 = vpop.f32.mrf.mxu0 }
 0x3c6   : > { %10425 = vst [vmem:[#allocation90_spill] sm:$0xff] %v8355_v61  ;;  %v8366_v60 = vsel %vm2289_vm12, 4, %v2107_v5  ;;  %vm2288_vm14 = vcmp.gt.f32.partialorder %v8186_v47, %v2090_v18  ;;  %vm2077_vm15 = vcmp.gt.f32.partialorder %v8355_v61, %v8107_v49  ;;  %v8372_v55 = vadd.f32 %v2020_v25, %v7863_v30  ;;  %v8378_v20 = vpop.f32.mrf.mxu1 }
 0x3c7   : > { %vm1213_vm0 = vcmp.lt.s32.totalorder %v1194_v8, %v7968_v12  ;;  %v2093_v22 = vsel %vm2077_vm15, %v8355_v61, %v8107_v49  ;;  %v2109_v54 = vsel %vm2077_vm15, 3, %v8109_v1  ;;  %v8381_v5 = vsel %vm2288_vm14, %v8186_v47, %v2090_v18  ;;  %v2030_v61 = vpop.f32.mrf.mxu0 }
 0x3c8   : > { %10426 = vst [vmem:[#allocation91_spill] sm:$0xff] %v8372_v55  ;;  %v8383_v14 = vsel %vm2288_vm14, 4, %v2106_v4  ;;  %vm2291_vm1 = vcmp.gt.f32.partialorder %v8210_v46, %v2093_v22  ;;  %vm2076_vm2 = vcmp.gt.f32.partialorder %v8372_v55, %v8124_v10  ;;  %v8389_v25 = vadd.f32 %v6346_v33, %v7863_v30  ;;  %v8395_v18 = vpop.f32.mrf.mxu1  ;;  %vm8455_vm9 = vmand %vm1213_vm0, %vm8027_vm5 }
 0x3c9   : > { %vm1212_vm3 = vcmp.lt.s32.totalorder %v1193_v56, %v7968_v12  ;;  %v2092_v49 = vsel %vm2076_vm2, %v8372_v55, %v8124_v10  ;;  %v2108_v1 = vsel %vm2076_vm2, 3, %v8126_v43  ;;  %v8398_v4 = vsel %vm2291_vm1, %v8210_v46, %v2093_v22  ;;  %v6349_v22 = vpop.f32.mrf.mxu0 }
 0x3ca   : > { %10427 = vst [vmem:[#allocation92_spill] sm:$0xff] %v8389_v25  ;;  %v8400_v47 = vsel %vm2291_vm1, 4, %v2109_v54  ;;  %vm2290_vm4 = vcmp.gt.f32.partialorder %v8227_v2, %v2092_v49  ;;  %vm2079_vm6 = vcmp.gt.f32.partialorder %v8389_v25, %v8141_v41  ;;  %v8406_v33 = vadd.f32 %v2030_v61, %v7863_v30  ;;  %v8414_v46 = vpop.f32.mrf.mxu1  ;;  %vm8484_vm14 = vmand %vm1212_vm3, %vm8027_vm5 }
 0x3cb   : > { %v8409_v10 = vadd.s32 40, %v7790_v9  ;;  %v2095_v43 = vsel %vm2079_vm6, %v8389_v25, %v8141_v41  ;;  %v2111_v55 = vsel %vm2079_vm6, 3, %v8143_v27  ;;  %v8417_v54 = vsel %vm2290_vm4, %v8227_v2, %v2092_v49  ;;  %v2040_v25 = vpop.f32.mrf.mxu0 }
 0x3cc   : > { %10428 = vst [vmem:[#allocation93_spill] sm:$0xff] %v8406_v33  ;;  %v8419_v36 = vsel %vm2290_vm4, 4, %v2108_v1  ;;  %vm2293_vm10 = vcmp.gt.f32.partialorder %v8248_v23, %v2095_v43  ;;  %vm2078_vm11 = vcmp.gt.f32.partialorder %v8406_v33, %v8158_v59  ;;  %v8434_v27 = vadd.f32 %v6349_v22, %v7863_v30  ;;  %v8444_v2 = vpop.f32.mrf.mxu1 }
 0x3cd   : > { %v8439_v41 = vsel %vm8426_vm7, 1.0, %v10393_v38  ;;  %v2094_v49 = vsel %vm2078_vm11, %v8406_v33, %v8158_v59  ;;  %v2110_v1 = vsel %vm2078_vm11, 3, %v8160_v7  ;;  %v8447_v16 = vsel %vm2293_vm10, %v8248_v23, %v2095_v43  ;;  %v6392_v43 = vpop.f32.mrf.mxu0 }
 0x3ce   : > { %10431 = vst [vmem:[#allocation94_spill] sm:$0xff] %v8434_v27  ;;  %10432 = vst [vmem:[#allocation95_spill] sm:$0xff] %v8439_v41  ;;  %v8449_v62 = vsel %vm2293_vm10, 4, %v2111_v55  ;;  %v10433_v22 = vmov 0  ;;  %vm2292_vm12 = vcmp.gt.f32.partialorder %v8266_v63, %v2094_v49  ;;  %vm2081_vm13 = vcmp.gt.f32.partialorder %v8434_v27, %v8175_v0  ;;  %v8473_v33 = vpop.f32.mrf.mxu1 }
 0x3cf   : > { %v10434_v22 = vsel %vm8455_vm9, 4294967295, %v10433_v22  ;;  %v8463_v7 = vadd.f32 %v2040_v25, %v7863_v30  ;;  %v8468_v59 = vsel %vm8455_vm9, 1.0, %v10393_v38  ;;  %v2097_v8 = vsel %vm2081_vm13, %v8434_v27, %v8175_v0 }
 0x3d0   : > { %10435 = vst [vmem:[#allocation96_spill] sm:$0xff] %v10434_v22  ;;  %10437 = vst [vmem:[#allocation98_spill] sm:$0xff] %v8468_v59  ;;  %v2113_v55 = vsel %vm2081_vm13, 3, %v8177_v15  ;;  %v8476_v23 = vsel %vm2292_vm12, %v8266_v63, %v2094_v49  ;;  %v8478_v41 = vsel %vm2292_vm12, 4, %v2110_v1  ;;  %v10438_v30 = vmov 0  ;;  %v2398_v49 = vpop.f32.mrf.mxu0 }
 0x3d1   : > { %10436 = vst [vmem:[#allocation97_spill] sm:$0xff] %v8463_v7  ;;  %v10439_v30 = vsel %vm8484_vm14, 4294967295, %v10438_v30  ;;  %vm2295_vm15 = vcmp.gt.f32.partialorder %v8287_v53, %v2097_v8  ;;  %vm2080_vm0 = vcmp.gt.f32.partialorder %v8463_v7, %v8192_v6  ;;  %v8492_v15 = vadd.f32 %v6392_v43, %v7881_v29 }
 0x3d2   : > { %10440 = vst [vmem:[#allocation99_spill] sm:$0xff] %v10439_v30  ;;  %v8497_v0 = vsel %vm8484_vm14, 1.0, %v10393_v38  ;;  %v2096_v56 = vsel %vm2080_vm0, %v8463_v7, %v8192_v6  ;;  %v2112_v25 = vsel %vm2080_vm0, 3, %v8194_v45  ;;  %v8503_v1 = vsel %vm2295_vm15, %v8287_v53, %v2097_v8  ;;  %v2652_v8 = vpop.f32.mrf.mxu1 }
 0x3d3   : > { %10441 = vst [vmem:[#allocation100_spill] sm:$0xff] %v8497_v0  ;;  %v8505_v27 = vsel %vm2295_vm15, 4, %v2113_v55  ;;  %v8509_v43 = vadd.f32 %v8309_v37, %v7884_v34  ;;  %vm2294_vm1 = vcmp.gt.f32.partialorder %v8304_v51, %v2096_v56  ;;  %vm2495_vm2 = vcmp.gt.f32.partialorder %v8492_v15, %v8213_v35  ;;  %v6395_v55 = vpop.f32.mrf.mxu0 }
 0x3d4   : > { %v8515_v63 = vadd.f32 %v2398_v49, %v7881_v29  ;;  %v2511_v45 = vsel %vm2495_vm2, %v8492_v15, %v8213_v35  ;;  %v2527_v6 = vsel %vm2495_vm2, 5, %v8221_v40  ;;  %v8521_v7 = vsel %vm2294_vm1, %v8304_v51, %v2096_v56 }
 0x3d5   : > { %v8523_v37 = vsel %vm2294_vm1, 4, %v2112_v25  ;;  %v8527_v53 = vadd.f32 %v8327_v58, %v7884_v34  ;;  %vm2709_vm3 = vcmp.gt.f32.partialorder %v8509_v43, %v2511_v45  ;;  %v8533_v35 = vadd.f32 %v6395_v55, %v7881_v29  ;;  %v2408_v49 = vpop.f32.mrf.mxu0 }
 0x3d6   : > { %vm2494_vm4 = vcmp.gt.f32.partialorder %v8515_v63, %v8230_v48  ;;  %v8537_v40 = vadd.f32 %v8344_v24, %v7884_v34  ;;  %v8543_v58 = vsel %vm2709_vm3, %v8509_v43, %v2511_v45  ;;  %vm1215_vm6 = vcmp.lt.s32.totalorder %v8409_v10, %v7968_v12  ;;  %v6439_v45 = vpop.f32.mrf.mxu1 }
 0x3d7   : > { %10442 = vst [vmem:[#allocation101_spill] sm:$0xff] %v8533_v35  ;;  %v2510_v56 = vsel %vm2494_vm4, %v8515_v63, %v8230_v48  ;;  %v2526_v25 = vsel %vm2494_vm4, 5, %v8239_v50  ;;  %vm2497_vm11 = vcmp.gt.f32.partialorder %v8533_v35, %v8256_v42  ;;  %v8551_v24 = vadd.f32 %v2408_v49, %v7881_v29 }
 0x3d8   : > { %10443 = vst [vmem:[#allocation102_spill] sm:$0xff] %v8537_v40  ;;  %vm2708_vm10 = vcmp.gt.f32.partialorder %v8527_v53, %v2510_v56  ;;  %v8553_v55 = vsel %vm2709_vm3, 6, %v2527_v6  ;;  %v2513_v48 = vsel %vm2497_vm11, %v8533_v35, %v8256_v42  ;;  %v2529_v50 = vsel %vm2497_vm11, 5, %v8258_v21  ;;  %v6398_v6 = vpop.f32.mrf.mxu0 }
 0x3d9   : > { %10444 = vst [vmem:[#allocation103_spill] sm:$0xff] %v8551_v24  ;;  %v8559_v51 = vsel %vm2708_vm10, %v8527_v53, %v2510_v56  ;;  %v8562_v0 = vadd.s32 32, %v7790_v9  ;;  %v8566_v59 = vadd.f32 %v8361_v32, %v7884_v34  ;;  %vm2711_vm12 = vcmp.gt.f32.partialorder %v8537_v40, %v2513_v48 }
 0x3da   : > { %vm2496_vm13 = vcmp.gt.f32.partialorder %v8551_v24, %v8269_v39  ;;  %v8571_v42 = vsel %vm2708_vm10, 6, %v2526_v25  ;;  %v8575_v21 = vadd.f32 %v8378_v20, %v7884_v34  ;;  %v8581_v32 = vadd.f32 %v6398_v6, %v7881_v29  ;;  %v2418_v25 = vpop.f32.mrf.mxu0  ;;  %vm8649_vm10 = vmand %vm1215_vm6, %vm8027_vm5 }
 0x3db   : > { %v2512_v56 = vsel %vm2496_vm13, %v8551_v24, %v8269_v39  ;;  %v2528_v49 = vsel %vm2496_vm13, 5, %v8278_v28  ;;  %v8585_v30 = vadd.f32 %v8395_v18, %v7884_v34  ;;  %v8589_v22 = vsel %vm2711_vm12, %v8537_v40, %v2513_v48  ;;  %v2662_v28 = vpop.f32.mrf.mxu1 }
 0x3dc   : > { %10445 = vst [vmem:[#allocation104_spill] sm:$0xff] %v8581_v32  ;;  %vm2710_vm15 = vcmp.gt.f32.partialorder %v8566_v59, %v2512_v56  ;;  %v8591_v20 = vsel %vm2711_vm12, 6, %v2529_v50  ;;  %v8595_v39 = vadd.f32 %v8414_v46, %v7884_v34  ;;  %vm2499_vm0 = vcmp.gt.f32.partialorder %v8581_v32, %v8293_v52  ;;  %v6401_v24 = vpop.f32.mrf.mxu0 }
 0x3dd   : > { %10446 = vst [vmem:[#allocation105_spill] sm:$0xff] %v8585_v30  ;;  %v8600_v6 = vadd.f32 %v2418_v25, %v7881_v29  ;;  %v8603_v18 = vsel %vm2710_vm15, %v8566_v59, %v2512_v56  ;;  %v8607_v48 = vadd.f32 %v8444_v2, %v7884_v34  ;;  %v2515_v50 = vsel %vm2499_vm0, %v8581_v32, %v8293_v52  ;;  %v6442_v32 = vpop.f32.mrf.mxu1 }
 0x3de   : > { %v2531_v46 = vsel %vm2499_vm0, 5, %v8295_v31  ;;  %v8612_v40 = vsel %vm2710_vm15, 6, %v2528_v49  ;;  %v8616_v35 = vadd.f32 %v8473_v33, %v7884_v34  ;;  %vm2713_vm1 = vcmp.gt.f32.partialorder %v8575_v21, %v2515_v50  ;;  %v2428_v56 = vpop.f32.mrf.mxu0 }
 0x3df   : > { %10447 = vst [vmem:[#allocation106_spill] sm:$0xff] %v8600_v6  ;;  %10448 = vst [vmem:[#allocation107_spill] sm:$0xff] %v8607_v48  ;;  %vm2498_vm2 = vcmp.gt.f32.partialorder %v8600_v6, %v8312_v44  ;;  %v8622_v2 = vadd.f32 %v6401_v24, %v7881_v29  ;;  %v8628_v49 = vsel %vm2713_vm1, %v8575_v21, %v2515_v50  ;;  %v8630_v25 = vsel %vm2713_vm1, 6, %v2531_v46 }
 0x3e0   : > { %10449 = vst [vmem:[#allocation108_spill] sm:$0xff] %v8616_v35  ;;  %v2514_v52 = vsel %vm2498_vm2, %v8600_v6, %v8312_v44  ;;  %v2530_v31 = vsel %vm2498_vm2, 5, %v8314_v11  ;;  %v8633_v33 = vadd.f32 %v2652_v8, %v7884_v34  ;;  %v8639_v24 = vadd.f32 %v2428_v56, %v7881_v29  ;;  %v6404_v50 = vpop.f32.mrf.mxu0 }
 0x3e1   : > { %10450 = vst [vmem:[#allocation109_spill] sm:$0xff] %v8622_v2  ;;  %vm2712_vm3 = vcmp.gt.f32.partialorder %v8585_v30, %v2514_v52  ;;  %vm2501_vm4 = vcmp.gt.f32.partialorder %v8622_v2, %v8330_v3  ;;  %v8678_v6 = vadd.f32 %v6439_v45, %v7884_v34  ;;  %vm1214_vm15 = vcmp.lt.s32.totalorder %v8562_v0, %v7968_v12 }
 0x3e2   : > { %10451 = vst [vmem:[#allocation110_spill] sm:$0xff] %v8633_v33  ;;  %10452 = vst [vmem:[#allocation111_spill] sm:$0xff] %v8639_v24  ;;  %v2517_v11 = vsel %vm2501_vm4, %v8622_v2, %v8330_v3  ;;  %v2533_v44 = vsel %vm2501_vm4, 5, %v8332_v57  ;;  %v8654_v46 = vsel %vm2712_vm3, %v8585_v30, %v2514_v52  ;;  %v8656_v56 = vsel %vm2712_vm3, 6, %v2530_v31  ;;  %v2438_v31 = vpop.f32.mrf.mxu0 }
 0x3e3   : > { %vm2715_vm11 = vcmp.gt.f32.partialorder %v8595_v39, %v2517_v11  ;;  %vm2500_vm12 = vcmp.gt.f32.partialorder %v8639_v24, %v8347_v13  ;;  %v8662_v3 = vadd.f32 %v6404_v50, %v7881_v29  ;;  %v8667_v57 = vsel %vm8649_vm10, 1.0, %v10393_v38  ;;  %10457 = vst [vmem:[#allocation114_spill] sm:$0xff] %v8678_v6  ;;  %v2672_v50 = vpop.f32.mrf.mxu1  ;;  %vm8722_vm4 = vmand %vm1214_vm15, %vm8027_vm5 }
 0x3e4   : > { %10456 = vst [vmem:[#allocation113_spill] sm:$0xff] %v8667_v57  ;;  %v2516_v10 = vsel %vm2500_vm12, %v8639_v24, %v8347_v13  ;;  %v2532_v52 = vsel %vm2500_vm12, 5, %v8349_v19  ;;  %v8673_v2 = vsel %vm2715_vm11, %v8595_v39, %v2517_v11  ;;  %v8675_v30 = vsel %vm2715_vm11, 6, %v2533_v44  ;;  %v6407_v11 = vpop.f32.mrf.mxu0 }
 0x3e5   : > { %10455 = vst [vmem:[#allocation112_spill] sm:$0xff] %v8662_v3  ;;  %vm2714_vm6 = vcmp.gt.f32.partialorder %v8607_v48, %v2516_v10  ;;  %vm2503_vm13 = vcmp.gt.f32.partialorder %v8662_v3, %v8364_v26  ;;  %v8684_v57 = vadd.f32 %v2438_v31, %v7881_v29  ;;  %v8698_v44 = vadd.f32 %v6407_v11, %v7881_v29  ;;  %v6445_v24 = vpop.f32.mrf.mxu1 }
 0x3e6   : > { %v2519_v19 = vsel %vm2503_vm13, %v8662_v3, %v8364_v26  ;;  %v2535_v13 = vsel %vm2503_vm13, 5, %v8366_v60  ;;  %v8692_v45 = vsel %vm2714_vm6, %v8607_v48, %v2516_v10  ;;  %v8700_v31 = vsel %vm2714_vm6, 6, %v2532_v52  ;;  %v2448_v48 = vpop.f32.mrf.mxu0 }
 0x3e7   : > { %10458 = vst [vmem:[#allocation115_spill] sm:$0xff] %v8684_v57  ;;  %vm2717_vm0 = vcmp.gt.f32.partialorder %v8616_v35, %v2519_v19  ;;  %vm2502_vm1 = vcmp.gt.f32.partialorder %v8684_v57, %v8381_v5  ;;  %10459 = vst [vmem:[#allocation116_spill] sm:$0xff] %v8698_v44  ;;  %v8703_v26 = vadd.f32 %v2662_v28, %v7884_v34  ;;  %v8737_v11 = vsel %vm8722_vm4, 1.0, %v10393_v38 }
 0x3e8   : > { %10460 = vst [vmem:[#allocation117_spill] sm:$0xff] %v8700_v31  ;;  %v8706_v60 = vadd.f32 %v6442_v32, %v7884_v34  ;;  %v2518_v10 = vsel %vm2502_vm1, %v8684_v57, %v8381_v5  ;;  %v2534_v3 = vsel %vm2502_vm1, 5, %v8383_v14  ;;  %vm2505_vm3 = vcmp.gt.f32.partialorder %v8698_v44, %v8398_v4  ;;  %10467 = vst [vmem:[#allocation122_spill] sm:$0xff] %v8737_v11 }
 0x3e9   : > { %10461 = vst [vmem:[#allocation118_spill] sm:$0xff] %v8703_v26  ;;  %vm2716_vm2 = vcmp.gt.f32.partialorder %v8633_v33, %v2518_v10  ;;  %v8715_v52 = vadd.f32 %v2448_v48, %v7881_v29  ;;  %v8729_v14 = vsel %vm2717_vm0, %v8616_v35, %v2519_v19  ;;  %v2521_v5 = vsel %vm2505_vm3, %v8698_v44, %v8398_v4  ;;  %v6410_v48 = vpop.f32.mrf.mxu0 }
 0x3ea   : > { %10462 = vst [vmem:[#allocation119_spill] sm:$0xff] %v8706_v60  ;;  %10466 = vst [vmem:[#allocation121_spill] sm:$0xff] %v8729_v14  ;;  %v2537_v28 = vsel %vm2505_vm3, 5, %v8400_v47  ;;  %v1198_v0 = vadd.s32 56, %v7790_v9  ;;  %vm2719_vm11 = vcmp.gt.f32.partialorder %v8678_v6, %v2521_v5  ;;  %v8744_v57 = vadd.f32 %v6410_v48, %v7881_v29  ;;  %v2682_v48 = vpop.f32.mrf.mxu1 }
 0x3eb   : > { %10463 = vst [vmem:[#allocation120_spill] sm:$0xff] %v8715_v52  ;;  %vm2504_vm12 = vcmp.gt.f32.partialorder %v8715_v52, %v8417_v54  ;;  %v8748_v4 = vsel %vm2717_vm0, 6, %v2535_v13  ;;  %v8751_v47 = vadd.f32 %v2672_v50, %v7884_v34  ;;  %v2458_v14 = vpop.f32.mrf.mxu0  ;;  %v8759_v31 = vsel %vm2716_vm2, %v8633_v33, %v2518_v10 }
 0x3ec   : > { %10468 = vst [vmem:[#allocation123_spill] sm:$0xff] %v8744_v57  ;;  %v2520_v44 = vsel %vm2504_vm12, %v8715_v52, %v8417_v54  ;;  %v2536_v11 = vsel %vm2504_vm12, 5, %v8419_v36  ;;  %10470 = vst [vmem:[#allocation125_spill] sm:$0xff] %v8759_v31  ;;  %vm2507_vm13 = vcmp.gt.f32.partialorder %v8744_v57, %v8447_v16  ;;  %v8765_v50 = vadd.f32 %v2458_v14, %v7881_v29 }
 0x3ed   : > { %10469 = vst [vmem:[#allocation124_spill] sm:$0xff] %v8751_v47  ;;  %vm2718_vm6 = vcmp.gt.f32.partialorder %v8703_v26, %v2520_v44  ;;  %v8769_v54 = vsel %vm2716_vm2, 6, %v2534_v3  ;;  %v8772_v36 = vadd.f32 %v6445_v24, %v7884_v34  ;;  %v2523_v19 = vsel %vm2507_vm13, %v8744_v57, %v8447_v16  ;;  %v6413_v52 = vpop.f32.mrf.mxu0 }
 0x3ee   : > { %10471 = vst [vmem:[#allocation126_spill] sm:$0xff] %v8765_v50  ;;  %10472 = vst [vmem:[#allocation127_spill] sm:$0xff] %v8769_v54  ;;  %v2539_v13 = vsel %vm2507_vm13, 5, %v8449_v62  ;;  %vm1217_vm15 = vcmp.lt.s32.totalorder %v1198_v0, %v7968_v12  ;;  %vm2721_vm0 = vcmp.gt.f32.partialorder %v8706_v60, %v2523_v19  ;;  %vm2506_vm1 = vcmp.gt.f32.partialorder %v8765_v50, %v8476_v23  ;;  %v10533_v54 = vld [vmem:[#allocation83_spill] sm:$0xff] }
 0x3ef   : > { %10473 = vst [vmem:[#allocation128_spill] sm:$0xff] %v8772_v36  ;;  %v8782_v3 = vadd.f32 %v6413_v52, %v7881_v29  ;;  %v8787_v24 = vsel %vm2719_vm11, %v8678_v6, %v2521_v5  ;;  %v8790_v16 = vadd.f32 %v2682_v48, %v7884_v34  ;;  %v2522_v62 = vsel %vm2506_vm1, %v8765_v50, %v8476_v23  ;;  %v2468_v14 = vpop.f32.mrf.mxu0 }
 0x3f0   : > { %10475 = vst [vmem:[#allocation130_spill] sm:$0xff] %v8787_v24  ;;  %v2538_v10 = vsel %vm2506_vm1, 5, %v8478_v41  ;;  %v8797_v57 = vsel %vm2719_vm11, 6, %v2537_v28  ;;  %vm2720_vm2 = vcmp.gt.f32.partialorder %v8751_v47, %v2522_v62  ;;  %v8803_v52 = vadd.f32 %v2468_v14, %v7881_v29  ;;  %vm8820_vm11 = vmand %vm1217_vm15, %vm8027_vm5  ;;  %v10485_v28 = vld [vmem:[#allocation55_spill] sm:$0xff] }
 0x3f1   : > { %10474 = vst [vmem:[#allocation129_spill] sm:$0xff] %v8782_v3  ;;  %10476 = vst [vmem:[#allocation131_spill] sm:$0xff] %v8790_v16  ;;  %vm2509_vm3 = vcmp.gt.f32.partialorder %v8782_v3, %v8503_v1  ;;  %v1197_v34 = vadd.s32 48, %v7790_v9  ;;  %v6456_v5 = vpop.f32.mrf.mxu0  ;;  %v8841_v48 = vsel %vm8820_vm11, 1.0, %v10393_v38 }
 0x3f2   : > { %10477 = vst [vmem:[#allocation132_spill] sm:$0xff] %v8797_v57  ;;  %10478 = vst [vmem:[#allocation133_spill] sm:$0xff] %v8803_v52  ;;  %v8808_v23 = vsel %vm2509_vm3, %v8782_v3, %v8503_v1  ;;  %v8811_v41 = vsel %vm2509_vm3, 5, %v8505_v27  ;;  %v8827_v1 = vsel %vm2718_vm6, %v8703_v26, %v2520_v44  ;;  %v8831_v27 = vsel %vm2718_vm6, 6, %v2536_v11 }
 0x3f3   : > { %10479 = vst [vmem:[#allocation134_spill] sm:$0xff] %v8808_v23  ;;  %10480 = vst [vmem:[#allocation135_spill] sm:$0xff] %v8811_v41  ;;  %vm2723_vm12 = vcmp.gt.f32.partialorder %v8772_v36, %v8808_v23  ;;  %vm2508_vm13 = vcmp.gt.f32.partialorder %v8803_v52, %v8521_v7  ;;  %v2832_v0 = vadd.f32 %v6456_v5, %v10485_v28  ;;  %v2826_v11 = vpop.f32.mrf.mxu0  ;;  %v8857_v5 = vsel %vm2721_vm0, 6, %v2539_v13  ;;  %v10493_v13 = vld [vmem:[#allocation12_spill] sm:$0xff] }
 0x3f4   : > { %10483 = vst [vmem:[#allocation136_spill] sm:$0xff] %v8827_v1  ;;  %10484 = vst [vmem:[#allocation137_spill] sm:$0xff] %v8831_v27  ;;  %v8845_v14 = vsel %vm2508_vm13, %v8803_v52, %v8521_v7  ;;  %v8848_v44 = vsel %vm2508_vm13, 5, %v8523_v37  ;;  %v8853_v3 = vsel %vm2721_vm0, %v8706_v60, %v2523_v19  ;;  %v2827_v7 = vadd.f32 %v2826_v11, %v10485_v28  ;;  %v10495_v11 = vld [vmem:[#allocation36_spill] sm:$0xff]  ;;  %v10525_v27 = vld [vmem:[#allocation78_spill] sm:$0xff] }
 0x3f5   : > { %10486 = vst [vmem:[#allocation55_spill] sm:$0xff] %v8841_v48  ;;  %10487 = vst [vmem:[#allocation138_spill] sm:$0xff] %v8845_v14  ;;  %vm2722_vm6 = vcmp.gt.f32.partialorder %v8790_v16, %v8845_v14  ;;  %vm2923_vm15 = vcmp.gt.f32.partialorder %v2832_v0, %v8543_v58  ;;  %v8867_v37 = vsel %vm2720_vm2, %v8751_v47, %v2522_v62  ;;  %v8874_v19 = vsel %vm2720_vm2, 6, %v2538_v10  ;;  %v10494_v14 = vld [vmem:[#allocation34_spill] sm:$0xff]  ;;  %v10496_v23 = vld [vmem:[#allocation68_spill] sm:$0xff] }
 0x3f6   : > { %10488 = vst [vmem:[#allocation139_spill] sm:$0xff] %v8848_v44  ;;  %10489 = vst [vmem:[#allocation140_spill] sm:$0xff] %v8853_v3  ;;  %v2939_v52 = vsel %vm2923_vm15, %v2832_v0, %v8543_v58  ;;  %v2955_v44 = vsel %vm2923_vm15, 7, %v8553_v55  ;;  %vm1216_vm0 = vcmp.lt.s32.totalorder %v1197_v34, %v7968_v12  ;;  %v10497_v60 = vld [vmem:[#allocation60_spill] sm:$0xff]  ;;  %v8884_v3 = vadd.s32 72, %v7790_v9 }
 0x3f7   : > { %10490 = vst [vmem:[#allocation141_spill] sm:$0xff] %v8857_v5  ;;  %10491 = vst [vmem:[#allocation142_spill] sm:$0xff] %v8867_v37  ;;  %v2987_v16 = vsub.f32 %v10493_v13, %v2939_v52  ;;  %v3083_v41 = vsub.f32 %v10494_v14, %v2939_v52  ;;  %v3179_v36 = vsub.f32 %v10495_v11, %v2939_v52  ;;  %v6459_v5 = vpop.f32.mrf.mxu0 }
 0x3f8   : > { %10492 = vst [vmem:[#allocation143_spill] sm:$0xff] %v8874_v19  ;;  %v3275_v50 = vsub.f32 %v10496_v23, %v2939_v52  ;;  %v3371_v37 = vsub.f32 %v10497_v60, %v2939_v52  ;;  %v3467_v58 = vsub.f32 %v8492_v15, %v2939_v52  ;;  %v3563_v55 = vsub.f32 %v8509_v43, %v2939_v52 }
 0x3f9   : > { %v3004_v62 = vmul.f32 1.442695, %v2987_v16  ;;  %v3100_v10 = vmul.f32 1.442695, %v3083_v41  ;;  %v3196_v47 = vmul.f32 1.442695, %v3179_v36  ;;  %vm2922_vm1 = vcmp.gt.f32.partialorder %v2827_v7, %v8559_v51 }
 0x3fa   : > { %v3292_v14 = vmul.f32 1.442695, %v3275_v50  ;;  %v3388_v13 = vmul.f32 1.442695, %v3371_v37  ;;  %v3659_v11 = vsub.f32 %v2832_v0, %v2939_v52  ;;  %v2938_v23 = vsel %vm2922_vm1, %v2827_v7, %v8559_v51  ;;  %v10499_v16 = vld [vmem:[#allocation13_spill] sm:$0xff]  ;;  %v2836_v52 = vpop.f32.mrf.mxu0  ;;  %v10501_v51 = vld [vmem:[#allocation39_spill] sm:$0xff] }
 0x3fb   : > { %6563 = vpow2.f32 %v3004_v62  ;;  %v3484_v60 = vmul.f32 1.442695, %v3467_v58  ;;  %v3580_v19 = vmul.f32 1.442695, %v3563_v55  ;;  %v4674_v43 = vsel %vm8067_vm8, %v2955_v44, 0  ;;  %v10500_v50 = vld [vmem:[#allocation37_spill] sm:$0xff]  ;;  %vm8903_vm8 = vmand %vm1216_vm0, %vm8027_vm5 }
 0x3fc   : > { %6565 = vpow2.f32 %v3100_v10  ;;  %4690 = vst [vmem:[%s8890_s27 + $0x8] sm:$0xff] %v4674_v43  ;;  %v2954_v36 = vsel %vm2922_vm1, 7, %v8571_v42  ;;  %v2986_v41 = vsub.f32 %v10499_v16, %v2938_v23  ;;  %v3082_v37 = vsub.f32 %v10500_v50, %v2938_v23  ;;  %v10502_v58 = vld [vmem:[#allocation70_spill] sm:$0xff] }
 0x3fd   : > { %6567 = vpow2.f32 %v3196_v47  ;;  %v3178_v0 = vsub.f32 %v10501_v51, %v2938_v23  ;;  %v3274_v55 = vsub.f32 %v10502_v58, %v2938_v23  ;;  %v10503_v62 = vld [vmem:[#allocation62_spill] sm:$0xff]  ;;  %v3676_v42 = vmul.f32 1.442695, %v3659_v11 }
 0x3fe   : > { %v3370_v15 = vsub.f32 %v10503_v62, %v2938_v23  ;;  %6569 = vpow2.f32 %v3292_v14  ;;  %v3466_v10 = vsub.f32 %v8515_v63, %v2938_v23  ;;  %v8911_v47 = vsel %vm8903_vm8, 1.0, %v10393_v38  ;;  %v6462_v62 = vpop.f32.mrf.mxu0 }
 0x3ff   : > { %10506 = vst [vmem:[#allocation12_spill] sm:$0xff] %v8911_v47  ;;  %6571 = vpow2.f32 %v3388_v13  ;;  %v3002_v43 = vmul.f32 1.442695, %v2986_v41  ;;  %v3098_v16 = vmul.f32 1.442695, %v3082_v37  ;;  %v3562_v51 = vsub.f32 %v8527_v53, %v2938_v23 }
 0x400   : > { %v3194_v50 = vmul.f32 1.442695, %v3178_v0  ;;  %6573 = vpow2.f32 %v3484_v60  ;;  %v3290_v34 = vmul.f32 1.442695, %v3274_v55  ;;  %v3658_v58 = vsub.f32 %v2827_v7, %v2938_v23  ;;  %v2846_v7 = vpop.f32.mrf.mxu0  ;;  %v10509_v0 = vld [vmem:[#allocation23_spill] sm:$0xff] }
 0x401   : > { %6575 = vpow2.f32 %v3580_v19  ;;  %v4673_v63 = vsel %vm8426_vm7, %v2954_v36, 0  ;;  %v2842_v14 = vadd.f32 %v6459_v5, %v10485_v28  ;;  %v8918_v11 = vadd.f32 %v2836_v52, %v10485_v28  ;;  %v10507_v19 = vld [vmem:[#allocation14_spill] sm:$0xff]  ;;  %v10508_v36 = vld [vmem:[#allocation40_spill] sm:$0xff] }
 0x402   : > { %6577 = vpow2.f32 %v3676_v42  ;;  %v3386_v13 = vmul.f32 1.442695, %v3370_v15  ;;  %v3482_v41 = vmul.f32 1.442695, %v3466_v10  ;;  %v3578_v37 = vmul.f32 1.442695, %v3562_v51  ;;  %4689 = vst [vmem:[%s8890_s27] sm:$0xff] %v4673_v63  ;;  %v6465_v31 = vpop.f32.mrf.mxu0 }
 0x403   : > { %6579 = vpow2.f32 %v3002_v43  ;;  %v3674_v60 = vmul.f32 1.442695, %v3658_v58  ;;  %vm2925_vm2 = vcmp.gt.f32.partialorder %v2842_v14, %v8589_v22  ;;  %v8923_v53 = vadd.f32 %v6462_v62, %v10485_v28  ;;  %v10510_v15 = vld [vmem:[#allocation73_spill] sm:$0xff]  ;;  %v10511_v10 = vld [vmem:[#allocation72_spill] sm:$0xff] }
 0x404   : > { %6581 = vpow2.f32 %v3098_v16  ;;  %v2941_v61 = vsel %vm2925_vm2, %v2842_v14, %v8589_v22  ;;  %v2957_v5 = vsel %vm2925_vm2, 7, %v8591_v20  ;;  %vm2924_vm7 = vcmp.gt.f32.partialorder %v8918_v11, %v8603_v18  ;;  %v10512_v16 = vld [vmem:[#allocation101_spill] sm:$0xff] }
 0x405   : > { %6583 = vpow2.f32 %v3194_v50  ;;  %v2989_v23 = vsub.f32 %v10507_v19, %v2941_v61  ;;  %v3085_v52 = vsub.f32 %v10508_v36, %v2941_v61  ;;  %v3181_v55 = vsub.f32 %v10509_v0, %v2941_v61 }
 0x406   : > { %6585 = vpow2.f32 %v3290_v34  ;;  %v3277_v42 = vsub.f32 %v10510_v15, %v2941_v61  ;;  %v3373_v43 = vsub.f32 %v10511_v10, %v2941_v61  ;;  %v3469_v22 = vsub.f32 %v10512_v16, %v2941_v61 }
 0x407   : > { %6587 = vpow2.f32 %v3386_v13  ;;  %v3008_v20 = vmul.f32 1.442695, %v2989_v23  ;;  %v8940_v50 = vsel %vm2924_vm7, %v8918_v11, %v8603_v18  ;;  %v8943_v51 = vadd.f32 %v2846_v7, %v10485_v28  ;;  %v10513_v13 = vld [vmem:[#allocation102_spill] sm:$0xff]  ;;  %v10517_v18 = vld [vmem:[#allocation25_spill] sm:$0xff] }
 0x408   : > { %v8945_v34 = vpop.eup %6563  ;;  %6589 = vpow2.f32 %v3482_v41  ;;  %v3104_v58 = vmul.f32 1.442695, %v3085_v52  ;;  %v3200_v62 = vmul.f32 1.442695, %v3181_v55  ;;  %v3296_v63 = vmul.f32 1.442695, %v3277_v42 }
 0x409   : > { %v8947_v19 = vpop.eup %6565  ;;  %6591 = vpow2.f32 %v3578_v37  ;;  %v3565_v23 = vsub.f32 %v10513_v13, %v2941_v61  ;;  %v3661_v36 = vsub.f32 %v2842_v14, %v2941_v61  ;;  %v4676_v15 = vsel %vm8455_vm9, %v2957_v5, 0  ;;  %v10515_v37 = vld [vmem:[#allocation15_spill] sm:$0xff]  ;;  %v10516_v5 = vld [vmem:[#allocation42_spill] sm:$0xff] }
 0x40a   : > { %v8952_v10 = vpop.eup %6567  ;;  %v3131_v7 = vadd.f32 %v8947_v19, %v8945_v34  ;;  %6593 = vpow2.f32 %v3674_v60  ;;  %4692 = vst [vmem:[%s8890_s27 + $0x18] sm:$0xff] %v4676_v15  ;;  %v2956_v41 = vsel %vm2924_vm7, 7, %v8612_v40  ;;  %v2988_v52 = vsub.f32 %v10515_v37, %v8940_v50 }
 0x40b   : > { %v8963_v55 = vpop.eup %6569  ;;  %6595 = vpow2.f32 %v3008_v20  ;;  %v3392_v14 = vmul.f32 1.442695, %v3373_v43  ;;  %v3488_v61 = vmul.f32 1.442695, %v3469_v22  ;;  %v3084_v42 = vsub.f32 %v10516_v5, %v8940_v50  ;;  %v10518_v20 = vld [vmem:[#allocation75_spill] sm:$0xff]  ;;  %v10519_v22 = vld [vmem:[#allocation77_spill] sm:$0xff] }
 0x40c   : > { %v8967_v16 = vpop.eup %6571  ;;  %v3227_v60 = vadd.f32 %v8952_v10, %v3131_v7  ;;  %6597 = vpow2.f32 %v3104_v58  ;;  %v3584_v13 = vmul.f32 1.442695, %v3565_v23  ;;  %v3180_v40 = vsub.f32 %v10517_v18, %v8940_v50  ;;  %v10520_v23 = vld [vmem:[#allocation103_spill] sm:$0xff] }
 0x40d   : > { %v8972_v0 = vpop.eup %6573  ;;  %6599 = vpow2.f32 %v3200_v62  ;;  %v3680_v15 = vmul.f32 1.442695, %v3661_v36  ;;  %v3276_v43 = vsub.f32 %v10518_v20, %v8940_v50  ;;  %v3372_v37 = vsub.f32 %v10519_v22, %v8940_v50 }
 0x40e   : > { %v8978_v5 = vpop.eup %6575  ;;  %v3323_v38 = vadd.f32 %v8963_v55, %v3227_v60  ;;  %6601 = vpow2.f32 %v3296_v63  ;;  %v3006_v58 = vmul.f32 1.442695, %v2988_v52  ;;  %v3468_v7 = vsub.f32 %v10520_v23, %v8940_v50 }
 0x40f   : > { %v8983_v18 = vpop.eup %6577  ;;  %6603 = vpow2.f32 %v3392_v14  ;;  %v3102_v62 = vmul.f32 1.442695, %v3084_v42  ;;  %v3198_v36 = vmul.f32 1.442695, %v3180_v40  ;;  %v3564_v20 = vsub.f32 %v8566_v59, %v8940_v50 }
 0x410   : > { %v8987_v26 = vpop.eup %6579  ;;  %v3419_v22 = vadd.f32 %v8967_v16, %v3323_v38  ;;  %6605 = vpow2.f32 %v3488_v61  ;;  %v3294_v60 = vmul.f32 1.442695, %v3276_v43  ;;  %v3390_v63 = vmul.f32 1.442695, %v3372_v37 }
 0x411   : > { %v8990_v52 = vpop.eup %6581  ;;  %6607 = vpow2.f32 %v3584_v13  ;;  %v3486_v23 = vmul.f32 1.442695, %v3468_v7  ;;  %v4675_v14 = vsel %vm8484_vm14, %v2956_v41, 0  ;;  %vm2927_vm9 = vcmp.gt.f32.partialorder %v8923_v53, %v8628_v49 }
 0x412   : > { %v8996_v42 = vpop.eup %6583  ;;  %v3515_v59 = vadd.f32 %v8972_v0, %v3419_v22  ;;  %v3130_v38 = vadd.f32 %v8990_v52, %v8987_v26  ;;  %6609 = vpow2.f32 %v3680_v15  ;;  %v3660_v61 = vsub.f32 %v8918_v11, %v8940_v50  ;;  %4691 = vst [vmem:[%s8890_s27 + $0x10] sm:$0xff] %v4675_v14  ;;  %v10522_v15 = vld [vmem:[#allocation16_spill] sm:$0xff] }
 0x413   : > { %v9004_v13 = vpop.eup %6585  ;;  %6611 = vpow2.f32 %v3006_v58  ;;  %v3582_v47 = vmul.f32 1.442695, %v3564_v20  ;;  %v2943_v41 = vsel %vm2927_vm9, %v8923_v53, %v8628_v49  ;;  %v2959_v40 = vsel %vm2927_vm9, 7, %v8630_v25  ;;  %v10523_v50 = vld [vmem:[#allocation44_spill] sm:$0xff]  ;;  %v10524_v20 = vld [vmem:[#allocation27_spill] sm:$0xff] }
 0x414   : > { %v9009_v43 = vpop.eup %6587  ;;  %v3611_v37 = vadd.f32 %v8978_v5, %v3515_v59  ;;  %v3226_v7 = vadd.f32 %v8996_v42, %v3130_v38  ;;  %6613 = vpow2.f32 %v3102_v62  ;;  %v2991_v22 = vsub.f32 %v10522_v15, %v2943_v41 }
 0x415   : > { %v9014_v11 = vpop.eup %6589  ;;  %6615 = vpow2.f32 %v3198_v36  ;;  %v3087_v58 = vsub.f32 %v10523_v50, %v2943_v41  ;;  %v3183_v14 = vsub.f32 %v10524_v20, %v2943_v41  ;;  %v3279_v49 = vsub.f32 %v10525_v27, %v2943_v41  ;;  %v10526_v50 = vld [vmem:[#allocation80_spill] sm:$0xff] }
 0x416   : > { %v9019_v6 = vpop.eup %6591  ;;  %v3707_v25 = vadd.f32 %v8983_v18, %v3611_v37  ;;  %v3322_v59 = vadd.f32 %v9004_v13, %v3226_v7  ;;  %6617 = vpow2.f32 %v3294_v60  ;;  %v3678_v38 = vmul.f32 1.442695, %v3660_v61  ;;  %v10527_v20 = vld [vmem:[#allocation104_spill] sm:$0xff] }
 0x417   : > { %v9023_v62 = vpop.eup %6593  ;;  %6619 = vpow2.f32 %v3390_v63  ;;  %v3012_v15 = vmul.f32 1.442695, %v2991_v22  ;;  %v3108_v48 = vmul.f32 1.442695, %v3087_v58  ;;  %vm2926_vm14 = vcmp.gt.f32.partialorder %v8943_v51, %v8654_v46 }
 0x418   : > { %v9027_v36 = vpop.eup %6595  ;;  %6621 = vrcp.f32 %v3707_v25  ;;  %v3418_v27 = vadd.f32 %v9009_v43, %v3322_v59  ;;  %v3375_v37 = vsub.f32 %v10526_v50, %v2943_v41  ;;  %v3471_v7 = vsub.f32 %v10527_v20, %v2943_v41 }
 0x419   : > { %v9032_v60 = vpop.eup %6597  ;;  %6623 = vpow2.f32 %v3486_v23  ;;  %v3204_v61 = vmul.f32 1.442695, %v3183_v14  ;;  %v3567_v63 = vsub.f32 %v8575_v21, %v2943_v41  ;;  %v4678_v22 = vsel %vm8649_vm10, %v2959_v40, 0 }
 0x41a   : > { %v9037_v58 = vpop.eup %6599  ;;  %v3514_v1 = vadd.f32 %v9014_v11, %v3418_v27  ;;  %v3133_v25 = vadd.f32 %v9032_v60, %v9027_v36  ;;  %6625 = vpow2.f32 %v3582_v47  ;;  %v3300_v59 = vmul.f32 1.442695, %v3279_v49  ;;  %4694 = vst [vmem:[%s8890_s27 + $0x28] sm:$0xff] %v4678_v22  ;;  %v10530_v22 = vld [vmem:[#allocation29_spill] sm:$0xff] }
 0x41b   : > { %v9043_v50 = vpop.eup %6601  ;;  %6627 = vpow2.f32 %v3678_v38  ;;  %v3396_v23 = vmul.f32 1.442695, %v3375_v37  ;;  %v3492_v14 = vmul.f32 1.442695, %v3471_v7  ;;  %v3663_v21 = vsub.f32 %v8923_v53, %v2943_v41  ;;  %v10528_v41 = vld [vmem:[#allocation17_spill] sm:$0xff] }
 0x41c   : > { %v9046_v20 = vpop.eup %6603  ;;  %v3610_v8 = vadd.f32 %v9019_v6, %v3514_v1  ;;  %v3229_v40 = vadd.f32 %v9037_v58, %v3133_v25  ;;  %6629 = vpow2.f32 %v3012_v15  ;;  %v2942_v47 = vsel %vm2926_vm14, %v8943_v51, %v8654_v46  ;;  %v10529_v1 = vld [vmem:[#allocation46_spill] sm:$0xff]  ;;  %v10531_v46 = vld [vmem:[#allocation81_spill] sm:$0xff] }
 0x41d   : > { %v9055_v49 = vpop.eup %6605  ;;  %6631 = vpow2.f32 %v3108_v48  ;;  %v2958_v53 = vsel %vm2926_vm14, 7, %v8656_v56  ;;  %v2990_v38 = vsub.f32 %v10528_v41, %v2942_v47  ;;  %v3086_v27 = vsub.f32 %v10529_v1, %v2942_v47 }
 0x41e   : > { %v9063_v37 = vpop.eup %6607  ;;  %v3706_v15 = vadd.f32 %v9023_v62, %v3610_v8  ;;  %v3325_v7 = vadd.f32 %v9043_v50, %v3229_v40  ;;  %6633 = vpow2.f32 %v3204_v61  ;;  %v3182_v25 = vsub.f32 %v10530_v22, %v2942_v47  ;;  %v10535_v22 = vld [vmem:[#allocation106_spill] sm:$0xff] }
 0x41f   : > { %v9068_v57 = vpop.eup %6609  ;;  %6635 = vpow2.f32 %v3300_v59  ;;  %v3588_v48 = vmul.f32 1.442695, %v3567_v63  ;;  %v3684_v33 = vmul.f32 1.442695, %v3663_v21  ;;  %v3278_v56 = vsub.f32 %v10531_v46, %v2942_v47  ;;  %v10536_v59 = vld [vmem:[#allocation105_spill] sm:$0xff] }
 0x420   : > { %v9071_v24 = vpop.eup %6611  ;;  %6637 = vrcp.f32 %v3706_v15  ;;  %v3421_v41 = vadd.f32 %v9046_v20, %v3325_v7  ;;  %v3010_v1 = vmul.f32 1.442695, %v2990_v38  ;;  %v3374_v8 = vsub.f32 %v10533_v54, %v2942_v47 }
 0x421   : > { %10532 = vst [vmem:[#allocation34_spill] sm:$0xff] %v9071_v24  ;;  %v9075_v40 = vpop.eup %6613  ;;  %6639 = vpow2.f32 %v3396_v23  ;;  %v3106_v61 = vmul.f32 1.442695, %v3086_v27  ;;  %v3470_v35 = vsub.f32 %v10535_v22, %v2942_v47  ;;  %v3566_v63 = vsub.f32 %v10536_v59, %v2942_v47 }
 0x422   : > { %10534 = vst [vmem:[#allocation36_spill] sm:$0xff] %v9075_v40  ;;  %v9079_v21 = vpop.eup %6615  ;;  %v3517_v46 = vadd.f32 %v9055_v49, %v3421_v41  ;;  %v3132_v15 = vadd.f32 %v9075_v40, %v9071_v24  ;;  %6641 = vpow2.f32 %v3492_v14  ;;  %v3202_v38 = vmul.f32 1.442695, %v3182_v25  ;;  %v2856_v14 = vpop.f32.mrf.mxu0 }
 0x423   : > { %v9084_v54 = vpop.eup %6617  ;;  %6643 = vpow2.f32 %v3588_v48  ;;  %v3298_v7 = vmul.f32 1.442695, %v3278_v56  ;;  %v3394_v23 = vmul.f32 1.442695, %v3374_v8  ;;  %v3662_v27 = vsub.f32 %v8943_v51, %v2942_v47  ;;  %v10538_v47 = vld [vmem:[#allocation59_spill] sm:$0xff] }
 0x424   : > { %v9087_v22 = vpop.eup %6619  ;;  %v3613_v59 = vadd.f32 %v9063_v37, %v3517_v46  ;;  %v3228_v17 = vadd.f32 %v9079_v21, %v3132_v15  ;;  %6645 = vpow2.f32 %v3684_v33  ;;  %v4677_v41 = vsel %vm8722_vm4, %v2958_v53, 0 }
 0x425   : > { %10537 = vst [vmem:[#allocation68_spill] sm:$0xff] %v9087_v22  ;;  %v6622_v25 = vpop.eup %6621  ;;  %6647 = vpow2.f32 %v3010_v1  ;;  %v3490_v40 = vmul.f32 1.442695, %v3470_v35  ;;  %v3586_v24 = vmul.f32 1.442695, %v3566_v63  ;;  %4693 = vst [vmem:[%s8890_s27 + $0x20] sm:$0xff] %v4677_v41  ;;  %v9095_v48 = vadd.f32 %v6465_v31, %v10485_v28 }
 0x426   : > { %v9097_v51 = vpop.eup %6623  ;;  %v3755_v56 = vmul.f32 %v6622_v25, %v10538_v47  ;;  %v3709_v8 = vadd.f32 %v9068_v57, %v3613_v59  ;;  %v3324_v33 = vadd.f32 %v9084_v54, %v3228_v17  ;;  %6649 = vpow2.f32 %v3106_v61  ;;  %v10543_v41 = vld [vmem:[#allocation48_spill] sm:$0xff] }
 0x427   : > { %v9102_v32 = vpop.eup %6625  ;;  %6651 = vpow2.f32 %v3202_v38  ;;  %v3682_v53 = vmul.f32 1.442695, %v3662_v27  ;;  %vm2929_vm10 = vcmp.gt.f32.partialorder %v9095_v48, %v8673_v2  ;;  %v9107_v35 = vadd.f32 %v2856_v14, %v10485_v28 }
 0x428   : > { %v9109_v31 = vpop.eup %6627  ;;  %v9112_v1 = vmul.f32 %v8945_v34, %v3755_v56  ;;  %v9115_v63 = vmul.f32 %v8947_v19, %v3755_v56  ;;  %v9118_v17 = vmul.f32 %v8952_v10, %v3755_v56  ;;  %v9121_v61 = vmul.f32 %v8963_v55, %v3755_v56 }
 0x429   : > { %v9123_v46 = vpop.eup %6629  ;;  %v9126_v15 = vmul.f32 %v8967_v16, %v3755_v56  ;;  %v9129_v38 = vmul.f32 %v8972_v0, %v3755_v56  ;;  %v9132_v34 = vmul.f32 %v8978_v5, %v3755_v56  ;;  %v9135_v19 = vmul.f32 %v8983_v18, %v3755_v56  ;;  %v10542_v18 = vld [vmem:[#allocation18_spill] sm:$0xff]  ;;  %v10546_v56 = vld [vmem:[#allocation84_spill] sm:$0xff] }
 0x42a   : > { %10539 = vst [vmem:[#allocation60_spill] sm:$0xff] %v9123_v46  ;;  %v9137_v27 = vpop.eup %6631  ;;  %6653 = vrcp.f32 %v3709_v8  ;;  %v3420_v10 = vadd.f32 %v9087_v22, %v3324_v33  ;;  %v9145_v55 = vsel %vm2929_vm10, %v9095_v48, %v8673_v2  ;;  %v9151_v16 = vsel %vm2929_vm10, 7, %v8675_v30  ;;  %v10545_v30 = vld [vmem:[#allocation31_spill] sm:$0xff] }
 0x42b   : > { %10540 = vst [vmem:[#allocation57_spill] sm:$0xff] %v9137_v27  ;;  %v9153_v0 = vpop.eup %6633  ;;  %v3135_v5 = vadd.f32 %v9137_v27, %v9123_v46  ;;  %6655 = vpow2.f32 %v3298_v7  ;;  %v2993_v59 = vsub.f32 %v10542_v18, %v9145_v55  ;;  %v3089_v14 = vsub.f32 %v10543_v41, %v9145_v55  ;;  %v10547_v41 = vld [vmem:[#allocation95_spill] sm:$0xff] }
 0x42c   : > { %10541 = vst [vmem:[#allocation13_spill] sm:$0xff] %v9153_v0  ;;  %v9161_v25 = vpop.eup %6635  ;;  %v3516_v47 = vadd.f32 %v9097_v51, %v3420_v10  ;;  %6657 = vpow2.f32 %v3394_v23  ;;  %v3185_v2 = vsub.f32 %v10545_v30, %v9145_v55  ;;  %v3281_v8 = vsub.f32 %v10546_v56, %v9145_v55 }
 0x42d   : > { %10544 = vst [vmem:[#allocation37_spill] sm:$0xff] %v9161_v25  ;;  %v6638_v33 = vpop.eup %6637  ;;  %v3231_v7 = vadd.f32 %v9153_v0, %v3135_v5  ;;  %6659 = vpow2.f32 %v3490_v40  ;;  %v3016_v27 = vmul.f32 1.442695, %v2993_v59  ;;  %v3112_v18 = vmul.f32 1.442695, %v3089_v14  ;;  %v10548_v5 = vld [vmem:[#allocation65_spill] sm:$0xff] }
 0x42e   : > { %v9169_v46 = vpop.eup %6639  ;;  %v3754_v22 = vmul.f32 %v6638_v33, %v10547_v41  ;;  %v3612_v10 = vadd.f32 %v9102_v32, %v3516_v47  ;;  %6661 = vpow2.f32 %v3586_v24  ;;  %v3208_v23 = vmul.f32 1.442695, %v3185_v2 }
 0x42f   : > { %vm2928_vm4 = vcmp.gt.f32.partialorder %v9107_v35, %v8692_v45  ;;  %v9176_v30 = vpop.eup %6641  ;;  %v3327_v56 = vadd.f32 %v9161_v25, %v3231_v7  ;;  %6663 = vpow2.f32 %v3682_v53  ;;  %v3304_v40 = vmul.f32 1.442695, %v3281_v8 }
 0x430   : > { %v3377_v59 = vsub.f32 %v10548_v5, %v9145_v55  ;;  %v9181_v14 = vpop.eup %6643  ;;  %v3786_v33 = vmul.f32 %v8987_v26, %v3754_v22  ;;  %v3898_v47 = vmul.f32 %v8990_v52, %v3754_v22  ;;  %v4011_v24 = vmul.f32 %v8996_v42, %v3754_v22 }
 0x431   : > { %v4124_v2 = vmul.f32 %v9004_v13, %v3754_v22  ;;  %v9187_v41 = vpop.eup %6645  ;;  %v4237_v7 = vmul.f32 %v9009_v43, %v3754_v22  ;;  %v4350_v53 = vmul.f32 %v9014_v11, %v3754_v22  ;;  %v4463_v8 = vmul.f32 %v9019_v6, %v3754_v22 }
 0x432   : > { %v4576_v5 = vmul.f32 %v9023_v62, %v3754_v22  ;;  %v9193_v25 = vpop.eup %6647  ;;  %v5450_v26 = vpack.c.bf16 %v9112_v1, %v3786_v33  ;;  %v5490_v52 = vpack.c.bf16 %v9115_v63, %v3898_v47  ;;  %v5530_v42 = vpack.c.bf16 %v9118_v17, %v4011_v24  ;;  %v10550_v24 = vld [vmem:[#allocation98_spill] sm:$0xff] }
 0x433   : > { %v5570_v13 = vpack.c.bf16 %v9121_v61, %v4124_v2  ;;  %v9199_v0 = vpop.eup %6649  ;;  %v5610_v43 = vpack.c.bf16 %v9126_v15, %v4237_v7  ;;  %v5650_v11 = vpack.c.bf16 %v9129_v38, %v4350_v53  ;;  %v5690_v6 = vpack.c.bf16 %v9132_v34, %v4463_v8  ;;  %v10549_v15 = vld [vmem:[#allocation109_spill] sm:$0xff] }
 0x434   : > { %v5730_v62 = vpack.c.bf16 %v9135_v19, %v4576_v5  ;;  %v9205_v22 = vpop.eup %6651  ;;  %5451 = vst [vmem:[%s9209_s10] sm:$0xff] %v5450_v26   ;;  %5774 = vst [vmem:[%s9209_s10 + $0x40] sm:$0xff] %v5490_v52   ;;  %v3708_v1 = vadd.f32 %v9109_v31, %v3612_v10  ;;  %v3423_v63 = vadd.f32 %v9169_v46, %v3327_v56  ;;  %6665 = vpow2.f32 %v3016_v27 }
 0x435   : > { %5782 = vst [vmem:[%s9209_s10 + $0x80] sm:$0xff] %v5530_v42   ;;  %5790 = vst [vmem:[%s9209_s10 + $0xc0] sm:$0xff] %v5570_v13   ;;  %v3134_v17 = vadd.f32 %v9199_v0, %v9193_v25  ;;  %6667 = vpow2.f32 %v3112_v18  ;;  %v3400_v61 = vmul.f32 1.442695, %v3377_v59  ;;  %v3473_v38 = vsub.f32 %v10549_v15, %v9145_v55 }
 0x436   : > { %5798 = vst [vmem:[%s9209_s10 + $0x100] sm:$0xff] %v5610_v43   ;;  %5806 = vst [vmem:[%s9209_s10 + $0x140] sm:$0xff] %v5650_v11   ;;  %v3569_v34 = vsub.f32 %v8595_v39, %v9145_v55  ;;  %6669 = vrcp.f32 %v3708_v1  ;;  %v3519_v19 = vadd.f32 %v9176_v30, %v3423_v63  ;;  %v3665_v27 = vsub.f32 %v9095_v48, %v9145_v55  ;;  %v10551_v55 = vld [vmem:[#allocation117_spill] sm:$0xff]  ;;  %v10552_v43 = vld [vmem:[#allocation19_spill] sm:$0xff] }
 0x437   : > { %5814 = vst [vmem:[%s9209_s10 + $0x180] sm:$0xff] %v5690_v6   ;;  %5822 = vst [vmem:[%s9209_s10 + $0x1c0] sm:$0xff] %v5730_v62   ;;  %v3230_v10 = vadd.f32 %v9205_v22, %v3134_v17  ;;  %v6654_v56 = vpop.eup %6653  ;;  %6671 = vpow2.f32 %v3208_v23  ;;  %v3496_v33 = vmul.f32 1.442695, %v3473_v38  ;;  %v4680_v59 = vsel %vm8820_vm11, %v9151_v16, 0  ;;  %v10555_v1 = vld [vmem:[#allocation86_spill] sm:$0xff] }
 0x438   : > { %v3592_v18 = vmul.f32 1.442695, %v3569_v34  ;;  %v9234_v47 = vpop.eup %6655  ;;  %v3757_v39 = vmul.f32 %v6654_v56, %v10550_v24  ;;  %v3615_v2 = vadd.f32 %v9181_v14, %v3519_v19  ;;  %6673 = vpow2.f32 %v3304_v40  ;;  %4696 = vst [vmem:[%s8890_s27 + $0x38] sm:$0xff] %v4680_v59  ;;  %v10556_v17 = vld [vmem:[#allocation67_spill] sm:$0xff]  ;;  %v6468_v19 = vpop.f32.mrf.mxu0 }
 0x439   : > { %v3688_v7 = vmul.f32 1.442695, %v3665_v27  ;;  %v9239_v53 = vpop.eup %6657  ;;  %v3326_v48 = vadd.f32 %v9234_v47, %v3230_v10  ;;  %6675 = vpow2.f32 %v3400_v61  ;;  %v2944_v29 = vsel %vm2928_vm4, %v9107_v35, %v8692_v45  ;;  %v10557_v56 = vld [vmem:[#allocation111_spill] sm:$0xff] }
 0x43a   : > { %v2960_v16 = vsel %vm2928_vm4, 7, %v10551_v55  ;;  %v9251_v23 = vpop.eup %6659  ;;  %v9254_v40 = vmul.f32 %v9027_v36, %v3757_v39  ;;  %v9257_v8 = vmul.f32 %v9032_v60, %v3757_v39  ;;  %v9260_v5 = vmul.f32 %v9037_v58, %v3757_v39  ;;  %v10558_v59 = vld [vmem:[#allocation107_spill] sm:$0xff] }
 0x43b   : > { %v9263_v26 = vmul.f32 %v9043_v50, %v3757_v39  ;;  %v9265_v52 = vpop.eup %6661  ;;  %v9268_v42 = vmul.f32 %v9046_v20, %v3757_v39  ;;  %v9271_v45 = vmul.f32 %v9055_v49, %v3757_v39  ;;  %v9274_v36 = vmul.f32 %v9063_v37, %v3757_v39  ;;  %v10553_v20 = vld [vmem:[#allocation50_spill] sm:$0xff]  ;;  %v10554_v49 = vld [vmem:[#allocation33_spill] sm:$0xff] }
 0x43c   : > { %v9277_v60 = vmul.f32 %v9068_v57, %v3757_v39  ;;  %v9279_v13 = vpop.eup %6663  ;;  %v3711_v58 = vadd.f32 %v9187_v41, %v3615_v2  ;;  %v3422_v50 = vadd.f32 %v9239_v53, %v3326_v48  ;;  %6677 = vpow2.f32 %v3496_v33 }
 0x43d   : > { %v2992_v11 = vsub.f32 %v10552_v43, %v2944_v29  ;;  %6679 = vpow2.f32 %v3592_v18  ;;  %v3088_v6 = vsub.f32 %v10553_v20, %v2944_v29  ;;  %v3184_v62 = vsub.f32 %v10554_v49, %v2944_v29 }
 0x43e   : > { %v3280_v37 = vsub.f32 %v10555_v1, %v2944_v29  ;;  %6681 = vrcp.f32 %v3711_v58  ;;  %v3518_v57 = vadd.f32 %v9251_v23, %v3422_v50  ;;  %v3376_v61 = vsub.f32 %v10556_v17, %v2944_v29 }
 0x43f   : > { %v3014_v63 = vmul.f32 1.442695, %v2992_v11  ;;  %6683 = vpow2.f32 %v3688_v7  ;;  %v3110_v15 = vmul.f32 1.442695, %v3088_v6  ;;  %v3206_v38 = vmul.f32 1.442695, %v3184_v62 }
 0x440   : > { %v3302_v34 = vmul.f32 1.442695, %v3280_v37  ;;  %v3614_v10 = vadd.f32 %v9265_v52, %v3518_v57  ;;  %v3398_v27 = vmul.f32 1.442695, %v3376_v61  ;;  %v3472_v33 = vsub.f32 %v10557_v56, %v2944_v29  ;;  %v10560_v6 = vld [vmem:[#allocation121_spill] sm:$0xff]  ;;  %v10562_v61 = vld [vmem:[#allocation36_spill] sm:$0xff] }
 0x441   : > { %6685 = vpow2.f32 %v3014_v63  ;;  %v9291_v18 = vpop.eup %6665  ;;  %v3568_v24 = vsub.f32 %v10558_v59, %v2944_v29  ;;  %v3664_v39 = vsub.f32 %v9107_v35, %v2944_v29  ;;  %v4679_v2 = vsel %vm8903_vm8, %v2960_v16, 0  ;;  %v10559_v16 = vld [vmem:[#allocation100_spill] sm:$0xff]  ;;  %v10561_v63 = vld [vmem:[#allocation34_spill] sm:$0xff] }
 0x442   : > { %6687 = vpow2.f32 %v3110_v15  ;;  %v9297_v7 = vpop.eup %6667  ;;  %v3710_v48 = vadd.f32 %v9279_v13, %v3614_v10  ;;  %4695 = vst [vmem:[%s8890_s27 + $0x30] sm:$0xff] %v4679_v2  ;;  %v9302_v55 = vadd.f32 %v6468_v19, %v10485_v28  ;;  %v9305_v58 = vadd.s32 64, %v7790_v9  ;;  %v10563_v19 = vld [vmem:[#allocation68_spill] sm:$0xff] }
 0x443   : > { %6689 = vpow2.f32 %v3206_v38  ;;  %v6670_v50 = vpop.eup %6669  ;;  %v3137_v43 = vadd.f32 %v9297_v7, %v9291_v18  ;;  %v3494_v35 = vmul.f32 1.442695, %v3472_v33  ;;  %v3590_v44 = vmul.f32 1.442695, %v3568_v24 }
 0x444   : > { %6691 = vpow2.f32 %v3302_v34  ;;  %v9309_v29 = vpop.eup %6671  ;;  %v3756_v11 = vmul.f32 %v6670_v50, %v10559_v16  ;;  %v3686_v20 = vmul.f32 1.442695, %v3664_v39  ;;  %vm2931_vm3 = vcmp.gt.f32.partialorder %v9302_v55, %v10560_v6 }
 0x445   : > { %6693 = vrcp.f32 %v3710_v48  ;;  %v9314_v49 = vpop.eup %6673  ;;  %v3233_v62 = vadd.f32 %v9309_v29, %v3137_v43  ;;  %vm1219_vm11 = vcmp.lt.s32.totalorder %v8884_v3, %v7968_v12  ;;  %v9321_v1 = vsel %vm2931_vm3, %v9302_v55, %v10560_v6  ;;  %v10567_v48 = vld [vmem:[#allocation88_spill] sm:$0xff]  ;;  %v10568_v43 = vld [vmem:[#allocation69_spill] sm:$0xff]  ;;  %v10579_v3 = vld [vmem:[#allocation122_spill] sm:$0xff] }
 0x446   : > { %6695 = vpow2.f32 %v3398_v27  ;;  %v9324_v37 = vsel %vm2931_vm3, 7, %v8748_v4  ;;  %v9326_v57 = vpop.eup %6675  ;;  %v3788_v17 = vmul.f32 %v10561_v63, %v3756_v11  ;;  %v3900_v15 = vmul.f32 %v10562_v61, %v3756_v11  ;;  %vm9397_vm13 = vmand %vm1219_vm11, %vm8027_vm5 }
 0x447   : > { %v4013_v38 = vmul.f32 %v9079_v21, %v3756_v11  ;;  %v4126_v34 = vmul.f32 %v9084_v54, %v3756_v11  ;;  %v4239_v10 = vmul.f32 %v10563_v19, %v3756_v11  ;;  %v4352_v27 = vmul.f32 %v9097_v51, %v3756_v11 }
 0x448   : > { %v4465_v4 = vmul.f32 %v9102_v32, %v3756_v11  ;;  %v4578_v56 = vmul.f32 %v9109_v31, %v3756_v11  ;;  %v5455_v33 = vpack.c.bf16 %v9254_v40, %v3788_v17  ;;  %v5495_v59 = vpack.c.bf16 %v9257_v8, %v3900_v15  ;;  %v10569_v11 = vld [vmem:[#allocation113_spill] sm:$0xff] }
 0x449   : > { %v5535_v21 = vpack.c.bf16 %v9260_v5, %v4013_v38  ;;  %v5575_v24 = vpack.c.bf16 %v9263_v26, %v4126_v34  ;;  %v9340_v54 = vpop.eup %6677  ;;  %v5615_v39 = vpack.c.bf16 %v9268_v42, %v4239_v10  ;;  %v5655_v51 = vpack.c.bf16 %v9271_v45, %v4352_v27  ;;  %v10564_v5 = vld [vmem:[#allocation20_spill] sm:$0xff] }
 0x44a   : > { %v5695_v32 = vpack.c.bf16 %v9274_v36, %v4465_v4  ;;  %v5735_v31 = vpack.c.bf16 %v9277_v60, %v4578_v56  ;;  %v9346_v40 = vpop.eup %6679  ;;  %5767 = vst [vmem:[%s9209_s10 + $0x8] sm:$0xff] %v5455_v33   ;;  %5775 = vst [vmem:[%s9209_s10 + $0x48] sm:$0xff] %v5495_v59   ;;  %v3329_v8 = vadd.f32 %v9314_v49, %v3233_v62  ;;  %6697 = vpow2.f32 %v3494_v35  ;;  %v10565_v42 = vld [vmem:[#allocation52_spill] sm:$0xff]  ;;  %v10566_v36 = vld [vmem:[#allocation35_spill] sm:$0xff] }
 0x44b   : > { %5783 = vst [vmem:[%s9209_s10 + $0x88] sm:$0xff] %v5535_v21   ;;  %5791 = vst [vmem:[%s9209_s10 + $0xc8] sm:$0xff] %v5575_v24   ;;  %v2995_v26 = vsub.f32 %v10564_v5, %v9321_v1  ;;  %v3091_v45 = vsub.f32 %v10565_v42, %v9321_v1  ;;  %v6682_v2 = vpop.eup %6681  ;;  %6699 = vpow2.f32 %v3590_v44  ;;  %v3187_v60 = vsub.f32 %v10566_v36, %v9321_v1  ;;  %v10570_v38 = vld [vmem:[#allocation112_spill] sm:$0xff]  ;;  %v10572_v4 = vld [vmem:[#allocation57_spill] sm:$0xff] }
 0x44c   : > { %5799 = vst [vmem:[%s9209_s10 + $0x108] sm:$0xff] %v5615_v39   ;;  %5807 = vst [vmem:[%s9209_s10 + $0x148] sm:$0xff] %v5655_v51   ;;  %v3283_v50 = vsub.f32 %v10567_v48, %v9321_v1  ;;  %v3379_v35 = vsub.f32 %v10568_v43, %v9321_v1  ;;  %v9367_v16 = vpop.eup %6683  ;;  %v3759_v6 = vmul.f32 %v6682_v2, %v10569_v11  ;;  %6701 = vpow2.f32 %v3686_v20  ;;  %v10571_v10 = vld [vmem:[#allocation60_spill] sm:$0xff]  ;;  %v10573_v33 = vld [vmem:[#allocation13_spill] sm:$0xff] }
 0x44d   : > { %5815 = vst [vmem:[%s9209_s10 + $0x188] sm:$0xff] %v5695_v32   ;;  %5823 = vst [vmem:[%s9209_s10 + $0x1c8] sm:$0xff] %v5735_v31   ;;  %v3425_v62 = vadd.f32 %v9326_v57, %v3329_v8  ;;  %v3020_v63 = vmul.f32 1.442695, %v2995_v26  ;;  %v3116_v44 = vmul.f32 1.442695, %v3091_v45  ;;  %v3475_v34 = vsub.f32 %v10570_v38, %v9321_v1 }
 0x44e   : > { %v9371_v17 = vpop.eup %6685  ;;  %v3212_v61 = vmul.f32 1.442695, %v3187_v60  ;;  %v3308_v15 = vmul.f32 1.442695, %v3283_v50  ;;  %v3791_v27 = vmul.f32 %v10571_v10, %v3759_v6  ;;  %v3903_v56 = vmul.f32 %v10572_v4, %v3759_v6  ;;  %v10574_v21 = vld [vmem:[#allocation37_spill] sm:$0xff]  ;;  %v10578_v36 = vld [vmem:[#allocation108_spill] sm:$0xff] }
 0x44f   : > { %v9375_v19 = vpop.eup %6687  ;;  %v4016_v59 = vmul.f32 %v10573_v33, %v3759_v6  ;;  %v4129_v24 = vmul.f32 %v10574_v21, %v3759_v6  ;;  %v4242_v39 = vmul.f32 %v9169_v46, %v3759_v6  ;;  %v4355_v51 = vmul.f32 %v9176_v30, %v3759_v6  ;;  %v2866_v30 = vpop.f32.mrf.mxu0 }
 0x450   : > { %v9381_v20 = vpop.eup %6689  ;;  %v4468_v32 = vmul.f32 %v9181_v14, %v3759_v6  ;;  %v4581_v31 = vmul.f32 %v9187_v41, %v3759_v6  ;;  %v3521_v5 = vadd.f32 %v9340_v54, %v3425_v62  ;;  %v3136_v26 = vadd.f32 %v9375_v19, %v9371_v17 }
 0x451   : > { %v9387_v8 = vpop.eup %6691  ;;  %6703 = vpow2.f32 %v3020_v63  ;;  %v9402_v14 = vadd.s32 88, %v7790_v9  ;;  %v3404_v45 = vmul.f32 1.442695, %v3379_v35  ;;  %v3500_v2 = vmul.f32 1.442695, %v3475_v34 }
 0x452   : > { %v6694_v41 = vpop.eup %6693  ;;  %6705 = vpow2.f32 %v3116_v44  ;;  %v3571_v60 = vsub.f32 %v10578_v36, %v9321_v1  ;;  %v3617_v43 = vadd.f32 %v9346_v40, %v3521_v5  ;;  %v3232_v11 = vadd.f32 %v9381_v20, %v3136_v26  ;;  %v10581_v26 = vld [vmem:[#allocation127_spill] sm:$0xff] }
 0x453   : > { %v9406_v48 = vpop.eup %6695  ;;  %v3758_v50 = vmul.f32 %v6694_v41, %v10579_v3  ;;  %6707 = vpow2.f32 %v3212_v61  ;;  %v3667_v62 = vsub.f32 %v9302_v55, %v9321_v1  ;;  %v4682_v35 = vsel %vm9397_vm13, %v9324_v37, 0  ;;  %v6471_v61 = vpop.f32.mrf.mxu0 }
 0x454   : > { %6709 = vpow2.f32 %v3308_v15  ;;  %v3596_v6 = vmul.f32 1.442695, %v3571_v60  ;;  %4698 = vst [vmem:[%s8890_s27 + $0x48] sm:$0xff] %v4682_v35  ;;  %vm1218_vm15 = vcmp.lt.s32.totalorder %v9305_v58, %v7968_v12  ;;  %vm1221_vm1 = vcmp.lt.s32.totalorder %v9402_v14, %v7968_v12  ;;  %v10583_v60 = vld [vmem:[#allocation53_spill] sm:$0xff] }
 0x455   : > { %v3790_v63 = vmul.f32 %v9193_v25, %v3758_v50  ;;  %v3902_v44 = vmul.f32 %v9199_v0, %v3758_v50  ;;  %v4015_v38 = vmul.f32 %v9205_v22, %v3758_v50  ;;  %v4128_v34 = vmul.f32 %v9234_v47, %v3758_v50  ;;  %vm9478_vm2 = vmand %vm1218_vm15, %vm8027_vm5 }
 0x456   : > { %v4241_v15 = vmul.f32 %v9239_v53, %v3758_v50  ;;  %v4354_v55 = vmul.f32 %v9251_v23, %v3758_v50  ;;  %v4467_v1 = vmul.f32 %v9265_v52, %v3758_v50  ;;  %v4580_v25 = vmul.f32 %v9279_v13, %v3758_v50  ;;  %v10584_v50 = vld [vmem:[#allocation130_spill] sm:$0xff]  ;;  %vm9528_vm7 = vmand %vm1221_vm1, %vm8027_vm5 }
 0x457   : > { %v5460_v37 = vpack.c.bf16 %v3791_v27, %v3790_v63  ;;  %v5500_v0 = vpack.c.bf16 %v3903_v56, %v3902_v44  ;;  %v5540_v10 = vpack.c.bf16 %v4016_v59, %v4015_v38  ;;  %v5580_v22 = vpack.c.bf16 %v4129_v24, %v4128_v34  ;;  %v9425_v4 = vpop.eup %6697  ;;  %v2876_v56 = vpop.f32.mrf.mxu0  ;;  %v10587_v63 = vld [vmem:[#allocation71_spill] sm:$0xff] }
 0x458   : > { %v5620_v47 = vpack.c.bf16 %v4242_v39, %v4241_v15  ;;  %v5660_v33 = vpack.c.bf16 %v4355_v51, %v4354_v55  ;;  %v5700_v53 = vpack.c.bf16 %v4468_v32, %v4467_v1  ;;  %v5740_v21 = vpack.c.bf16 %v4581_v31, %v4580_v25  ;;  %v9427_v23 = vpop.eup %6699  ;;  %v10580_v31 = vld [vmem:[#allocation125_spill] sm:$0xff]  ;;  %v10588_v38 = vld [vmem:[#allocation115_spill] sm:$0xff] }
 0x459   : > { %5768 = vst [vmem:[%s9209_s10 + $0x10] sm:$0xff] %v5460_v37   ;;  %5776 = vst [vmem:[%s9209_s10 + $0x50] sm:$0xff] %v5500_v0   ;;  %v3713_v52 = vadd.f32 %v9367_v16, %v3617_v43  ;;  %v3328_v13 = vadd.f32 %v9387_v8, %v3232_v11  ;;  %6711 = vpow2.f32 %v3404_v45  ;;  %v2867_v27 = vadd.f32 %v2866_v30, %v10485_v28  ;;  %v9436_v59 = vpop.eup %6701  ;;  %v10585_v11 = vld [vmem:[#allocation38_spill] sm:$0xff] }
 0x45a   : > { %5784 = vst [vmem:[%s9209_s10 + $0x90] sm:$0xff] %v5540_v10   ;;  %5792 = vst [vmem:[%s9209_s10 + $0xd0] sm:$0xff] %v5580_v22   ;;  %6713 = vpow2.f32 %v3500_v2  ;;  %v9445_v24 = vadd.f32 %v6471_v61, %v10485_v28  ;;  %v9448_v39 = vadd.s32 80, %v7790_v9  ;;  %v3692_v32 = vmul.f32 1.442695, %v3667_v62  ;;  %v10582_v2 = vld [vmem:[#allocation21_spill] sm:$0xff] }
 0x45b   : > { %5800 = vst [vmem:[%s9209_s10 + $0x110] sm:$0xff] %v5620_v47   ;;  %5808 = vst [vmem:[%s9209_s10 + $0x150] sm:$0xff] %v5660_v33   ;;  %6715 = vrcp.f32 %v3713_v52  ;;  %v3424_v51 = vadd.f32 %v9406_v48, %v3328_v13  ;;  %vm2930_vm0 = vcmp.gt.f32.partialorder %v2867_v27, %v10580_v31  ;;  %v9457_v41 = vadd.f32 %v2876_v56, %v10485_v28  ;;  %v10586_v62 = vld [vmem:[#allocation89_spill] sm:$0xff]  ;;  %v10591_v37 = vld [vmem:[#allocation110_spill] sm:$0xff] }
 0x45c   : > { %5816 = vst [vmem:[%s9209_s10 + $0x190] sm:$0xff] %v5700_v53   ;;  %5824 = vst [vmem:[%s9209_s10 + $0x1d0] sm:$0xff] %v5740_v21   ;;  %6717 = vpow2.f32 %v3596_v6  ;;  %v2946_v5 = vsel %vm2930_vm0, %v2867_v27, %v10580_v31  ;;  %v2962_v30 = vsel %vm2930_vm0, 7, %v10581_v26  ;;  %vm2933_vm8 = vcmp.gt.f32.partialorder %v9445_v24, %v10584_v50  ;;  %v10592_v26 = vld [vmem:[#allocation132_spill] sm:$0xff] }
 0x45d   : > { %v3520_v45 = vadd.f32 %v9425_v4, %v3424_v51  ;;  %v2994_v36 = vsub.f32 %v10582_v2, %v2946_v5  ;;  %v3090_v3 = vsub.f32 %v10583_v60, %v2946_v5  ;;  %v3186_v6 = vsub.f32 %v10585_v11, %v2946_v5 }
 0x45e   : > { %v9464_v43 = vpop.eup %6703  ;;  %v3282_v35 = vsub.f32 %v10586_v62, %v2946_v5  ;;  %v3378_v44 = vsub.f32 %v10587_v63, %v2946_v5  ;;  %v3474_v34 = vsub.f32 %v10588_v38, %v2946_v5  ;;  %v3570_v0 = vsub.f32 %v10591_v37, %v2946_v5  ;;  %v10597_v63 = vld [vmem:[#allocation74_spill] sm:$0xff]  ;;  %v10598_v38 = vld [vmem:[#allocation116_spill] sm:$0xff] }
 0x45f   : > { %v9470_v61 = vpop.eup %6705  ;;  %v3616_v15 = vadd.f32 %v9427_v23, %v3520_v45  ;;  %v3018_v1 = vmul.f32 1.442695, %v2994_v36  ;;  %v3114_v25 = vmul.f32 1.442695, %v3090_v3  ;;  %6719 = vpow2.f32 %v3692_v32  ;;  %v10594_v36 = vld [vmem:[#allocation56_spill] sm:$0xff]  ;;  %v10595_v3 = vld [vmem:[#allocation41_spill] sm:$0xff] }
 0x460   : > { %v9483_v10 = vpop.eup %6707  ;;  %v3139_v22 = vadd.f32 %v9470_v61, %v9464_v43  ;;  %v3210_v47 = vmul.f32 1.442695, %v3186_v6  ;;  %v3306_v33 = vmul.f32 1.442695, %v3282_v35  ;;  %v3402_v21 = vmul.f32 1.442695, %v3378_v44 }
 0x461   : > { %v9487_v53 = vpop.eup %6709  ;;  %v3712_v58 = vadd.f32 %v9436_v59, %v3616_v15  ;;  %6721 = vpow2.f32 %v3018_v1  ;;  %v3498_v52 = vmul.f32 1.442695, %v3474_v34  ;;  %v3666_v56 = vsub.f32 %v2867_v27, %v2946_v5  ;;  %v10596_v6 = vld [vmem:[#allocation90_spill] sm:$0xff] }
 0x462   : > { %v3235_v13 = vadd.f32 %v9483_v10, %v3139_v22  ;;  %6723 = vpow2.f32 %v3114_v25  ;;  %v4681_v51 = vsel %vm9478_vm2, %v2962_v30, 0  ;;  %v3594_v31 = vmul.f32 1.442695, %v3570_v0  ;;  %v10593_v30 = vld [vmem:[#allocation22_spill] sm:$0xff]  ;;  %v10601_v0 = vld [vmem:[#allocation136_spill] sm:$0xff] }
 0x463   : > { %6725 = vrcp.f32 %v3712_v58  ;;  %4697 = vst [vmem:[%s8890_s27 + $0x40] sm:$0xff] %v4681_v51  ;;  %v9499_v32 = vsel %vm2933_vm8, %v9445_v24, %v10584_v50  ;;  %v2965_v45 = vsel %vm2933_vm8, 7, %v10592_v26  ;;  %v3690_v5 = vmul.f32 1.442695, %v3666_v56  ;;  %v10603_v56 = vld [vmem:[#allocation114_spill] sm:$0xff] }
 0x464   : > { %v3331_v27 = vadd.f32 %v9487_v53, %v3235_v13  ;;  %6727 = vpow2.f32 %v3210_v47  ;;  %v2997_v2 = vsub.f32 %v10593_v30, %v9499_v32  ;;  %v3093_v60 = vsub.f32 %v10594_v36, %v9499_v32 }
 0x465   : > { %6729 = vpow2.f32 %v3306_v33  ;;  %v3189_v11 = vsub.f32 %v10595_v3, %v9499_v32  ;;  %v3285_v62 = vsub.f32 %v10596_v6, %v9499_v32  ;;  %v3381_v44 = vsub.f32 %v10597_v63, %v9499_v32  ;;  %v10607_v63 = vld [vmem:[#allocation43_spill] sm:$0xff] }
 0x466   : > { %v9514_v35 = vpop.eup %6711  ;;  %6731 = vpow2.f32 %v3402_v21  ;;  %v3024_v50 = vmul.f32 1.442695, %v2997_v2  ;;  %v3477_v34 = vsub.f32 %v10598_v38, %v9499_v32  ;;  %v3120_v37 = vmul.f32 1.442695, %v3093_v60  ;;  %v10608_v38 = vld [vmem:[#allocation91_spill] sm:$0xff] }
 0x467   : > { %v9520_v15 = vpop.eup %6713  ;;  %v3427_v1 = vadd.f32 %v9514_v35, %v3331_v27  ;;  %6733 = vpow2.f32 %v3498_v52  ;;  %vm2932_vm9 = vcmp.gt.f32.partialorder %v9457_v41, %v10601_v0  ;;  %v3216_v47 = vmul.f32 1.442695, %v3189_v11  ;;  %v10602_v52 = vld [vmem:[#allocation55_spill] sm:$0xff]  ;;  %v10606_v11 = vld [vmem:[#allocation58_spill] sm:$0xff] }
 0x468   : > { %v6716_v22 = vpop.eup %6715  ;;  %6735 = vpow2.f32 %v3594_v31  ;;  %v3312_v33 = vmul.f32 1.442695, %v3285_v62  ;;  %v3408_v58 = vmul.f32 1.442695, %v3381_v44  ;;  %v3573_v51 = vsub.f32 %v10603_v56, %v9499_v32 }
 0x469   : > { %v9534_v21 = vpop.eup %6717  ;;  %v3761_v13 = vmul.f32 %v6716_v22, %v10602_v52  ;;  %v3523_v14 = vadd.f32 %v9520_v15, %v3427_v1  ;;  %6737 = vpow2.f32 %v3690_v5  ;;  %v3669_v26 = vsub.f32 %v9445_v24, %v9499_v32  ;;  %v10609_v52 = vld [vmem:[#allocation12_spill] sm:$0xff] }
 0x46a   : > { %6739 = vpow2.f32 %v3024_v50  ;;  %v4684_v31 = vsel %vm9528_vm7, %v2965_v45, 0  ;;  %vm1220_vm14 = vcmp.lt.s32.totalorder %v9448_v39, %v7968_v12  ;;  %v9551_v27 = vsel %vm2932_vm9, %v9457_v41, %v10601_v0 }
 0x46b   : > { %v3793_v5 = vmul.f32 %v9291_v18, %v3761_v13  ;;  %v3905_v30 = vmul.f32 %v9297_v7, %v3761_v13  ;;  %v4018_v2 = vmul.f32 %v9309_v29, %v3761_v13  ;;  %v4131_v24 = vmul.f32 %v9314_v49, %v3761_v13  ;;  %4700 = vst [vmem:[%s8890_s27 + $0x58] sm:$0xff] %v4684_v31  ;;  %v10610_v31 = vld [vmem:[#allocation76_spill] sm:$0xff]  ;;  %vm9623_vm10 = vmand %vm1220_vm14, %vm8027_vm5 }
 0x46c   : > { %v9559_v32 = vmul.f32 %v9326_v57, %v3761_v13  ;;  %v9562_v45 = vmul.f32 %v9340_v54, %v3761_v13  ;;  %v9565_v36 = vmul.f32 %v9346_v40, %v3761_v13  ;;  %v9568_v60 = vmul.f32 %v9367_v16, %v3761_v13  ;;  %v9570_v18 = vpop.eup %6719  ;;  %v10604_v57 = vld [vmem:[#allocation137_spill] sm:$0xff]  ;;  %v10605_v40 = vld [vmem:[#allocation24_spill] sm:$0xff] }
 0x46d   : > { %v3619_v7 = vadd.f32 %v9534_v21, %v3523_v14  ;;  %6741 = vpow2.f32 %v3120_v37  ;;  %v3504_v29 = vmul.f32 1.442695, %v3477_v34  ;;  %v3600_v49 = vmul.f32 1.442695, %v3573_v51 }
 0x46e   : > { %v9573_v3 = vpop.eup %6721  ;;  %6743 = vpow2.f32 %v3216_v47  ;;  %v9579_v54 = vsel %vm2932_vm9, 7, %v10604_v57  ;;  %v2996_v16 = vsub.f32 %v10605_v40, %v9551_v27  ;;  %v3092_v6 = vsub.f32 %v10606_v11, %v9551_v27  ;;  %v10611_v57 = vld [vmem:[#allocation120_spill] sm:$0xff] }
 0x46f   : > { %v9585_v62 = vpop.eup %6723  ;;  %v3715_v50 = vadd.f32 %v9570_v18, %v3619_v7  ;;  %6745 = vpow2.f32 %v3312_v33  ;;  %v3188_v44 = vsub.f32 %v10607_v63, %v9551_v27  ;;  %v3284_v34 = vsub.f32 %v10608_v38, %v9551_v27 }
 0x470   : > { %v6726_v1 = vpop.eup %6725  ;;  %v3138_v37 = vadd.f32 %v9585_v62, %v9573_v3  ;;  %6747 = vpow2.f32 %v3408_v58  ;;  %v3696_v0 = vmul.f32 1.442695, %v3669_v26  ;;  %v3022_v22 = vmul.f32 1.442695, %v2996_v16 }
 0x471   : > { %v9594_v47 = vpop.eup %6727  ;;  %v3760_v13 = vmul.f32 %v6726_v1, %v10609_v52  ;;  %6749 = vrcp.f32 %v3715_v50  ;;  %v3118_v14 = vmul.f32 1.442695, %v3092_v6  ;;  %v3214_v33 = vmul.f32 1.442695, %v3188_v44 }
 0x472   : > { %v9597_v56 = vpop.eup %6729  ;;  %v3234_v51 = vadd.f32 %v9594_v47, %v3138_v37  ;;  %6751 = vpow2.f32 %v3504_v29  ;;  %v3380_v7 = vsub.f32 %v10610_v31, %v9551_v27  ;;  %v3476_v58 = vsub.f32 %v10611_v57, %v9551_v27 }
 0x473   : > { %v9604_v26 = vpop.eup %6731  ;;  %v3792_v40 = vmul.f32 %v9371_v17, %v3760_v13  ;;  %v3904_v16 = vmul.f32 %v9375_v19, %v3760_v13  ;;  %v4017_v11 = vmul.f32 %v9381_v20, %v3760_v13  ;;  %v4130_v6 = vmul.f32 %v9387_v8, %v3760_v13 }
 0x474   : > { %v9610_v50 = vpop.eup %6733  ;;  %v4243_v29 = vmul.f32 %v9406_v48, %v3760_v13  ;;  %v4356_v63 = vmul.f32 %v9425_v4, %v3760_v13  ;;  %v4469_v44 = vmul.f32 %v9427_v23, %v3760_v13  ;;  %v4582_v38 = vmul.f32 %v9436_v59, %v3760_v13 }
 0x475   : > { %v9616_v17 = vpop.eup %6735  ;;  %v5465_v19 = vpack.c.bf16 %v3793_v5, %v3792_v40  ;;  %v5505_v20 = vpack.c.bf16 %v3905_v30, %v3904_v16  ;;  %v5545_v1 = vpack.c.bf16 %v4018_v2, %v4017_v11  ;;  %v5585_v8 = vpack.c.bf16 %v4131_v24, %v4130_v6  ;;  %v6474_v2 = vpop.f32.mrf.mxu0  ;;  %v10616_v11 = vld [vmem:[#allocation140_spill] sm:$0xff] }
 0x476   : > { %v9627_v4 = vpop.eup %6737  ;;  %v5625_v23 = vpack.c.bf16 %v9559_v32, %v4243_v29  ;;  %v5665_v59 = vpack.c.bf16 %v9562_v45, %v4356_v63  ;;  %v5705_v5 = vpack.c.bf16 %v9565_v36, %v4469_v44  ;;  %v5745_v30 = vpack.c.bf16 %v9568_v60, %v4582_v38  ;;  %v10614_v45 = vld [vmem:[#allocation118_spill] sm:$0xff]  ;;  %v10617_v63 = vld [vmem:[#allocation141_spill] sm:$0xff] }
 0x477   : > { %v9633_v39 = vpop.eup %6739  ;;  %5769 = vst [vmem:[%s9209_s10 + $0x18] sm:$0xff] %v5465_v19   ;;  %5777 = vst [vmem:[%s9209_s10 + $0x58] sm:$0xff] %v5505_v20   ;;  %v3330_v24 = vadd.f32 %v9597_v56, %v3234_v51  ;;  %6753 = vpow2.f32 %v3600_v49  ;;  %v3310_v32 = vmul.f32 1.442695, %v3284_v34  ;;  %v3406_v37 = vmul.f32 1.442695, %v3380_v7  ;;  %v2886_v40 = vpop.f32.mrf.mxu0 }
 0x478   : > { %5785 = vst [vmem:[%s9209_s10 + $0x98] sm:$0xff] %v5545_v1   ;;  %5793 = vst [vmem:[%s9209_s10 + $0xd8] sm:$0xff] %v5585_v8   ;;  %6755 = vpow2.f32 %v3696_v0  ;;  %v3572_v36 = vsub.f32 %v10614_v45, %v9551_v27  ;;  %v3668_v60 = vsub.f32 %v9457_v41, %v9551_v27  ;;  %v4683_v52 = vsel %vm9623_vm10, %v9579_v54, 0 }
 0x479   : > { %5801 = vst [vmem:[%s9209_s10 + $0x118] sm:$0xff] %v5625_v23   ;;  %5809 = vst [vmem:[%s9209_s10 + $0x158] sm:$0xff] %v5665_v59   ;;  %v3426_v13 = vadd.f32 %v9604_v26, %v3330_v24  ;;  %6757 = vpow2.f32 %v3022_v22  ;;  %v1204_v49 = vadd.s32 104, %v7790_v9  ;;  %v9655_v34 = vadd.f32 %v6474_v2, %v10485_v28  ;;  %v10618_v23 = vld [vmem:[#allocation26_spill] sm:$0xff]  ;;  %v10620_v2 = vld [vmem:[#allocation45_spill] sm:$0xff] }
 0x47a   : > { %5817 = vst [vmem:[%s9209_s10 + $0x198] sm:$0xff] %v5705_v5   ;;  %5825 = vst [vmem:[%s9209_s10 + $0x1d8] sm:$0xff] %v5745_v30   ;;  %v9657_v0 = vpop.eup %6741  ;;  %v10615_v51 = vmov 0.0   ;;  %6759 = vpow2.f32 %v3118_v14  ;;  %v3502_v27 = vmul.f32 1.442695, %v3476_v58  ;;  %v9677_v55 = vadd.s32 96, %v7790_v9 }
 0x47b   : > { %4699 = vst [vmem:[%s8890_s27 + $0x50] sm:$0xff] %v4683_v52  ;;  %v4933_v31 = vsel %vm9397_vm13, 1.0, %v10615_v51  ;;  %v9665_v41 = vsel %vm9478_vm2, 1.0, %v10615_v51  ;;  %v9667_v54 = vpop.eup %6743  ;;  %v3522_v22 = vadd.f32 %v9610_v50, %v3426_v13  ;;  %v3141_v7 = vadd.f32 %v9657_v0, %v9633_v39  ;;  %v10619_v5 = vld [vmem:[#allocation61_spill] sm:$0xff] }
 0x47c   : > { %6761 = vpow2.f32 %v3214_v33  ;;  %v3598_v57 = vmul.f32 1.442695, %v3572_v36  ;;  %v9672_v16 = vpop.eup %6745  ;;  %v3694_v46 = vmul.f32 1.442695, %v3668_v60  ;;  %vm2935_vm4 = vcmp.gt.f32.partialorder %v9655_v34, %v10616_v11 }
 0x47d   : > { %6763 = vpow2.f32 %v3310_v32  ;;  %v9679_v14 = vpop.eup %6747  ;;  %v3618_v58 = vadd.f32 %v9616_v17, %v3522_v22  ;;  %v3237_v6 = vadd.f32 %v9667_v54, %v3141_v7  ;;  %vm1223_vm3 = vcmp.lt.s32.totalorder %v1204_v49, %v7968_v12  ;;  %v10621_v22 = vld [vmem:[#allocation92_spill] sm:$0xff]  ;;  %v10622_v7 = vld [vmem:[#allocation79_spill] sm:$0xff] }
 0x47e   : > { %6765 = vpow2.f32 %v3406_v37  ;;  %v6750_v33 = vpop.eup %6749  ;;  %v2951_v29 = vsel %vm2935_vm4, %v9655_v34, %v10616_v11  ;;  %v2967_v44 = vsel %vm2935_vm4, 7, %v10617_v63  ;;  %v9688_v38 = vadd.f32 %v2886_v40, %v10485_v28  ;;  %vm9736_vm13 = vmand %vm1223_vm3, %vm8027_vm5  ;;  %v10626_v11 = vld [vmem:[#allocation119_spill] sm:$0xff] }
 0x47f   : > { %6767 = vpow2.f32 %v3502_v27  ;;  %v9690_v19 = vpop.eup %6751  ;;  %v3763_v20 = vmul.f32 %v6750_v33, %v4933_v31  ;;  %v3714_v1 = vadd.f32 %v9627_v4, %v3618_v58  ;;  %v3333_v8 = vadd.f32 %v9672_v16, %v3237_v6 }
 0x480   : > { %6769 = vpow2.f32 %v3598_v57  ;;  %v2999_v59 = vsub.f32 %v10618_v23, %v2951_v29  ;;  %v3095_v30 = vsub.f32 %v10619_v5, %v2951_v29  ;;  %v3191_v24 = vsub.f32 %v10620_v2, %v2951_v29 }
 0x481   : > { %6771 = vpow2.f32 %v3694_v46  ;;  %v9698_v32 = vmul.f32 %v9464_v43, %v3763_v20  ;;  %v9701_v37 = vmul.f32 %v9470_v61, %v3763_v20  ;;  %v9704_v45 = vmul.f32 %v9483_v10, %v3763_v20 }
 0x482   : > { %v9707_v36 = vmul.f32 %v9487_v53, %v3763_v20  ;;  %vm1222_vm11 = vcmp.lt.s32.totalorder %v9677_v55, %v7968_v12  ;;  %v9712_v60 = vmul.f32 %v9514_v35, %v3763_v20  ;;  %v9715_v52 = vmul.f32 %v9520_v15, %v3763_v20  ;;  %v10623_v15 = vld [vmem:[#allocation123_spill] sm:$0xff] }
 0x483   : > { %v9718_v43 = vmul.f32 %v9534_v21, %v3763_v20  ;;  %v9721_v61 = vmul.f32 %v9570_v18, %v3763_v20  ;;  %6773 = vrcp.f32 %v3714_v1  ;;  %v3429_v10 = vadd.f32 %v9679_v14, %v3333_v8  ;;  %vm9780_vm0 = vmand %vm1222_vm11, %vm8027_vm5 }
 0x484   : > { %v3028_v53 = vmul.f32 1.442695, %v2999_v59  ;;  %v3124_v13 = vmul.f32 1.442695, %v3095_v30  ;;  %v9724_v31 = vpop.eup %6753  ;;  %v3220_v27 = vmul.f32 1.442695, %v3191_v24  ;;  %v3287_v35 = vsub.f32 %v10621_v22, %v2951_v29 }
 0x485   : > { %v3383_v57 = vsub.f32 %v10622_v7, %v2951_v29  ;;  %v3479_v40 = vsub.f32 %v10623_v15, %v2951_v29  ;;  %v9729_v46 = vpop.eup %6755  ;;  %v3525_v21 = vadd.f32 %v9690_v19, %v3429_v10  ;;  %v3575_v58 = vsub.f32 %v10626_v11, %v2951_v29  ;;  %v10630_v7 = vld [vmem:[#allocation63_spill] sm:$0xff]  ;;  %v10632_v11 = vld [vmem:[#allocation93_spill] sm:$0xff] }
 0x486   : > { %6775 = vpow2.f32 %v3028_v53  ;;  %v3671_v6 = vsub.f32 %v9655_v34, %v2951_v29  ;;  %v9742_v33 = vpop.eup %6757  ;;  %v3316_v63 = vmul.f32 1.442695, %v3287_v35  ;;  %v4686_v34 = vsel %vm9736_vm13, %v2967_v44, 0  ;;  %v10627_v29 = vld [vmem:[#allocation142_spill] sm:$0xff]  ;;  %v10628_v53 = vld [vmem:[#allocation143_spill] sm:$0xff]  ;;  %v10629_v44 = vld [vmem:[#allocation28_spill] sm:$0xff] }
 0x487   : > { %6777 = vpow2.f32 %v3124_v13  ;;  %v3412_v20 = vmul.f32 1.442695, %v3383_v57  ;;  %v3508_v1 = vmul.f32 1.442695, %v3479_v40  ;;  %v9744_v8 = vpop.eup %6759  ;;  %v3621_v49 = vadd.f32 %v9724_v31, %v3525_v21  ;;  %4702 = vst [vmem:[%s8890_s27 + $0x68] sm:$0xff] %v4686_v34  ;;  %v10631_v40 = vld [vmem:[#allocation47_spill] sm:$0xff] }
 0x488   : > { %6779 = vpow2.f32 %v3220_v27  ;;  %v3604_v23 = vmul.f32 1.442695, %v3575_v58  ;;  %v3700_v59 = vmul.f32 1.442695, %v3671_v6  ;;  %v3140_v30 = vadd.f32 %v9744_v8, %v9742_v33  ;;  %v10633_v6 = vld [vmem:[#allocation82_spill] sm:$0xff] }
 0x489   : > { %v9747_v5 = vpop.eup %6761  ;;  %6781 = vpow2.f32 %v3316_v63  ;;  %vm2934_vm15 = vcmp.gt.f32.partialorder %v9688_v38, %v10627_v29  ;;  %v3717_v24 = vadd.f32 %v9729_v46, %v3621_v49 }
 0x48a   : > { %v9755_v2 = vpop.eup %6763  ;;  %6783 = vpow2.f32 %v3412_v20  ;;  %v2950_v10 = vsel %vm2934_vm15, %v9688_v38, %v10627_v29  ;;  %v2966_v13 = vsel %vm2934_vm15, 7, %v10628_v53  ;;  %v3236_v22 = vadd.f32 %v9747_v5, %v3140_v30 }
 0x48b   : > { %v9762_v27 = vpop.eup %6765  ;;  %6785 = vpow2.f32 %v3508_v1  ;;  %v2998_v35 = vsub.f32 %v10629_v44, %v2950_v10  ;;  %v3094_v57 = vsub.f32 %v10630_v7, %v2950_v10  ;;  %v3190_v21 = vsub.f32 %v10631_v40, %v2950_v10  ;;  %v10637_v40 = vld [vmem:[#allocation124_spill] sm:$0xff] }
 0x48c   : > { %v9767_v15 = vpop.eup %6767  ;;  %6787 = vrcp.f32 %v3717_v24  ;;  %v3286_v58 = vsub.f32 %v10632_v11, %v2950_v10  ;;  %v3382_v63 = vsub.f32 %v10633_v6, %v2950_v10  ;;  %v3332_v49 = vadd.f32 %v9755_v2, %v3236_v22  ;;  %v10636_v22 = vld [vmem:[#allocation126_spill] sm:$0xff] }
 0x48d   : > { %v9772_v20 = vpop.eup %6769  ;;  %6789 = vpow2.f32 %v3604_v23  ;;  %v3026_v30 = vmul.f32 1.442695, %v2998_v35  ;;  %v3122_v34 = vmul.f32 1.442695, %v3094_v57  ;;  %v3218_v24 = vmul.f32 1.442695, %v3190_v21 }
 0x48e   : > { %v9784_v29 = vpop.eup %6771  ;;  %6791 = vpow2.f32 %v3700_v59  ;;  %v3314_v53 = vmul.f32 1.442695, %v3286_v58  ;;  %v3410_v44 = vmul.f32 1.442695, %v3382_v63  ;;  %v3428_v23 = vadd.f32 %v9762_v27, %v3332_v49 }
 0x48f   : > { %6793 = vpow2.f32 %v3026_v30  ;;  %v3478_v7 = vsub.f32 %v10636_v22, %v2950_v10  ;;  %v3574_v55 = vsub.f32 %v10637_v40, %v2950_v10  ;;  %v4935_v11 = vsel %vm9528_vm7, 1.0, %v10615_v51 }
 0x490   : > { %6795 = vpow2.f32 %v3122_v34  ;;  %v3670_v35 = vsub.f32 %v9688_v38, %v2950_v10  ;;  %v4685_v59 = vsel %vm9780_vm0, %v2966_v13, 0  ;;  %v6774_v57 = vpop.eup %6773  ;;  %v3524_v21 = vadd.f32 %v9767_v15, %v3428_v23  ;;  %v10638_v10 = vld [vmem:[#allocation134_spill] sm:$0xff]  ;;  %v10639_v13 = vld [vmem:[#allocation128_spill] sm:$0xff] }
 0x491   : > { %6797 = vpow2.f32 %v3218_v24  ;;  %v3506_v58 = vmul.f32 1.442695, %v3478_v7  ;;  %4701 = vst [vmem:[%s8890_s27 + $0x60] sm:$0xff] %v4685_v59  ;;  %v9798_v6 = vadd.s32 120, %v7790_v9  ;;  %v3762_v63 = vmul.f32 %v6774_v57, %v9665_v41  ;;  %v10640_v24 = vld [vmem:[#allocation135_spill] sm:$0xff] }
 0x492   : > { %6799 = vpow2.f32 %v3314_v53  ;;  %v3602_v25 = vmul.f32 1.442695, %v3574_v55  ;;  %v3698_v49 = vmul.f32 1.442695, %v3670_v35  ;;  %v3620_v38 = vadd.f32 %v9772_v20, %v3524_v21  ;;  %v6477_v21 = vpop.f32.mrf.mxu0 }
 0x493   : > { %v9801_v30 = vpop.eup %6775  ;;  %6801 = vpow2.f32 %v3410_v44  ;;  %v9809_v34 = vsel %vm2723_vm12, %v10639_v13, %v10638_v10  ;;  %v9815_v41 = vsel %vm2723_vm12, 6, %v10640_v24  ;;  %v3794_v23 = vmul.f32 %v9573_v3, %v3762_v63 }
 0x494   : > { %v9817_v53 = vpop.eup %6777  ;;  %v3906_v22 = vmul.f32 %v9585_v62, %v3762_v63  ;;  %v4019_v44 = vmul.f32 %v9594_v47, %v3762_v63  ;;  %v4132_v7 = vmul.f32 %v9597_v56, %v3762_v63  ;;  %v4245_v55 = vmul.f32 %v9604_v26, %v3762_v63 }
 0x495   : > { %v9823_v40 = vpop.eup %6779  ;;  %v4358_v35 = vmul.f32 %v9610_v50, %v3762_v63  ;;  %v4471_v59 = vmul.f32 %v9616_v17, %v3762_v63  ;;  %v4584_v57 = vmul.f32 %v9627_v4, %v3762_v63  ;;  %v5470_v62 = vpack.c.bf16 %v9698_v32, %v3794_v23  ;;  %v10643_v23 = vld [vmem:[#allocation139_spill] sm:$0xff] }
 0x496   : > { %v9829_v3 = vpop.eup %6781  ;;  %v5510_v47 = vpack.c.bf16 %v9701_v37, %v3906_v22  ;;  %v5550_v56 = vpack.c.bf16 %v9704_v45, %v4019_v44  ;;  %v5590_v26 = vpack.c.bf16 %v9707_v36, %v4132_v7  ;;  %v5630_v17 = vpack.c.bf16 %v9712_v60, %v4245_v55 }
 0x497   : > { %v9835_v50 = vpop.eup %6783  ;;  %v5670_v4 = vpack.c.bf16 %v9715_v52, %v4358_v35  ;;  %v5710_v63 = vpack.c.bf16 %v9718_v43, %v4471_v59  ;;  %v5750_v32 = vpack.c.bf16 %v9721_v61, %v4584_v57  ;;  %5770 = vst [vmem:[%s9209_s10 + $0x20] sm:$0xff] %v5470_v62   ;;  %v3716_v45 = vadd.f32 %v9784_v29, %v3620_v38  ;;  %v10641_v43 = vld [vmem:[#allocation138_spill] sm:$0xff]  ;;  %v10642_v61 = vld [vmem:[#allocation131_spill] sm:$0xff] }
 0x498   : > { %v9841_v37 = vpop.eup %6785  ;;  %5778 = vst [vmem:[%s9209_s10 + $0x60] sm:$0xff] %v5510_v47   ;;  %5786 = vst [vmem:[%s9209_s10 + $0xa0] sm:$0xff] %v5550_v56   ;;  %v3143_v36 = vadd.f32 %v9817_v53, %v9801_v30  ;;  %6803 = vpow2.f32 %v3506_v58  ;;  %v9855_v52 = vadd.f32 %v6477_v21, %v10485_v28  ;;  %v9862_v10 = vsel %vm2722_vm6, %v10642_v61, %v10641_v43  ;;  %v10644_v47 = vld [vmem:[#allocation30_spill] sm:$0xff]  ;;  %v10649_v43 = vld [vmem:[#allocation129_spill] sm:$0xff] }
 0x499   : > { %5794 = vst [vmem:[%s9209_s10 + $0xe0] sm:$0xff] %v5590_v26   ;;  %v6788_v60 = vpop.eup %6787  ;;  %5802 = vst [vmem:[%s9209_s10 + $0x120] sm:$0xff] %v5630_v17   ;;  %6805 = vpow2.f32 %v3602_v25  ;;  %v2754_v25 = vsel %vm2722_vm6, 6, %v10643_v23  ;;  %vm1225_vm12 = vcmp.lt.s32.totalorder %v9798_v6, %v7968_v12  ;;  %v9878_v44 = vadd.s32 112, %v7790_v9  ;;  %v10645_v26 = vld [vmem:[#allocation64_spill] sm:$0xff]  ;;  %v10646_v17 = vld [vmem:[#allocation49_spill] sm:$0xff] }
 0x49a   : > { %5810 = vst [vmem:[%s9209_s10 + $0x160] sm:$0xff] %v5670_v4   ;;  %5818 = vst [vmem:[%s9209_s10 + $0x1a0] sm:$0xff] %v5710_v63   ;;  %v9864_v38 = vpop.eup %6789  ;;  %v3765_v24 = vmul.f32 %v6788_v60, %v4935_v11  ;;  %6807 = vrcp.f32 %v3716_v45  ;;  %v3239_v58 = vadd.f32 %v9823_v40, %v3143_v36  ;;  %vm2937_vm1 = vcmp.gt.f32.partialorder %v9855_v52, %v9809_v34  ;;  %v10647_v63 = vld [vmem:[#allocation94_spill] sm:$0xff]  ;;  %v10648_v36 = vld [vmem:[#allocation85_spill] sm:$0xff] }
 0x49b   : > { %5826 = vst [vmem:[%s9209_s10 + $0x1e0] sm:$0xff] %v5750_v32   ;;  %v9871_v22 = vpop.eup %6791  ;;  %6809 = vpow2.f32 %v3698_v49  ;;  %vm9947_vm6 = vmand %vm1225_vm12, %vm8027_vm5  ;;  %vm1224_vm8 = vcmp.lt.s32.totalorder %v9878_v44, %v7968_v12  ;;  %v10658_v12 = vld [vmem:[#allocation87_spill] sm:$0xff] }
 0x49c   : > { %v9880_v11 = vpop.eup %6793  ;;  %v9883_v7 = vmul.f32 %v9633_v39, %v3765_v24  ;;  %v9886_v55 = vmul.f32 %v9657_v0, %v3765_v24  ;;  %v9889_v35 = vmul.f32 %v9667_v54, %v3765_v24  ;;  %v9892_v49 = vmul.f32 %v9672_v16, %v3765_v24  ;;  %vm10014_vm7 = vmand %vm1224_vm8, %vm8027_vm5 }
 0x49d   : > { %v9894_v59 = vpop.eup %6795  ;;  %v9897_v57 = vmul.f32 %v9679_v14, %v3765_v24  ;;  %v9900_v9 = vmul.f32 %v9690_v19, %v3765_v24  ;;  %v9903_v39 = vmul.f32 %v9724_v31, %v3765_v24  ;;  %v9906_v0 = vmul.f32 %v9729_v46, %v3765_v24  ;;  %v2896_v31 = vpop.f32.mrf.mxu0 }
 0x49e   : > { %v9908_v62 = vpop.eup %6797  ;;  %v3335_v54 = vadd.f32 %v9829_v3, %v3239_v58  ;;  %v3142_v16 = vadd.f32 %v9894_v59, %v9880_v11  ;;  %v9918_v14 = vsel %vm2937_vm1, %v9855_v52, %v9809_v34  ;;  %v2969_v19 = vsel %vm2937_vm1, 7, %v9815_v41 }
 0x49f   : > { %v9924_v46 = vpop.eup %6799  ;;  %v3001_v56 = vsub.f32 %v10644_v47, %v9918_v14  ;;  %v3097_v21 = vsub.f32 %v10645_v26, %v9918_v14  ;;  %v3193_v4 = vsub.f32 %v10646_v17, %v9918_v14  ;;  %v3289_v32 = vsub.f32 %v10647_v63, %v9918_v14 }
 0x4a0   : > { %v9934_v45 = vpop.eup %6801  ;;  %v3431_v34 = vadd.f32 %v9835_v50, %v3335_v54  ;;  %v3238_v41 = vadd.f32 %v9908_v62, %v3142_v16  ;;  %v3385_v60 = vsub.f32 %v10648_v36, %v9918_v14  ;;  %v3481_v24 = vsub.f32 %v10649_v43, %v9918_v14 }
 0x4a1   : > { %v3032_v23 = vmul.f32 1.442695, %v3001_v56  ;;  %v3128_v54 = vmul.f32 1.442695, %v3097_v21  ;;  %v3577_v16 = vsub.f32 %v10639_v13, %v9918_v14  ;;  %v9954_v47 = vadd.f32 %v2896_v31, %v10485_v28 }
 0x4a2   : > { %v3527_v26 = vadd.f32 %v9841_v37, %v3431_v34  ;;  %v3334_v17 = vadd.f32 %v9924_v46, %v3238_v41  ;;  %v3224_v63 = vmul.f32 1.442695, %v3193_v4  ;;  %v3320_v6 = vmul.f32 1.442695, %v3289_v32  ;;  %v10652_v41 = vld [vmem:[#allocation32_spill] sm:$0xff] }
 0x4a3   : > { %6811 = vpow2.f32 %v3032_v23  ;;  %v4688_v56 = vsel %vm9947_vm6, %v2969_v19, 0  ;;  %v4934_v28 = vsel %vm9623_vm10, 1.0, %v10615_v51  ;;  %v3416_v13 = vmul.f32 1.442695, %v3385_v60  ;;  %v10653_v23 = vld [vmem:[#allocation66_spill] sm:$0xff] }
 0x4a4   : > { %v3623_v36 = vadd.f32 %v9864_v38, %v3527_v26  ;;  %v3430_v43 = vadd.f32 %v9934_v45, %v3334_v17  ;;  %6813 = vpow2.f32 %v3128_v54  ;;  %4704 = vst [vmem:[%s8890_s27 + $0x78] sm:$0xff] %v4688_v56  ;;  %vm2936_vm2 = vcmp.gt.f32.partialorder %v9954_v47, %v9862_v10 }
 0x4a5   : > { %v9962_v21 = vpop.eup %6803  ;;  %6815 = vpow2.f32 %v3224_v63  ;;  %v9978_v32 = vsel %vm2936_vm2, %v9954_v47, %v9862_v10  ;;  %v2968_v34 = vsel %vm2936_vm2, 7, %v2754_v25  ;;  %v10654_v10 = vld [vmem:[#allocation51_spill] sm:$0xff]  ;;  %v3608_v25 = vmul.f32 1.442695, %v3577_v16 }
 0x4a6   : > { %v9972_v31 = vpop.eup %6805  ;;  %v3719_v4 = vadd.f32 %v9871_v22, %v3623_v36  ;;  %v3526_v19 = vadd.f32 %v9962_v21, %v3430_v43  ;;  %6817 = vpow2.f32 %v3320_v6  ;;  %v3000_v60 = vsub.f32 %v10652_v41, %v9978_v32  ;;  %v10655_v43 = vld [vmem:[#allocation97_spill] sm:$0xff] }
 0x4a7   : > { %v6808_v48 = vpop.eup %6807  ;;  %v3096_v54 = vsub.f32 %v10653_v23, %v9978_v32  ;;  %v3192_v36 = vsub.f32 %v10654_v10, %v9978_v32  ;;  %v3512_v6 = vmul.f32 1.442695, %v3481_v24  ;;  %v3288_v56 = vsub.f32 %v10655_v43, %v9978_v32 }
 0x4a8   : > { %v9984_v26 = vpop.eup %6809  ;;  %v3764_v17 = vmul.f32 %v6808_v48, %v4934_v28  ;;  %6819 = vrcp.f32 %v3719_v4  ;;  %v3622_v63 = vadd.f32 %v9972_v31, %v3526_v19  ;;  %v3384_v42 = vsub.f32 %v10658_v12, %v9978_v32 }
 0x4a9   : > { %6821 = vpow2.f32 %v3416_v13 }
 0x4aa   : > { %v3796_v41 = vmul.f32 %v9742_v33, %v3764_v17  ;;  %v3908_v23 = vmul.f32 %v9744_v8, %v3764_v17  ;;  %v4021_v28 = vmul.f32 %v9747_v5, %v3764_v17  ;;  %v4134_v4 = vmul.f32 %v9755_v2, %v3764_v17 }
 0x4ab   : > { %v4247_v19 = vmul.f32 %v9762_v27, %v3764_v17  ;;  %v4360_v48 = vmul.f32 %v9767_v15, %v3764_v17  ;;  %v4473_v24 = vmul.f32 %v9772_v20, %v3764_v17  ;;  %v4586_v16 = vmul.f32 %v9784_v29, %v3764_v17 }
 0x4ac   : > { %v5475_v33 = vpack.c.bf16 %v9883_v7, %v3796_v41  ;;  %v5515_v8 = vpack.c.bf16 %v9886_v55, %v3908_v23  ;;  %v5555_v5 = vpack.c.bf16 %v9889_v35, %v4021_v28  ;;  %v5595_v2 = vpack.c.bf16 %v9892_v49, %v4134_v4 }
 0x4ad   : > { %v5635_v27 = vpack.c.bf16 %v9897_v57, %v4247_v19  ;;  %v5675_v15 = vpack.c.bf16 %v9900_v9, %v4360_v48  ;;  %v5715_v20 = vpack.c.bf16 %v9903_v39, %v4473_v24  ;;  %v5755_v29 = vpack.c.bf16 %v9906_v0, %v4586_v16 }
 0x4ae   : > { %5771 = vst [vmem:[%s9209_s10 + $0x28] sm:$0xff] %v5475_v33   ;;  %5779 = vst [vmem:[%s9209_s10 + $0x68] sm:$0xff] %v5515_v8   ;;  %v3718_v55 = vadd.f32 %v9984_v26, %v3622_v63  ;;  %6823 = vpow2.f32 %v3512_v6  ;;  %v3673_v35 = vsub.f32 %v9855_v52, %v9918_v14  ;;  %v3030_v49 = vmul.f32 1.442695, %v3000_v60  ;;  %v10659_v52 = vld [vmem:[#allocation133_spill] sm:$0xff] }
 0x4af   : > { %5787 = vst [vmem:[%s9209_s10 + $0xa8] sm:$0xff] %v5555_v5   ;;  %5795 = vst [vmem:[%s9209_s10 + $0xe8] sm:$0xff] %v5595_v2   ;;  %6825 = vpow2.f32 %v3608_v25  ;;  %v3480_v44 = vsub.f32 %v10659_v52, %v9978_v32  ;;  %v3576_v57 = vsub.f32 %v10642_v61, %v9978_v32  ;;  %v3126_v39 = vmul.f32 1.442695, %v3096_v54 }
 0x4b0   : > { %5803 = vst [vmem:[%s9209_s10 + $0x128] sm:$0xff] %v5635_v27   ;;  %5811 = vst [vmem:[%s9209_s10 + $0x168] sm:$0xff] %v5675_v15   ;;  %v10042_v9 = vpop.eup %6811  ;;  %6827 = vrcp.f32 %v3718_v55  ;;  %v4687_v0 = vsel %vm10014_vm7, %v2968_v34, 0  ;;  %v3704_v60 = vmul.f32 1.442695, %v3673_v35 }
 0x4b1   : > { %5819 = vst [vmem:[%s9209_s10 + $0x1a8] sm:$0xff] %v5715_v20   ;;  %5827 = vst [vmem:[%s9209_s10 + $0x1e8] sm:$0xff] %v5755_v29   ;;  %v10046_v14 = vpop.eup %6813 }
 0x4b2   : > { %4703 = vst [vmem:[%s8890_s27 + $0x70] sm:$0xff] %v4687_v0  ;;  %v3145_v13 = vadd.f32 %v10046_v14, %v10042_v9 }
 0x4b3   : > { %6876 = shalt.err (!%p6873_p8)
}
 0x4b4   : > { %s6877_s26 = scalar_lea.hbm %s10028_s19, 2048  ;;  %s6881_s12 = scalar_lea.hbm %s10200_s7, 4096 }
 0x4b5   : > { %p6878_p9 = scmp.ne.s32.totalorder %s10028_s19, %s6877_s26  ;;  %p6882_p0 = scmp.lt.s32.totalorder %s10028_s19, %s10200_s7 }
 0x4b6   : > { %p6883_p1 = scmp.lt.s32.totalorder %s6881_s12, %s6877_s26 }
 0x4b7   : > { %p6879_p12 = pnand %p6878_p9, %p7049_p10 }
 0x4b8   : > { %p6884_p2 = por %p6883_p1, %p6882_p0 }
 0x4b9   : > { %p6880_p13 = pneg %p6879_p12 }
 0x4bb   : > { %p6885_p3 = pnand %p6884_p2, %p6880_p13 }
 0x4bd   : > { %6888 = shalt.err (!%p6885_p3)
}
 0x4be   : > { %s6963_s21 = smov 128   ;;  %s6964_s22 = smov 8   ;;  %v10074_v61 = vpop.eup %6815  ;;  %v4937_v34 = vsel %vm9736_vm13, 1.0, %v10615_v51  ;;  %6829 = vpow2.f32 %v3030_v49  ;;  %v3222_v54 = vmul.f32 1.442695, %v3192_v36  ;;  %v3672_v36 = vsub.f32 %v9954_v47, %v9978_v32 }
 0x4bf   : > { %6479 = dma.vmem_to_hbm [thread:$0]  (%p7049_p10), %s10030_s13, 2048, %s10028_s19, %s4711_s20, %s6963_s21, %s6963_s21, %s6964_s22   ;;  %v10082_v17 = vpop.eup %6817  ;;  %v3241_v63 = vadd.f32 %v10074_v61, %v3145_v13  ;;  %6831 = vpow2.f32 %v3126_v39  ;;  %v3318_v18 = vmul.f32 1.442695, %v3288_v56  ;;  %v3414_v28 = vmul.f32 1.442695, %v3384_v42 }
 0x4c0   : > { %v6820_v6 = vpop.eup %6819  ;;  %6833 = vpow2.f32 %v3704_v60  ;;  %v3510_v10 = vmul.f32 1.442695, %v3480_v44  ;;  %v3606_v47 = vmul.f32 1.442695, %v3576_v57  ;;  %s5445_s13 = sshll.u32 %s7032_s9, 13  ;;  %s4724_s19 = sshll.u32 %s9209_s10, 4  ;;  %s10143_s19 = int_to_ptr.vmem [resolvable:$true] %s4724_s19 }
 0x4c1   : > { %v10085_v25 = vpop.eup %6821  ;;  %v3767_v41 = vmul.f32 %v6820_v6, %v4937_v34  ;;  %v3337_v23 = vadd.f32 %v10082_v17, %v3241_v63  ;;  %6835 = vpow2.f32 %v3222_v54  ;;  %s10141_s23 = scalar_lea.hbm %s10199_s6, %s5445_s13  ;;  %s4706_s24 = scalar_lea.sflag [#allocation6], %s8814_s25 }
 0x4c2   : > { %6837 = vpow2.f32 %v3318_v18  ;;  %v10102_v32 = vpop.eup %6823  ;;  %s6889_s26 = scalar_lea.vmem %s10143_s19, 8192  ;;  %s6965_s27 = smov [#allocation5]  }
 0x4c3   : > { %v3799_v4 = vmul.f32 %v9801_v30, %v3767_v41  ;;  %v3911_v19 = vmul.f32 %v9817_v53, %v3767_v41  ;;  %v4024_v48 = vmul.f32 %v9823_v40, %v3767_v41  ;;  %v4137_v24 = vmul.f32 %v9829_v3, %v3767_v41  ;;  %v6826_v40 = vpop.eup %6825  ;;  %p6890_p4 = scmp.ne.s32.totalorder %s10143_s19, %s6889_s26  ;;  %s6893_s28 = sshll.u32 %s6965_s27, 4  ;;  %s6894_s28 = int_to_ptr.vmem [resolvable:$false] %s6893_s28 }
 0x4c4   : > { %v4250_v16 = vmul.f32 %v9835_v50, %v3767_v41  ;;  %v4363_v33 = vmul.f32 %v9841_v37, %v3767_v41  ;;  %v4476_v43 = vmul.f32 %v9864_v38, %v3767_v41  ;;  %v4589_v56 = vmul.f32 %v9871_v22, %v3767_v41  ;;  %v6828_v50 = vpop.eup %6827  ;;  %s6895_s12 = scalar_lea.vmem %s6894_s28, 16384  ;;  %p6896_p7 = scmp.lt.s32.totalorder %s10143_s19, %s6894_s28 }
 0x4c5   : > { %v3433_v8 = vadd.f32 %v10085_v25, %v3337_v23  ;;  %v4936_v30 = vsel %vm9780_vm0, 1.0, %v10615_v51  ;;  %v3702_v53 = vmul.f32 1.442695, %v3672_v36  ;;  %6839 = vpow2.f32 %v3414_v28  ;;  %p6891_p5 = pnand %p6890_p4, %p7049_p10  ;;  %p6897_p8 = scmp.lt.s32.totalorder %s6895_s12, %s6889_s26 }
 0x4c6   : > { %6841 = vpow2.f32 %v3510_v10  ;;  %v3766_v37 = vmul.f32 %v6828_v50, %v4936_v30  ;;  %v4939_v23 = vsel %vm9947_vm6, 1.0, %v10615_v51 }
 0x4c7   : > { %v3529_v3 = vadd.f32 %v10102_v32, %v3433_v8  ;;  %6843 = vpow2.f32 %v3606_v47  ;;  %p6892_p6 = pneg %p6891_p5  ;;  %p6898_p9 = por %p6897_p8, %p6896_p7 }
 0x4c8   : > { %6845 = vpow2.f32 %v3702_v53  ;;  %v3798_v5 = vmul.f32 %v9880_v11, %v3766_v37  ;;  %v3910_v2 = vmul.f32 %v9894_v59, %v3766_v37  ;;  %v4023_v27 = vmul.f32 %v9908_v62, %v3766_v37 }
 0x4c9   : > { %v3625_v38 = vadd.f32 %v6826_v40, %v3529_v3  ;;  %v4136_v1 = vmul.f32 %v9924_v46, %v3766_v37  ;;  %v4249_v20 = vmul.f32 %v9934_v45, %v3766_v37  ;;  %v4362_v29 = vmul.f32 %v9962_v21, %v3766_v37  ;;  %p6899_p12 = pnand %p6898_p9, %p6892_p6 }
 0x4ca   : > { %v4475_v55 = vmul.f32 %v9972_v31, %v3766_v37  ;;  %v4588_v35 = vmul.f32 %v9984_v26, %v3766_v37  ;;  %v5480_v11 = vpack.c.bf16 %v3799_v4, %v3798_v5  ;;  %v5520_v59 = vpack.c.bf16 %v3911_v19, %v3910_v2 }
 0x4cb   : > { %v6830_v22 = vpop.eup %6829  ;;  %v5560_v62 = vpack.c.bf16 %v4024_v48, %v4023_v27  ;;  %v5600_v46 = vpack.c.bf16 %v4137_v24, %v4136_v1  ;;  %v5640_v12 = vpack.c.bf16 %v4250_v16, %v4249_v20  ;;  %v5680_v42 = vpack.c.bf16 %v4363_v33, %v4362_v29 }
 0x4cc   : > { %v6832_v15 = vpop.eup %6831  ;;  %v5720_v45 = vpack.c.bf16 %v4476_v43, %v4475_v55  ;;  %v5760_v52 = vpack.c.bf16 %v4589_v56, %v4588_v35  ;;  %5772 = vst [vmem:[%s9209_s10 + $0x30] sm:$0xff] %v5480_v11   ;;  %5780 = vst [vmem:[%s9209_s10 + $0x70] sm:$0xff] %v5520_v59   ;;  %v4938_v33 = vsel %vm10014_vm7, 1.0, %v10615_v51 }
 0x4cd   : > { %v6834_v49 = vpop.eup %6833  ;;  %5788 = vst [vmem:[%s9209_s10 + $0xb0] sm:$0xff] %v5560_v62   ;;  %5796 = vst [vmem:[%s9209_s10 + $0xf0] sm:$0xff] %v5600_v46   ;;  %v3144_v31 = vadd.f32 %v6832_v15, %v6830_v22 }
 0x4ce   : > { %v6836_v44 = vpop.eup %6835  ;;  %v3721_v21 = vadd.f32 %v6834_v49, %v3625_v38  ;;  %5804 = vst [vmem:[%s9209_s10 + $0x130] sm:$0xff] %v5640_v12   ;;  %5812 = vst [vmem:[%s9209_s10 + $0x170] sm:$0xff] %v5680_v42  }
 0x4cf   : > { %5820 = vst [vmem:[%s9209_s10 + $0x1b0] sm:$0xff] %v5720_v45   ;;  %5828 = vst [vmem:[%s9209_s10 + $0x1f0] sm:$0xff] %v5760_v52   ;;  %v3240_v26 = vadd.f32 %v6836_v44, %v3144_v31  ;;  %v6838_v57 = vpop.eup %6837 }
 0x4d0   : > { %6847 = vrcp.f32 %v3721_v21 }
 0x4d1   : > { %v3336_v39 = vadd.f32 %v6838_v57, %v3240_v26 }
 0x4d2   : > { %v6840_v0 = vpop.eup %6839 }
 0x4d3   : > { %v6842_v13 = vpop.eup %6841  ;;  %v3432_v60 = vadd.f32 %v6840_v0, %v3336_v39 }
 0x4d4   : > { %v6844_v34 = vpop.eup %6843 }
 0x4d5   : > { %v6846_v54 = vpop.eup %6845  ;;  %v3528_v63 = vadd.f32 %v6842_v13, %v3432_v60 }
 0x4d7   : > { %v3624_v6 = vadd.f32 %v6844_v34, %v3528_v63 }
 0x4d9   : > { %v3720_v41 = vadd.f32 %v6846_v54, %v3624_v6 }
 0x4db   : > { %6849 = vrcp.f32 %v3720_v41 }
 0x4dd   : > { %v6848_v18 = vpop.eup %6847 }
 0x4de   : > { %v3769_v28 = vmul.f32 %v6848_v18, %v4939_v23 }
 0x4e0   : > { %v3801_v10 = vmul.f32 %v10042_v9, %v3769_v28  ;;  %v3913_v36 = vmul.f32 %v10046_v14, %v3769_v28  ;;  %v4026_v4 = vmul.f32 %v10074_v61, %v3769_v28  ;;  %v4139_v19 = vmul.f32 %v10082_v17, %v3769_v28 }
 0x4e1   : > { %v4252_v48 = vmul.f32 %v10085_v25, %v3769_v28  ;;  %v4365_v24 = vmul.f32 %v10102_v32, %v3769_v28  ;;  %v4478_v16 = vmul.f32 %v6826_v40, %v3769_v28  ;;  %v4591_v58 = vmul.f32 %v6834_v49, %v3769_v28 }
 0x4e8   : > { %v6850_v43 = vpop.eup %6849 }
 0x4e9   : > { %v3768_v56 = vmul.f32 %v6850_v43, %v4938_v33 }
 0x4eb   : > { %v3800_v9 = vmul.f32 %v6830_v22, %v3768_v56  ;;  %v3912_v14 = vmul.f32 %v6832_v15, %v3768_v56  ;;  %v4025_v8 = vmul.f32 %v6836_v44, %v3768_v56  ;;  %v4138_v61 = vmul.f32 %v6838_v57, %v3768_v56 }
 0x4ec   : > { %v4251_v17 = vmul.f32 %v6840_v0, %v3768_v56  ;;  %v4364_v25 = vmul.f32 %v6842_v13, %v3768_v56  ;;  %v4477_v47 = vmul.f32 %v6844_v34, %v3768_v56  ;;  %v4590_v32 = vmul.f32 %v6846_v54, %v3768_v56 }
 0x4ed   : > { %v5485_v7 = vpack.c.bf16 %v3801_v10, %v3800_v9  ;;  %v5525_v51 = vpack.c.bf16 %v3913_v36, %v3912_v14  ;;  %v5565_v30 = vpack.c.bf16 %v4026_v4, %v4025_v8  ;;  %v5605_v53 = vpack.c.bf16 %v4139_v19, %v4138_v61 }
 0x4ee   : > { %v5645_v40 = vpack.c.bf16 %v4252_v48, %v4251_v17  ;;  %v5685_v3 = vpack.c.bf16 %v4365_v24, %v4364_v25  ;;  %v5725_v50 = vpack.c.bf16 %v4478_v16, %v4477_v47  ;;  %v5765_v37 = vpack.c.bf16 %v4591_v58, %v4590_v32 }
 0x4ef   : > { %5773 = vst [vmem:[%s9209_s10 + $0x38] sm:$0xff] %v5485_v7   ;;  %5781 = vst [vmem:[%s9209_s10 + $0x78] sm:$0xff] %v5525_v51  }
 0x4f0   : > { %5789 = vst [vmem:[%s9209_s10 + $0xb8] sm:$0xff] %v5565_v30   ;;  %5797 = vst [vmem:[%s9209_s10 + $0xf8] sm:$0xff] %v5605_v53  }
 0x4f1   : > { %5805 = vst [vmem:[%s9209_s10 + $0x138] sm:$0xff] %v5645_v40   ;;  %5813 = vst [vmem:[%s9209_s10 + $0x178] sm:$0xff] %v5685_v3  }
 0x4f2   : > { %5821 = vst [vmem:[%s9209_s10 + $0x1b8] sm:$0xff] %v5725_v50   ;;  %5829 = vst [vmem:[%s9209_s10 + $0x1f8] sm:$0xff] %v5765_v37  }
 0x4f3   : > { %6902 = shalt.err (!%p6899_p12)
}
 0x4f4   : > { %s6903_s10 = scalar_lea.hbm %s10141_s23, 8192  ;;  %s6907_s21 = scalar_lea.hbm %s10199_s6, 16384 }
 0x4f5   : > { %p6904_p13 = scmp.ne.s32.totalorder %s10141_s23, %s6903_s10  ;;  %p6908_p2 = scmp.lt.s32.totalorder %s10141_s23, %s10199_s6 }
 0x4f6   : > { %p6909_p3 = scmp.lt.s32.totalorder %s6907_s21, %s6903_s10 }
 0x4f7   : > { %p6905_p0 = pnand %p6904_p13, %p7049_p10 }
 0x4f8   : > { %p6910_p4 = por %p6909_p3, %p6908_p2 }
 0x4f9   : > { %p6906_p1 = pneg %p6905_p0 }
 0x4fb   : > { %p6911_p5 = pnand %p6910_p4, %p6906_p1 }
 0x4fd   : > { %6914 = shalt.err (!%p6911_p5)
}
 0x4fe   : > { %s6966_s9 = smov 64   ;;  %s6967_s20 = smov 4  }
 0x4ff   : > { %6478 = dma.vmem_to_hbm [thread:$0]  (%p7049_p10), %s10143_s19, 8192, %s10141_s23, %s4706_s24, %s6966_s9, %s6966_s9, %s6967_s20  }
 0x500 PF: > { %p6489_p6 = scmp.ge.s32.totalorder %s6955_s8, 2  ;;  %s4755_s26 = sand.u32 1, %s6943_s29  }
 0x501   : > { %s4756_s27 = scalar_lea.sflag [#allocation6], %s4755_s26 }
 0x502   : > { %p6483_p7 = pnand %p6489_p6, %p7053_p11 }
 0x504   : > { %p6484_p8 = pneg %p6483_p7 }
 0x506   : > { %6934 = dma.done.wait (%p6484_p8), %s4756_s27, 8192  }
 0x507   : > { %6936 = vsyncadd (%p6484_p8), %s4756_s27, 4294959104  ;;  %s4765_s28 = scalar_lea.sflag [#allocation8], %s4755_s26 }
 0x508   : > { %6938 = dma.done.wait (%p6484_p8), %s4765_s28, 2048  }
 0x509   : > { %6940 = vsyncadd (%p6484_p8), %s4765_s28, 4294965248  ;;  %p27_p10 = scmp.ge.s32.totalorder %s7036_s11, 4   ;;  %s10660_s29 = smov %s6947_s0 }
 0x50a   : > { %s10661_s0 = smov %s6951_s30  ;;  %s10662_s30 = smov %s7047_s14 }
 0x50b   : > { %s10663_s8 = smov %s7036_s11  ;;  %29 = sbr.rel (!%p27_p10) target bundleno = 20 (0x14), region = 106 }
 0x510   :  { %4770 = vsyncpa [#allocation6], 1 }
 0x511   :  { %4772 = vsyncpa [#allocation6 + $0x1], 1 }
 0x512   :  { %4773 = vsyncpa [#allocation8], 1 }
 0x513   :  { %4775 = vsyncpa [#allocation8 + $0x1], 1 }

</bundles_post_ra>
